<compile_context>
chip_gen: v5e
topology: v5e:2x2
jax: 0.10.0
libtpu: 0.0.40
codegen_flags: <defaults>
</compile_context>

<pallas_src>
import numpy as np
import jax
import jax.numpy as jnp
from jax.experimental import pallas as pl
from jax.experimental.pallas import tpu as pltpu


# ----------------------------------------------------------------------------
# pltpu.roll direction probe (falls back to jnp.roll if unavailable)
# ----------------------------------------------------------------------------
def _probe_roll_mode():
    """Returns -1 if pltpu.roll follows jnp.roll convention, +1 if opposite,
    0 if pltpu.roll is unusable (then jnp.roll is used inside the kernel)."""
    try:
        n = 256
        x_np = np.arange(8 * n, dtype=np.float32).reshape(8, n)

        def k(x_ref, o_ref):
            o_ref[...] = pltpu.roll(x_ref[...], 3, axis=1)

        y = np.asarray(pl.pallas_call(
            k, out_shape=jax.ShapeDtypeStruct((8, n), jnp.float32)
        )(jnp.asarray(x_np)))
        if np.array_equal(y, np.roll(x_np, 3, axis=1)):
            return -1
        if np.array_equal(y, np.roll(x_np, -3, axis=1)):
            return 1
    except Exception:
        pass
    return 0


_ROLL_MODE = _probe_roll_mode()


# ----------------------------------------------------------------------------
# Fused Pallas kernel
# ----------------------------------------------------------------------------
def _build_exchange_kernel(W, HWe, roll_mode):
    def shift_lanes(x, s):
        # out[:, p] == x[:, (p + s) mod HWe]; wrapped positions are zeroed by
        # the per-tap boundary mask afterwards.
        sm = s % HWe
        if sm == 0:
            return x
        if roll_mode == -1:                       # pltpu.roll == jnp.roll
            return pltpu.roll(x, HWe - sm, axis=1)
        if roll_mode == 1:                        # opposite convention
            return pltpu.roll(x, sm, axis=1)
        return jnp.roll(x, -sm, axis=1)           # safe fallback

    def kernel(masks_ref, base_ref,
               w_l1, w_i2, w_l2, w_i3, w_l3, w_i4, w_l4, w_l5,
               out_ref):
        base = base_ref[0]                        # (C1+C2, HWe) f32

        def conv3x3(x, w_ref):
            # x: (Cin, HWe) f32; w_ref: (9, Cout_fused, Cin) bf16.
            acc = None
            for dh in range(3):
                for dw in range(3):
                    t = 3 * dh + dw
                    s = (dh - 1) * W + (dw - 1)
                    if t == 4:                    # center tap: no shift/mask
                        tap = x
                    else:
                        tap = shift_lanes(x, s) * masks_ref[t]
                    c = jnp.dot(w_ref[t], tap.astype(jnp.bfloat16),
                                preferred_element_type=jnp.float32)
                    acc = c if acc is None else acc + c
            return jnp.maximum(acc, 0.0)

        def conv1x1(x, w_ref):
            return jnp.maximum(
                jnp.dot(w_ref[...], x.astype(jnp.bfloat16),
                        preferred_element_type=jnp.float32), 0.0)

        # Layer 1: fused [x1; x1c; y1; y1t] from [t1; t2].
        L1 = conv3x3(base, w_l1)
        feats = jnp.concatenate([base, L1], axis=0)

        # Layers 2..4: fused 1x1 "input" conv then fused 3x3 conv.
        L2 = conv3x3(conv1x1(feats, w_i2), w_l2)
        feats = jnp.concatenate([feats, L2], axis=0)
        L3 = conv3x3(conv1x1(feats, w_i3), w_l3)
        feats = jnp.concatenate([feats, L3], axis=0)
        L4 = conv3x3(conv1x1(feats, w_i4), w_l4)
        feats = jnp.concatenate([feats, L4], axis=0)

        # Layer 5: fused [x5; y5] from the full feature stack.
        out5 = conv3x3(feats, w_l5)               # (C1+C2, HWe)

        # Fused residual epilogue, single full-sublane packed store.
        out_ref[0] = (0.4 * out5 + base).astype(out_ref.dtype)

    return kernel


def _build_tap_masks(H, W, NB):
    HW = H * W
    idx = jnp.arange(HW, dtype=jnp.int32)
    h, w = idx // W, idx % W
    rows = []
    for dh in range(3):
        for dw in range(3):
            hh, ww = h + (dh - 1), w + (dw - 1)
            valid = (hh >= 0) & (hh < H) & (ww >= 0) & (ww < W)
            rows.append(valid.astype(jnp.float32))
    m = jnp.stack(rows)                           # (9, HW)
    m = jnp.tile(m, (1, NB))                      # same pattern per image
    return m.reshape(9, 1, NB * HW)


def exchange_pallas(packed, ten1, ten2, *, images_per_step=1):
    """Fused forward. `packed` is the list from pack_fused_weights()."""
    N, C1, H, W = ten1.shape
    C2 = ten2.shape[1]
    HW = H * W
    NB = images_per_step
    assert N % NB == 0, "batch must be divisible by images_per_step"
    G = N // NB
    HWe = NB * HW
    Cb = C1 + C2

    # Channels-first, lane-dense (Cb, NB*HW) slab per grid step.
    base = jnp.concatenate([ten1, ten2], axis=1).reshape(N, Cb, HW)
    base = base.reshape(G, NB, Cb, HW).transpose(0, 2, 1, 3).reshape(G, Cb, HWe)
    masks = _build_tap_masks(H, W, NB)

    cmap3 = lambda g: (0, 0, 0)
    cmap2 = lambda g: (0, 0)
    in_specs = [pl.BlockSpec(masks.shape, cmap3),
                pl.BlockSpec((1, Cb, HWe), lambda g: (g, 0, 0))]
    for wgt in packed:
        in_specs.append(pl.BlockSpec(wgt.shape,
                                     cmap3 if wgt.ndim == 3 else cmap2))

    out = pl.pallas_call(
        _build_exchange_kernel(W, HWe, _ROLL_MODE),
        grid=(G,),
        in_specs=in_specs,
        out_specs=pl.BlockSpec((1, Cb, HWe), lambda g: (g, 0, 0)),
        out_shape=jax.ShapeDtypeStruct((G, Cb, HWe), ten1.dtype),
        compiler_params=pltpu.CompilerParams(
            dimension_semantics=("parallel",)),
    )(masks, base, *packed)

    out = out.reshape(G, Cb, NB, HW).transpose(0, 2, 1, 3).reshape(N, Cb, H, W)
    return out[:, :C1], out[:, C1:]


exchange_apply = jax.jit(exchange_pallas, static_argnames=("images_per_step",))


# ----------------------------------------------------------------------------
# Parameters (deterministic, PyTorch layouts) + host-side fused weight packing
# ----------------------------------------------------------------------------
def _uniform(key, shape, bound):
    return jax.random.uniform(key, shape, jnp.float32, -bound, bound)


def init_raw_params(key, scale1, scale2, k_1, k_2):
    layers1 = [scale1, scale1 + 2 * k_1, scale1 + 3 * k_1,
               scale1 + 4 * k_1, scale1 + 5 * k_1]
    layers2 = [scale2, scale2 + k_2 + k_1, scale2 + 2 * k_2 + k_1,
               scale2 + 3 * k_2 + k_1, scale2 + 4 * k_2 + k_1]
    specs = {
        'x1': ('conv', scale1, k_1, 3), 'y1': ('conv', scale2, k_2, 3),
        'x1c': ('conv', scale1, k_1, 3), 'y1t': ('convT', scale2, k_1, 3),
        'x2_input': ('conv', layers1[1], k_1, 1), 'y2_input': ('conv', layers2[1], k_2, 1),
        'x2': ('conv', k_1, k_1, 3), 'y2': ('conv', k_2, k_2, 3),
        'x2c': ('conv', k_1, k_1, 3), 'y2t': ('convT', k_2, k_1, 3),
        'x3_input': ('conv', layers1[2], k_1, 1), 'y3_input': ('conv', layers2[2], k_2, 1),
        'x3': ('conv', k_1, k_1, 3), 'y3': ('conv', k_2, k_2, 3),
        'x3c': ('conv', k_1, k_1, 3), 'y3t': ('convT', k_2, k_1, 3),
        'x4_input': ('conv', layers1[3], k_1, 1), 'y4_input': ('conv', layers2[3], k_2, 1),
        'x4': ('conv', k_1, k_1, 3), 'y4': ('conv', k_2, k_2, 3),
        'x4c': ('conv', k_1, k_1, 3), 'y4t': ('convT', k_2, k_1, 3),
        # NOTE: x5_input / y5_input exist in __init__ but are unused in forward.
        'x5': ('conv', layers1[4], scale1, 3), 'y5': ('conv', layers2[4], scale2, 3),
    }
    params = {}
    keys = jax.random.split(key, len(specs))
    for (name, (kind, cin, cout, ksz)), kk in zip(sorted(specs.items()), keys):
        if kind == 'conv':          # torch Conv2d weight (cout, cin, k, k)
            bound = 1.0 / float(cin * ksz * ksz) ** 0.5
            params[name] = _uniform(kk, (cout, cin, ksz, ksz), bound)
        else:                       # torch ConvTranspose2d weight (cin, cout, k, k)
            bound = 1.0 / float(cout * ksz * ksz) ** 0.5
            params[name] = _uniform(kk, (cin, cout, ksz, ksz), bound)
    return params


def convT_to_oihw(w_t):
    # ConvTranspose2d(k=3, s=1, p=1) == Conv2d(k=3, p=1) with spatial flip and
    # in/out channel swap.
    return jnp.transpose(jnp.flip(w_t, axis=(2, 3)), (1, 0, 2, 3))


def pack_fused_weights(rp, scale1, scale2, k1, k2):
    """Fuse sibling convs and the x/y paths into per-layer block weights.

    Activation row layouts used by the kernel:
      base = [t1 (C1); t2 (C2)]
      L_l  = [x_l (k1); x_lc (k1); y_l (k2); y_lt (k1)]         (l = 1..4)
      Pin_l = [x_l_in (k1); y_l_in (k2)]                        (l = 2..4)
      feats = concat([base, L1, ..., L_l])
    """
    C1, C2 = scale1, scale2
    Cb = C1 + C2
    CL = 3 * k1 + k2
    P = k1 + k2

    def taps(w_oihw):               # (Cout, Cin, 3, 3) -> (9, Cout, Cin)
        co, ci = w_oihw.shape[0], w_oihw.shape[1]
        return jnp.transpose(w_oihw, (2, 3, 0, 1)).reshape(9, co, ci)

    def off_L(j):                   # column offset of L_j inside feats
        return Cb + (j - 1) * CL

    # ---- layer 1 (3x3): rows [x1; x1c; y1; y1t], cols [t1; t2]
    w = jnp.zeros((CL, Cb, 3, 3), jnp.float32)
    w = w.at[0:k1, 0:C1].set(rp['x1'])
    w = w.at[k1:2 * k1, 0:C1].set(rp['x1c'])
    w = w.at[2 * k1:2 * k1 + k2, C1:Cb].set(rp['y1'])
    w = w.at[2 * k1 + k2:CL, C1:Cb].set(convT_to_oihw(rp['y1t']))
    w_l1 = taps(w)

    def layer_conv(l):              # layers 2..4 3x3: input Pin_l
        w = jnp.zeros((CL, P, 3, 3), jnp.float32)
        w = w.at[0:k1, 0:k1].set(rp[f'x{l}'])
        w = w.at[k1:2 * k1, 0:k1].set(rp[f'x{l}c'])
        w = w.at[2 * k1:2 * k1 + k2, k1:P].set(rp[f'y{l}'])
        w = w.at[2 * k1 + k2:CL, k1:P].set(convT_to_oihw(rp[f'y{l}t']))
        return taps(w)

    def input_conv(l):              # fused 1x1: rows [x_l_in; y_l_in], cols feats
        A = Cb + (l - 1) * CL
        w = jnp.zeros((P, A), jnp.float32)
        wx = rp[f'x{l}_input'][:, :, 0, 0]
        wy = rp[f'y{l}_input'][:, :, 0, 0]
        # x-side concat order: [ten1, x1..x_{l-1}, y_{l-1}t]
        w = w.at[0:k1, 0:C1].set(wx[:, 0:C1])
        col = C1
        for j in range(1, l):
            w = w.at[0:k1, off_L(j):off_L(j) + k1].set(wx[:, col:col + k1])
            col += k1
        o = off_L(l - 1) + 2 * k1 + k2
        w = w.at[0:k1, o:o + k1].set(wx[:, col:col + k1])
        # y-side concat order: [ten2, y1..y_{l-1}, x_{l-1}c]
        w = w.at[k1:P, C1:Cb].set(wy[:, 0:C2])
        col = C2
        for j in range(1, l):
            w = w.at[k1:P, off_L(j) + 2 * k1:off_L(j) + 2 * k1 + k2].set(
                wy[:, col:col + k2])
            col += k2
        o = off_L(l - 1) + k1
        w = w.at[k1:P, o:o + k1].set(wy[:, col:col + k1])
        return w

    # ---- layer 5 (3x3): rows [x5 (C1); y5 (C2)], cols = feats (Cb + 4*CL)
    A5 = Cb + 4 * CL
    w = jnp.zeros((Cb, A5, 3, 3), jnp.float32)
    wx5, wy5 = rp['x5'], rp['y5']
    w = w.at[0:C1, 0:C1].set(wx5[:, 0:C1])
    col = C1
    for j in range(1, 5):
        w = w.at[0:C1, off_L(j):off_L(j) + k1].set(wx5[:, col:col + k1])
        col += k1
    o = off_L(4) + 2 * k1 + k2
    w = w.at[0:C1, o:o + k1].set(wx5[:, col:col + k1])
    w = w.at[C1:Cb, C1:Cb].set(wy5[:, 0:C2])
    col = C2
    for j in range(1, 5):
        w = w.at[C1:Cb, off_L(j) + 2 * k1:off_L(j) + 2 * k1 + k2].set(
            wy5[:, col:col + k2])
        col += k2
    o = off_L(4) + k1
    w = w.at[C1:Cb, o:o + k1].set(wy5[:, col:col + k1])
    w_l5 = taps(w)

    packed = [w_l1,
              input_conv(2), layer_conv(2),
              input_conv(3), layer_conv(3),
              input_conv(4), layer_conv(4),
              w_l5]
    return [p.astype(jnp.bfloat16) for p in packed]


# ----------------------------------------------------------------------------
# Plain-JAX reference (lax.conv, f32 HIGHEST) for correctness validation
# ----------------------------------------------------------------------------
def _conv_nchw(x, w_oihw, pad):
    return jax.lax.conv_general_dilated(
        x, w_oihw, window_strides=(1, 1), padding=((pad, pad), (pad, pad)),
        dimension_numbers=('NCHW', 'OIHW', 'NCHW'),
        precision=jax.lax.Precision.HIGHEST)


def exchange_reference(rp, ten1, ten2):
    r = lambda v: jnp.maximum(v, 0.0)
    c3 = lambda x, w: r(_conv_nchw(x, w, 1))
    c1 = lambda x, w: r(_conv_nchw(x, w, 0))
    ct = lambda x, w: r(_conv_nchw(x, convT_to_oihw(w), 1))
    cat = lambda xs: jnp.concatenate(xs, axis=1)
    x1, y1 = c3(ten1, rp['x1']), c3(ten2, rp['y1'])
    x1c, y1t = c3(ten1, rp['x1c']), ct(ten2, rp['y1t'])
    x2_in = c1(cat([ten1, x1, y1t]), rp['x2_input'])
    y2_in = c1(cat([ten2, y1, x1c]), rp['y2_input'])
    x2, y2 = c3(x2_in, rp['x2']), c3(y2_in, rp['y2'])
    x2c, y2t = c3(x2_in, rp['x2c']), ct(y2_in, rp['y2t'])
    x3_in = c1(cat([ten1, x1, x2, y2t]), rp['x3_input'])
    y3_in = c1(cat([ten2, y1, y2, x2c]), rp['y3_input'])
    x3, y3 = c3(x3_in, rp['x3']), c3(y3_in, rp['y3'])
    x3c, y3t = c3(x3_in, rp['x3c']), ct(y3_in, rp['y3t'])
    x4_in = c1(cat([ten1, x1, x2, x3, y3t]), rp['x4_input'])
    y4_in = c1(cat([ten2, y1, y2, y3, x3c]), rp['y4_input'])
    x4, y4 = c3(x4_in, rp['x4']), c3(y4_in, rp['y4'])
    x4c, y4t = c3(x4_in, rp['x4c']), ct(y4_in, rp['y4t'])
    x5 = c3(cat([ten1, x1, x2, x3, x4, y4t]), rp['x5'])
    y5 = c3(cat([ten2, y1, y2, y3, y4, x4c]), rp['y5'])
    return 0.4 * x5 + ten1, 0.4 * y5 + ten2


# ----------------------------------------------------------------------------
if __name__ == "__main__":
    scale1, scale2, k_1, k_2 = 4, 4, 4, 4
    N, H, W = 2, 16, 16

    key = jax.random.PRNGKey(0)
    kp, ka, kb = jax.random.split(key, 3)
    raw = init_raw_params(kp, scale1, scale2, k_1, k_2)
    # Snap weights to bf16-representable values; the kernel feeds bf16 weights
    # to the MXU and the reference then uses the exact same weights in f32.
    raw = jax.tree_util.tree_map(
        lambda w: w.astype(jnp.bfloat16).astype(jnp.float32), raw)
    packed = pack_fused_weights(raw, scale1, scale2, k_1, k_2)

    ten1 = jax.random.normal(ka, (N, scale1, H, W), jnp.float32)   # NCHW
    ten2 = jax.random.normal(kb, (N, scale2, H, W), jnp.float32)

    out1, out2 = exchange_apply(packed, ten1, ten2)
    jax.block_until_ready((out1, out2))
    assert out1.shape == (N, scale1, H, W) and out2.shape == (N, scale2, H, W)

    # Validate against a plain-JAX f32 reference.  The kernel casts activations
    # to bf16 at the MXU (f32 accumulate), so allow ~1e-2-scale deviation.
    ref1, ref2 = exchange_reference(raw, ten1, ten2)
    err = max(float(jnp.max(jnp.abs(out1 - ref1))),
              float(jnp.max(jnp.abs(out2 - ref2))))
    assert err < 5e-2, err

    print("KERNEL_OK")
</pallas_src>

<mosaic_0001>
module attributes {stable_mosaic.version = 11 : i64} {
  func.func @k(%arg0: memref<8x256xf32, #tpu.memory_space<vmem>>, %arg1: memref<8x256xf32, #tpu.memory_space<vmem>>) attributes {dimension_semantics = [], scalar_prefetch = 0 : i64, scratch_operands = 0 : i64, tpu.core_type = #tpu.core_type<tc>} {
    %c0 = arith.constant 0 : index
    %c0_0 = arith.constant 0 : index
    %0 = vector.load %arg0[%c0, %c0_0] : memref<8x256xf32, #tpu.memory_space<vmem>>, vector<8x256xf32>
    %c3_i32 = arith.constant 3 : i32
    %1 = tpu.dynamic_rotate %0 by %c3_i32 dim 1 : vector<8x256xf32>, i32 -> vector<8x256xf32>
    %c0_1 = arith.constant 0 : index
    %c0_2 = arith.constant 0 : index
    %2 = vector.load %arg1[%c0_1, %c0_2] : memref<8x256xf32, #tpu.memory_space<vmem>>, vector<8x256xf32>
    tpu.vector_store %arg1[%c0_1, %c0_2], %1 {strides = array<i32>} : memref<8x256xf32, #tpu.memory_space<vmem>>, vector<8x256xf32>,
    return
  }
}

module attributes {stable_mosaic.version = 11 : i64} {
  func.func @kernel(%arg0: i32, %arg1: memref<9x1x256xf32, #tpu.memory_space<vmem>>, %arg2: memref<1x8x256xf32, #tpu.memory_space<vmem>>, %arg3: memref<9x16x8xbf16, #tpu.memory_space<vmem>>, %arg4: memref<8x24xbf16, #tpu.memory_space<vmem>>, %arg5: memref<9x16x8xbf16, #tpu.memory_space<vmem>>, %arg6: memref<8x40xbf16, #tpu.memory_space<vmem>>, %arg7: memref<9x16x8xbf16, #tpu.memory_space<vmem>>, %arg8: memref<8x56xbf16, #tpu.memory_space<vmem>>, %arg9: memref<9x16x8xbf16, #tpu.memory_space<vmem>>, %arg10: memref<9x8x72xbf16, #tpu.memory_space<vmem>>, %arg11: memref<1x8x256xf32, #tpu.memory_space<vmem>>) attributes {dimension_semantics = [#tpu.dimension_semantics<parallel>], iteration_bounds = array<i64: 2>, scalar_prefetch = 0 : i64, scratch_operands = 0 : i64, tpu.core_type = #tpu.core_type<tc>, window_params = [{pipeline_mode = #tpu.pipeline_mode<synchronous>, transform_indices = @transform_0, window_bounds = array<i64: 9, 1, 256>}, {transform_indices = @transform_1, window_bounds = array<i64: 1, 8, 256>}, {pipeline_mode = #tpu.pipeline_mode<synchronous>, transform_indices = @transform_2, window_bounds = array<i64: 9, 16, 8>}, {pipeline_mode = #tpu.pipeline_mode<synchronous>, transform_indices = @transform_3, window_bounds = array<i64: 8, 24>}, {pipeline_mode = #tpu.pipeline_mode<synchronous>, transform_indices = @transform_4, window_bounds = array<i64: 9, 16, 8>}, {pipeline_mode = #tpu.pipeline_mode<synchronous>, transform_indices = @transform_5, window_bounds = array<i64: 8, 40>}, {pipeline_mode = #tpu.pipeline_mode<synchronous>, transform_indices = @transform_6, window_bounds = array<i64: 9, 16, 8>}, {pipeline_mode = #tpu.pipeline_mode<synchronous>, transform_indices = @transform_7, window_bounds = array<i64: 8, 56>}, {pipeline_mode = #tpu.pipeline_mode<synchronous>, transform_indices = @transform_8, window_bounds = array<i64: 9, 16, 8>}, {pipeline_mode = #tpu.pipeline_mode<synchronous>, transform_indices = @transform_9, window_bounds = array<i64: 9, 8, 72>}, {transform_indices = @transform_10, window_bounds = array<i64: 1, 8, 256>}]} {
    %c0 = arith.constant 0 : index
    %c0_0 = arith.constant 0 : index
    %c0_1 = arith.constant 0 : index
    %0 = vector.load %arg2[%c0, %c0_0, %c0_1] : memref<1x8x256xf32, #tpu.memory_space<vmem>>, vector<1x8x256xf32>
    %1 = vector.shape_cast %0 : vector<1x8x256xf32> to vector<8x256xf32>
    %2 = vector.extract_strided_slice %1 {offsets = [0, 239], sizes = [8, 17], strides = [1, 1]} : vector<8x256xf32> to vector<8x17xf32>
    %3 = vector.extract_strided_slice %1 {offsets = [0, 0], sizes = [8, 239], strides = [1, 1]} : vector<8x256xf32> to vector<8x239xf32>
    %4 = tpu.concatenate %2, %3 in 1 : vector<8x17xf32>, vector<8x239xf32> -> vector<8x256xf32>
    %c0_2 = arith.constant 0 : index
    %c0_3 = arith.constant 0 : index
    %c0_4 = arith.constant 0 : index
    %5 = vector.load %arg1[%c0_2, %c0_3, %c0_4] : memref<9x1x256xf32, #tpu.memory_space<vmem>>, vector<1x1x256xf32>
    %6 = vector.shape_cast %5 : vector<1x1x256xf32> to vector<1x256xf32>
    %7 = vector.broadcast %6 : vector<1x256xf32> to vector<8x256xf32>
    %8 = arith.mulf %4, %7 : vector<8x256xf32>
    %c0_5 = arith.constant 0 : index
    %c0_6 = arith.constant 0 : index
    %c0_7 = arith.constant 0 : index
    %9 = vector.load %arg3[%c0_5, %c0_6, %c0_7] : memref<9x16x8xbf16, #tpu.memory_space<vmem>>, vector<1x16x8xbf16>
    %10 = vector.shape_cast %9 : vector<1x16x8xbf16> to vector<16x8xbf16>
    %11 = arith.truncf %8 : vector<8x256xf32> to vector<8x256xbf16>
    %cst = arith.constant dense<0.000000e+00> : vector<16x256xf32>
    %12 = tpu.matmul %10, %11, %cst {dimension_numbers = #tpu.dot_dimension_numbers<[1], [0], [0], [1], [0, 0, 1, 1], [], []>} : vector<16x8xbf16>, vector<8x256xbf16>, vector<16x256xf32> -> vector<16x256xf32>
    %13 = vector.extract_strided_slice %1 {offsets = [0, 240], sizes = [8, 16], strides = [1, 1]} : vector<8x256xf32> to vector<8x16xf32>
    %14 = vector.extract_strided_slice %1 {offsets = [0, 0], sizes = [8, 240], strides = [1, 1]} : vector<8x256xf32> to vector<8x240xf32>
    %15 = tpu.concatenate %13, %14 in 1 : vector<8x16xf32>, vector<8x240xf32> -> vector<8x256xf32>
    %c1 = arith.constant 1 : index
    %c0_8 = arith.constant 0 : index
    %c0_9 = arith.constant 0 : index
    %16 = vector.load %arg1[%c1, %c0_8, %c0_9] : memref<9x1x256xf32, #tpu.memory_space<vmem>>, vector<1x1x256xf32>
    %17 = vector.shape_cast %16 : vector<1x1x256xf32> to vector<1x256xf32>
    %18 = vector.broadcast %17 : vector<1x256xf32> to vector<8x256xf32>
    %19 = arith.mulf %15, %18 : vector<8x256xf32>
    %c1_10 = arith.constant 1 : index
    %c0_11 = arith.constant 0 : index
    %c0_12 = arith.constant 0 : index
    %20 = vector.load %arg3[%c1_10, %c0_11, %c0_12] : memref<9x16x8xbf16, #tpu.memory_space<vmem>>, vector<1x16x8xbf16>
    %21 = vector.shape_cast %20 : vector<1x16x8xbf16> to vector<16x8xbf16>
    %22 = arith.truncf %19 : vector<8x256xf32> to vector<8x256xbf16>
    %cst_13 = arith.constant dense<0.000000e+00> : vector<16x256xf32>
    %23 = tpu.matmul %21, %22, %cst_13 {dimension_numbers = #tpu.dot_dimension_numbers<[1], [0], [0], [1], [0, 0, 1, 1], [], []>} : vector<16x8xbf16>, vector<8x256xbf16>, vector<16x256xf32> -> vector<16x256xf32>
    %24 = arith.addf %12, %23 : vector<16x256xf32>
    %25 = vector.extract_strided_slice %1 {offsets = [0, 241], sizes = [8, 15], strides = [1, 1]} : vector<8x256xf32> to vector<8x15xf32>
    %26 = vector.extract_strided_slice %1 {offsets = [0, 0], sizes = [8, 241], strides = [1, 1]} : vector<8x256xf32> to vector<8x241xf32>
    %27 = tpu.concatenate %25, %26 in 1 : vector<8x15xf32>, vector<8x241xf32> -> vector<8x256xf32>
    %c2 = arith.constant 2 : index
    %c0_14 = arith.constant 0 : index
    %c0_15 = arith.constant 0 : index
    %28 = vector.load %arg1[%c2, %c0_14, %c0_15] : memref<9x1x256xf32, #tpu.memory_space<vmem>>, vector<1x1x256xf32>
    %29 = vector.shape_cast %28 : vector<1x1x256xf32> to vector<1x256xf32>
    %30 = vector.broadcast %29 : vector<1x256xf32> to vector<8x256xf32>
    %31 = arith.mulf %27, %30 : vector<8x256xf32>
    %c2_16 = arith.constant 2 : index
    %c0_17 = arith.constant 0 : index
    %c0_18 = arith.constant 0 : index
    %32 = vector.load %arg3[%c2_16, %c0_17, %c0_18] : memref<9x16x8xbf16, #tpu.memory_space<vmem>>, vector<1x16x8xbf16>
    %33 = vector.shape_cast %32 : vector<1x16x8xbf16> to vector<16x8xbf16>
    %34 = arith.truncf %31 : vector<8x256xf32> to vector<8x256xbf16>
    %cst_19 = arith.constant dense<0.000000e+00> : vector<16x256xf32>
    %35 = tpu.matmul %33, %34, %cst_19 {dimension_numbers = #tpu.dot_dimension_numbers<[1], [0], [0], [1], [0, 0, 1, 1], [], []>} : vector<16x8xbf16>, vector<8x256xbf16>, vector<16x256xf32> -> vector<16x256xf32>
    %36 = arith.addf %24, %35 : vector<16x256xf32>
    %37 = vector.extract_strided_slice %1 {offsets = [0, 255], sizes = [8, 1], strides = [1, 1]} : vector<8x256xf32> to vector<8x1xf32>
    %38 = vector.extract_strided_slice %1 {offsets = [0, 0], sizes = [8, 255], strides = [1, 1]} : vector<8x256xf32> to vector<8x255xf32>
    %39 = tpu.concatenate %37, %38 in 1 : vector<8x1xf32>, vector<8x255xf32> -> vector<8x256xf32>
    %c3 = arith.constant 3 : index
    %c0_20 = arith.constant 0 : index
    %c0_21 = arith.constant 0 : index
    %40 = vector.load %arg1[%c3, %c0_20, %c0_21] : memref<9x1x256xf32, #tpu.memory_space<vmem>>, vector<1x1x256xf32>
    %41 = vector.shape_cast %40 : vector<1x1x256xf32> to vector<1x256xf32>
    %42 = vector.broadcast %41 : vector<1x256xf32> to vector<8x256xf32>
    %43 = arith.mulf %39, %42 : vector<8x256xf32>
    %c3_22 = arith.constant 3 : index
    %c0_23 = arith.constant 0 : index
    %c0_24 = arith.constant 0 : index
    %44 = vector.load %arg3[%c3_22, %c0_23, %c0_24] : memref<9x16x8xbf16, #tpu.memory_space<vmem>>, vector<1x16x8xbf16>
    %45 = vector.shape_cast %44 : vector<1x16x8xbf16> to vector<16x8xbf16>
    %46 = arith.truncf %43 : vector<8x256xf32> to vector<8x256xbf16>
    %cst_25 = arith.constant dense<0.000000e+00> : vector<16x256xf32>
    %47 = tpu.matmul %45, %46, %cst_25 {dimension_numbers = #tpu.dot_dimension_numbers<[1], [0], [0], [1], [0, 0, 1, 1], [], []>} : vector<16x8xbf16>, vector<8x256xbf16>, vector<16x256xf32> -> vector<16x256xf32>
    %48 = arith.addf %36, %47 : vector<16x256xf32>
    %c4 = arith.constant 4 : index
    %c0_26 = arith.constant 0 : index
    %c0_27 = arith.constant 0 : index
    %49 = vector.load %arg3[%c4, %c0_26, %c0_27] : memref<9x16x8xbf16, #tpu.memory_space<vmem>>, vector<1x16x8xbf16>
    %50 = vector.shape_cast %49 : vector<1x16x8xbf16> to vector<16x8xbf16>
    %51 = arith.truncf %1 : vector<8x256xf32> to vector<8x256xbf16>
    %cst_28 = arith.constant dense<0.000000e+00> : vector<16x256xf32>
    %52 = tpu.matmul %50, %51, %cst_28 {dimension_numbers = #tpu.dot_dimension_numbers<[1], [0], [0], [1], [0, 0, 1, 1], [], []>} : vector<16x8xbf16>, vector<8x256xbf16>, vector<16x256xf32> -> vector<16x256xf32>
    %53 = arith.addf %48, %52 : vector<16x256xf32>
    %54 = vector.extract_strided_slice %1 {offsets = [0, 1], sizes = [8, 255], strides = [1, 1]} : vector<8x256xf32> to vector<8x255xf32>
    %55 = vector.extract_strided_slice %1 {offsets = [0, 0], sizes = [8, 1], strides = [1, 1]} : vector<8x256xf32> to vector<8x1xf32>
    %56 = tpu.concatenate %54, %55 in 1 : vector<8x255xf32>, vector<8x1xf32> -> vector<8x256xf32>
    %c5 = arith.constant 5 : index
    %c0_29 = arith.constant 0 : index
    %c0_30 = arith.constant 0 : index
    %57 = vector.load %arg1[%c5, %c0_29, %c0_30] : memref<9x1x256xf32, #tpu.memory_space<vmem>>, vector<1x1x256xf32>
    %58 = vector.shape_cast %57 : vector<1x1x256xf32> to vector<1x256xf32>
    %59 = vector.broadcast %58 : vector<1x256xf32> to vector<8x256xf32>
    %60 = arith.mulf %56, %59 : vector<8x256xf32>
    %c5_31 = arith.constant 5 : index
    %c0_32 = arith.constant 0 : index
    %c0_33 = arith.constant 0 : index
    %61 = vector.load %arg3[%c5_31, %c0_32, %c0_33] : memref<9x16x8xbf16, #tpu.memory_space<vmem>>, vector<1x16x8xbf16>
    %62 = vector.shape_cast %61 : vector<1x16x8xbf16> to vector<16x8xbf16>
    %63 = arith.truncf %60 : vector<8x256xf32> to vector<8x256xbf16>
    %cst_34 = arith.constant dense<0.000000e+00> : vector<16x256xf32>
    %64 = tpu.matmul %62, %63, %cst_34 {dimension_numbers = #tpu.dot_dimension_numbers<[1], [0], [0], [1], [0, 0, 1, 1], [], []>} : vector<16x8xbf16>, vector<8x256xbf16>, vector<16x256xf32> -> vector<16x256xf32>
    %65 = arith.addf %53, %64 : vector<16x256xf32>
    %66 = vector.extract_strided_slice %1 {offsets = [0, 15], sizes = [8, 241], strides = [1, 1]} : vector<8x256xf32> to vector<8x241xf32>
    %67 = vector.extract_strided_slice %1 {offsets = [0, 0], sizes = [8, 15], strides = [1, 1]} : vector<8x256xf32> to vector<8x15xf32>
    %68 = tpu.concatenate %66, %67 in 1 : vector<8x241xf32>, vector<8x15xf32> -> vector<8x256xf32>
    %c6 = arith.constant 6 : index
    %c0_35 = arith.constant 0 : index
    %c0_36 = arith.constant 0 : index
    %69 = vector.load %arg1[%c6, %c0_35, %c0_36] : memref<9x1x256xf32, #tpu.memory_space<vmem>>, vector<1x1x256xf32>
    %70 = vector.shape_cast %69 : vector<1x1x256xf32> to vector<1x256xf32>
    %71 = vector.broadcast %70 : vector<1x256xf32> to vector<8x256xf32>
    %72 = arith.mulf %68, %71 : vector<8x256xf32>
    %c6_37 = arith.constant 6 : index
    %c0_38 = arith.constant 0 : index
    %c0_39 = arith.constant 0 : index
    %73 = vector.load %arg3[%c6_37, %c0_38, %c0_39] : memref<9x16x8xbf16, #tpu.memory_space<vmem>>, vector<1x16x8xbf16>
    %74 = vector.shape_cast %73 : vector<1x16x8xbf16> to vector<16x8xbf16>
    %75 = arith.truncf %72 : vector<8x256xf32> to vector<8x256xbf16>
    %cst_40 = arith.constant dense<0.000000e+00> : vector<16x256xf32>
    %76 = tpu.matmul %74, %75, %cst_40 {dimension_numbers = #tpu.dot_dimension_numbers<[1], [0], [0], [1], [0, 0, 1, 1], [], []>} : vector<16x8xbf16>, vector<8x256xbf16>, vector<16x256xf32> -> vector<16x256xf32>
    %77 = arith.addf %65, %76 : vector<16x256xf32>
    %78 = vector.extract_strided_slice %1 {offsets = [0, 16], sizes = [8, 240], strides = [1, 1]} : vector<8x256xf32> to vector<8x240xf32>
    %79 = vector.extract_strided_slice %1 {offsets = [0, 0], sizes = [8, 16], strides = [1, 1]} : vector<8x256xf32> to vector<8x16xf32>
    %80 = tpu.concatenate %78, %79 in 1 : vector<8x240xf32>, vector<8x16xf32> -> vector<8x256xf32>
    %c7 = arith.constant 7 : index
    %c0_41 = arith.constant 0 : index
    %c0_42 = arith.constant 0 : index
    %81 = vector.load %arg1[%c7, %c0_41, %c0_42] : memref<9x1x256xf32, #tpu.memory_space<vmem>>, vector<1x1x256xf32>
    %82 = vector.shape_cast %81 : vector<1x1x256xf32> to vector<1x256xf32>
    %83 = vector.broadcast %82 : vector<1x256xf32> to vector<8x256xf32>
    %84 = arith.mulf %80, %83 : vector<8x256xf32>
    %c7_43 = arith.constant 7 : index
    %c0_44 = arith.constant 0 : index
    %c0_45 = arith.constant 0 : index
    %85 = vector.load %arg3[%c7_43, %c0_44, %c0_45] : memref<9x16x8xbf16, #tpu.memory_space<vmem>>, vector<1x16x8xbf16>
    %86 = vector.shape_cast %85 : vector<1x16x8xbf16> to vector<16x8xbf16>
    %87 = arith.truncf %84 : vector<8x256xf32> to vector<8x256xbf16>
    %cst_46 = arith.constant dense<0.000000e+00> : vector<16x256xf32>
    %88 = tpu.matmul %86, %87, %cst_46 {dimension_numbers = #tpu.dot_dimension_numbers<[1], [0], [0], [1], [0, 0, 1, 1], [], []>} : vector<16x8xbf16>, vector<8x256xbf16>, vector<16x256xf32> -> vector<16x256xf32>
    %89 = arith.addf %77, %88 : vector<16x256xf32>
    %90 = vector.extract_strided_slice %1 {offsets = [0, 17], sizes = [8, 239], strides = [1, 1]} : vector<8x256xf32> to vector<8x239xf32>
    %91 = vector.extract_strided_slice %1 {offsets = [0, 0], sizes = [8, 17], strides = [1, 1]} : vector<8x256xf32> to vector<8x17xf32>
    %92 = tpu.concatenate %90, %91 in 1 : vector<8x239xf32>, vector<8x17xf32> -> vector<8x256xf32>
    %c8 = arith.constant 8 : index
    %c0_47 = arith.constant 0 : index
    %c0_48 = arith.constant 0 : index
    %93 = vector.load %arg1[%c8, %c0_47, %c0_48] : memref<9x1x256xf32, #tpu.memory_space<vmem>>, vector<1x1x256xf32>
    %94 = vector.shape_cast %93 : vector<1x1x256xf32> to vector<1x256xf32>
    %95 = vector.broadcast %94 : vector<1x256xf32> to vector<8x256xf32>
    %96 = arith.mulf %92, %95 : vector<8x256xf32>
    %c8_49 = arith.constant 8 : index
    %c0_50 = arith.constant 0 : index
    %c0_51 = arith.constant 0 : index
    %97 = vector.load %arg3[%c8_49, %c0_50, %c0_51] : memref<9x16x8xbf16, #tpu.memory_space<vmem>>, vector<1x16x8xbf16>
    %98 = vector.shape_cast %97 : vector<1x16x8xbf16> to vector<16x8xbf16>
    %99 = arith.truncf %96 : vector<8x256xf32> to vector<8x256xbf16>
    %cst_52 = arith.constant dense<0.000000e+00> : vector<16x256xf32>
    %100 = tpu.matmul %98, %99, %cst_52 {dimension_numbers = #tpu.dot_dimension_numbers<[1], [0], [0], [1], [0, 0, 1, 1], [], []>} : vector<16x8xbf16>, vector<8x256xbf16>, vector<16x256xf32> -> vector<16x256xf32>
    %101 = arith.addf %89, %100 : vector<16x256xf32>
    %cst_53 = arith.constant 0.000000e+00 : f32
    %102 = vector.broadcast %cst_53 : f32 to vector<16x256xf32>
    %103 = arith.maximumf %101, %102 : vector<16x256xf32>
    %104 = tpu.concatenate %1, %103 in 0 : vector<8x256xf32>, vector<16x256xf32> -> vector<24x256xf32>
    %c0_54 = arith.constant 0 : index
    %c0_55 = arith.constant 0 : index
    %105 = vector.load %arg4[%c0_54, %c0_55] : memref<8x24xbf16, #tpu.memory_space<vmem>>, vector<8x24xbf16>
    %106 = arith.truncf %104 : vector<24x256xf32> to vector<24x256xbf16>
    %cst_56 = arith.constant dense<0.000000e+00> : vector<8x256xf32>
    %107 = tpu.matmul %105, %106, %cst_56 {dimension_numbers = #tpu.dot_dimension_numbers<[1], [0], [0], [1], [0, 0, 1, 1], [], []>} : vector<8x24xbf16>, vector<24x256xbf16>, vector<8x256xf32> -> vector<8x256xf32>
    %cst_57 = arith.constant 0.000000e+00 : f32
    %108 = vector.broadcast %cst_57 : f32 to vector<8x256xf32>
    %109 = arith.maximumf %107, %108 : vector<8x256xf32>
    %110 = vector.extract_strided_slice %109 {offsets = [0, 239], sizes = [8, 17], strides = [1, 1]} : vector<8x256xf32> to vector<8x17xf32>
    %111 = vector.extract_strided_slice %109 {offsets = [0, 0], sizes = [8, 239], strides = [1, 1]} : vector<8x256xf32> to vector<8x239xf32>
    %112 = tpu.concatenate %110, %111 in 1 : vector<8x17xf32>, vector<8x239xf32> -> vector<8x256xf32>
    %c0_58 = arith.constant 0 : index
    %c0_59 = arith.constant 0 : index
    %c0_60 = arith.constant 0 : index
    %113 = vector.load %arg1[%c0_58, %c0_59, %c0_60] : memref<9x1x256xf32, #tpu.memory_space<vmem>>, vector<1x1x256xf32>
    %114 = vector.shape_cast %113 : vector<1x1x256xf32> to vector<1x256xf32>
    %115 = vector.broadcast %114 : vector<1x256xf32> to vector<8x256xf32>
    %116 = arith.mulf %112, %115 : vector<8x256xf32>
    %c0_61 = arith.constant 0 : index
    %c0_62 = arith.constant 0 : index
    %c0_63 = arith.constant 0 : index
    %117 = vector.load %arg5[%c0_61, %c0_62, %c0_63] : memref<9x16x8xbf16, #tpu.memory_space<vmem>>, vector<1x16x8xbf16>
    %118 = vector.shape_cast %117 : vector<1x16x8xbf16> to vector<16x8xbf16>
    %119 = arith.truncf %116 : vector<8x256xf32> to vector<8x256xbf16>
    %cst_64 = arith.constant dense<0.000000e+00> : vector<16x256xf32>
    %120 = tpu.matmul %118, %119, %cst_64 {dimension_numbers = #tpu.dot_dimension_numbers<[1], [0], [0], [1], [0, 0, 1, 1], [], []>} : vector<16x8xbf16>, vector<8x256xbf16>, vector<16x256xf32> -> vector<16x256xf32>
    %121 = vector.extract_strided_slice %109 {offsets = [0, 240], sizes = [8, 16], strides = [1, 1]} : vector<8x256xf32> to vector<8x16xf32>
    %122 = vector.extract_strided_slice %109 {offsets = [0, 0], sizes = [8, 240], strides = [1, 1]} : vector<8x256xf32> to vector<8x240xf32>
    %123 = tpu.concatenate %121, %122 in 1 : vector<8x16xf32>, vector<8x240xf32> -> vector<8x256xf32>
    %c1_65 = arith.constant 1 : index
    %c0_66 = arith.constant 0 : index
    %c0_67 = arith.constant 0 : index
    %124 = vector.load %arg1[%c1_65, %c0_66, %c0_67] : memref<9x1x256xf32, #tpu.memory_space<vmem>>, vector<1x1x256xf32>
    %125 = vector.shape_cast %124 : vector<1x1x256xf32> to vector<1x256xf32>
    %126 = vector.broadcast %125 : vector<1x256xf32> to vector<8x256xf32>
    %127 = arith.mulf %123, %126 : vector<8x256xf32>
    %c1_68 = arith.constant 1 : index
    %c0_69 = arith.constant 0 : index
    %c0_70 = arith.constant 0 : index
    %128 = vector.load %arg5[%c1_68, %c0_69, %c0_70] : memref<9x16x8xbf16, #tpu.memory_space<vmem>>, vector<1x16x8xbf16>
    %129 = vector.shape_cast %128 : vector<1x16x8xbf16> to vector<16x8xbf16>
    %130 = arith.truncf %127 : vector<8x256xf32> to vector<8x256xbf16>
    %cst_71 = arith.constant dense<0.000000e+00> : vector<16x256xf32>
    %131 = tpu.matmul %129, %130, %cst_71 {dimension_numbers = #tpu.dot_dimension_numbers<[1], [0], [0], [1], [0, 0, 1, 1], [], []>} : vector<16x8xbf16>, vector<8x256xbf16>, vector<16x256xf32> -> vector<16x256xf32>
    %132 = arith.addf %120, %131 : vector<16x256xf32>
    %133 = vector.extract_strided_slice %109 {offsets = [0, 241], sizes = [8, 15], strides = [1, 1]} : vector<8x256xf32> to vector<8x15xf32>
    %134 = vector.extract_strided_slice %109 {offsets = [0, 0], sizes = [8, 241], strides = [1, 1]} : vector<8x256xf32> to vector<8x241xf32>
    %135 = tpu.concatenate %133, %134 in 1 : vector<8x15xf32>, vector<8x241xf32> -> vector<8x256xf32>
    %c2_72 = arith.constant 2 : index
    %c0_73 = arith.constant 0 : index
    %c0_74 = arith.constant 0 : index
    %136 = vector.load %arg1[%c2_72, %c0_73, %c0_74] : memref<9x1x256xf32, #tpu.memory_space<vmem>>, vector<1x1x256xf32>
    %137 = vector.shape_cast %136 : vector<1x1x256xf32> to vector<1x256xf32>
    %138 = vector.broadcast %137 : vector<1x256xf32> to vector<8x256xf32>
    %139 = arith.mulf %135, %138 : vector<8x256xf32>
    %c2_75 = arith.constant 2 : index
    %c0_76 = arith.constant 0 : index
    %c0_77 = arith.constant 0 : index
    %140 = vector.load %arg5[%c2_75, %c0_76, %c0_77] : memref<9x16x8xbf16, #tpu.memory_space<vmem>>, vector<1x16x8xbf16>
    %141 = vector.shape_cast %140 : vector<1x16x8xbf16> to vector<16x8xbf16>
    %142 = arith.truncf %139 : vector<8x256xf32> to vector<8x256xbf16>
    %cst_78 = arith.constant dense<0.000000e+00> : vector<16x256xf32>
    %143 = tpu.matmul %141, %142, %cst_78 {dimension_numbers = #tpu.dot_dimension_numbers<[1], [0], [0], [1], [0, 0, 1, 1], [], []>} : vector<16x8xbf16>, vector<8x256xbf16>, vector<16x256xf32> -> vector<16x256xf32>
    %144 = arith.addf %132, %143 : vector<16x256xf32>
    %145 = vector.extract_strided_slice %109 {offsets = [0, 255], sizes = [8, 1], strides = [1, 1]} : vector<8x256xf32> to vector<8x1xf32>
    %146 = vector.extract_strided_slice %109 {offsets = [0, 0], sizes = [8, 255], strides = [1, 1]} : vector<8x256xf32> to vector<8x255xf32>
    %147 = tpu.concatenate %145, %146 in 1 : vector<8x1xf32>, vector<8x255xf32> -> vector<8x256xf32>
    %c3_79 = arith.constant 3 : index
    %c0_80 = arith.constant 0 : index
    %c0_81 = arith.constant 0 : index
    %148 = vector.load %arg1[%c3_79, %c0_80, %c0_81] : memref<9x1x256xf32, #tpu.memory_space<vmem>>, vector<1x1x256xf32>
    %149 = vector.shape_cast %148 : vector<1x1x256xf32> to vector<1x256xf32>
    %150 = vector.broadcast %149 : vector<1x256xf32> to vector<8x256xf32>
    %151 = arith.mulf %147, %150 : vector<8x256xf32>
    %c3_82 = arith.constant 3 : index
    %c0_83 = arith.constant 0 : index
    %c0_84 = arith.constant 0 : index
    %152 = vector.load %arg5[%c3_82, %c0_83, %c0_84] : memref<9x16x8xbf16, #tpu.memory_space<vmem>>, vector<1x16x8xbf16>
    %153 = vector.shape_cast %152 : vector<1x16x8xbf16> to vector<16x8xbf16>
    %154 = arith.truncf %151 : vector<8x256xf32> to vector<8x256xbf16>
    %cst_85 = arith.constant dense<0.000000e+00> : vector<16x256xf32>
    %155 = tpu.matmul %153, %154, %cst_85 {dimension_numbers = #tpu.dot_dimension_numbers<[1], [0], [0], [1], [0, 0, 1, 1], [], []>} : vector<16x8xbf16>, vector<8x256xbf16>, vector<16x256xf32> -> vector<16x256xf32>
    %156 = arith.addf %144, %155 : vector<16x256xf32>
    %c4_86 = arith.constant 4 : index
    %c0_87 = arith.constant 0 : index
    %c0_88 = arith.constant 0 : index
    %157 = vector.load %arg5[%c4_86, %c0_87, %c0_88] : memref<9x16x8xbf16, #tpu.memory_space<vmem>>, vector<1x16x8xbf16>
    %158 = vector.shape_cast %157 : vector<1x16x8xbf16> to vector<16x8xbf16>
    %159 = arith.truncf %109 : vector<8x256xf32> to vector<8x256xbf16>
    %cst_89 = arith.constant dense<0.000000e+00> : vector<16x256xf32>
    %160 = tpu.matmul %158, %159, %cst_89 {dimension_numbers = #tpu.dot_dimension_numbers<[1], [0], [0], [1], [0, 0, 1, 1], [], []>} : vector<16x8xbf16>, vector<8x256xbf16>, vector<16x256xf32> -> vector<16x256xf32>
    %161 = arith.addf %156, %160 : vector<16x256xf32>
    %162 = vector.extract_strided_slice %109 {offsets = [0, 1], sizes = [8, 255], strides = [1, 1]} : vector<8x256xf32> to vector<8x255xf32>
    %163 = vector.extract_strided_slice %109 {offsets = [0, 0], sizes = [8, 1], strides = [1, 1]} : vector<8x256xf32> to vector<8x1xf32>
    %164 = tpu.concatenate %162, %163 in 1 : vector<8x255xf32>, vector<8x1xf32> -> vector<8x256xf32>
    %c5_90 = arith.constant 5 : index
    %c0_91 = arith.constant 0 : index
    %c0_92 = arith.constant 0 : index
    %165 = vector.load %arg1[%c5_90, %c0_91, %c0_92] : memref<9x1x256xf32, #tpu.memory_space<vmem>>, vector<1x1x256xf32>
    %166 = vector.shape_cast %165 : vector<1x1x256xf32> to vector<1x256xf32>
    %167 = vector.broadcast %166 : vector<1x256xf32> to vector<8x256xf32>
    %168 = arith.mulf %164, %167 : vector<8x256xf32>
    %c5_93 = arith.constant 5 : index
    %c0_94 = arith.constant 0 : index
    %c0_95 = arith.constant 0 : index
    %169 = vector.load %arg5[%c5_93, %c0_94, %c0_95] : memref<9x16x8xbf16, #tpu.memory_space<vmem>>, vector<1x16x8xbf16>
    %170 = vector.shape_cast %169 : vector<1x16x8xbf16> to vector<16x8xbf16>
    %171 = arith.truncf %168 : vector<8x256xf32> to vector<8x256xbf16>
    %cst_96 = arith.constant dense<0.000000e+00> : vector<16x256xf32>
    %172 = tpu.matmul %170, %171, %cst_96 {dimension_numbers = #tpu.dot_dimension_numbers<[1], [0], [0], [1], [0, 0, 1, 1], [], []>} : vector<16x8xbf16>, vector<8x256xbf16>, vector<16x256xf32> -> vector<16x256xf32>
    %173 = arith.addf %161, %172 : vector<16x256xf32>
    %174 = vector.extract_strided_slice %109 {offsets = [0, 15], sizes = [8, 241], strides = [1, 1]} : vector<8x256xf32> to vector<8x241xf32>
    %175 = vector.extract_strided_slice %109 {offsets = [0, 0], sizes = [8, 15], strides = [1, 1]} : vector<8x256xf32> to vector<8x15xf32>
    %176 = tpu.concatenate %174, %175 in 1 : vector<8x241xf32>, vector<8x15xf32> -> vector<8x256xf32>
    %c6_97 = arith.constant 6 : index
    %c0_98 = arith.constant 0 : index
    %c0_99 = arith.constant 0 : index
    %177 = vector.load %arg1[%c6_97, %c0_98, %c0_99] : memref<9x1x256xf32, #tpu.memory_space<vmem>>, vector<1x1x256xf32>
    %178 = vector.shape_cast %177 : vector<1x1x256xf32> to vector<1x256xf32>
    %179 = vector.broadcast %178 : vector<1x256xf32> to vector<8x256xf32>
    %180 = arith.mulf %176, %179 : vector<8x256xf32>
    %c6_100 = arith.constant 6 : index
    %c0_101 = arith.constant 0 : index
    %c0_102 = arith.constant 0 : index
    %181 = vector.load %arg5[%c6_100, %c0_101, %c0_102] : memref<9x16x8xbf16, #tpu.memory_space<vmem>>, vector<1x16x8xbf16>
    %182 = vector.shape_cast %181 : vector<1x16x8xbf16> to vector<16x8xbf16>
    %183 = arith.truncf %180 : vector<8x256xf32> to vector<8x256xbf16>
    %cst_103 = arith.constant dense<0.000000e+00> : vector<16x256xf32>
    %184 = tpu.matmul %182, %183, %cst_103 {dimension_numbers = #tpu.dot_dimension_numbers<[1], [0], [0], [1], [0, 0, 1, 1], [], []>} : vector<16x8xbf16>, vector<8x256xbf16>, vector<16x256xf32> -> vector<16x256xf32>
    %185 = arith.addf %173, %184 : vector<16x256xf32>
    %186 = vector.extract_strided_slice %109 {offsets = [0, 16], sizes = [8, 240], strides = [1, 1]} : vector<8x256xf32> to vector<8x240xf32>
    %187 = vector.extract_strided_slice %109 {offsets = [0, 0], sizes = [8, 16], strides = [1, 1]} : vector<8x256xf32> to vector<8x16xf32>
    %188 = tpu.concatenate %186, %187 in 1 : vector<8x240xf32>, vector<8x16xf32> -> vector<8x256xf32>
    %c7_104 = arith.constant 7 : index
    %c0_105 = arith.constant 0 : index
    %c0_106 = arith.constant 0 : index
    %189 = vector.load %arg1[%c7_104, %c0_105, %c0_106] : memref<9x1x256xf32, #tpu.memory_space<vmem>>, vector<1x1x256xf32>
    %190 = vector.shape_cast %189 : vector<1x1x256xf32> to vector<1x256xf32>
    %191 = vector.broadcast %190 : vector<1x256xf32> to vector<8x256xf32>
    %192 = arith.mulf %188, %191 : vector<8x256xf32>
    %c7_107 = arith.constant 7 : index
    %c0_108 = arith.constant 0 : index
    %c0_109 = arith.constant 0 : index
    %193 = vector.load %arg5[%c7_107, %c0_108, %c0_109] : memref<9x16x8xbf16, #tpu.memory_space<vmem>>, vector<1x16x8xbf16>
    %194 = vector.shape_cast %193 : vector<1x16x8xbf16> to vector<16x8xbf16>
    %195 = arith.truncf %192 : vector<8x256xf32> to vector<8x256xbf16>
    %cst_110 = arith.constant dense<0.000000e+00> : vector<16x256xf32>
    %196 = tpu.matmul %194, %195, %cst_110 {dimension_numbers = #tpu.dot_dimension_numbers<[1], [0], [0], [1], [0, 0, 1, 1], [], []>} : vector<16x8xbf16>, vector<8x256xbf16>, vector<16x256xf32> -> vector<16x256xf32>
    %197 = arith.addf %185, %196 : vector<16x256xf32>
    %198 = vector.extract_strided_slice %109 {offsets = [0, 17], sizes = [8, 239], strides = [1, 1]} : vector<8x256xf32> to vector<8x239xf32>
    %199 = vector.extract_strided_slice %109 {offsets = [0, 0], sizes = [8, 17], strides = [1, 1]} : vector<8x256xf32> to vector<8x17xf32>
    %200 = tpu.concatenate %198, %199 in 1 : vector<8x239xf32>, vector<8x17xf32> -> vector<8x256xf32>
    %c8_111 = arith.constant 8 : index
    %c0_112 = arith.constant 0 : index
    %c0_113 = arith.constant 0 : index
    %201 = vector.load %arg1[%c8_111, %c0_112, %c0_113] : memref<9x1x256xf32, #tpu.memory_space<vmem>>, vector<1x1x256xf32>
    %202 = vector.shape_cast %201 : vector<1x1x256xf32> to vector<1x256xf32>
    %203 = vector.broadcast %202 : vector<1x256xf32> to vector<8x256xf32>
    %204 = arith.mulf %200, %203 : vector<8x256xf32>
    %c8_114 = arith.constant 8 : index
    %c0_115 = arith.constant 0 : index
    %c0_116 = arith.constant 0 : index
    %205 = vector.load %arg5[%c8_114, %c0_115, %c0_116] : memref<9x16x8xbf16, #tpu.memory_space<vmem>>, vector<1x16x8xbf16>
    %206 = vector.shape_cast %205 : vector<1x16x8xbf16> to vector<16x8xbf16>
    %207 = arith.truncf %204 : vector<8x256xf32> to vector<8x256xbf16>
    %cst_117 = arith.constant dense<0.000000e+00> : vector<16x256xf32>
    %208 = tpu.matmul %206, %207, %cst_117 {dimension_numbers = #tpu.dot_dimension_numbers<[1], [0], [0], [1], [0, 0, 1, 1], [], []>} : vector<16x8xbf16>, vector<8x256xbf16>, vector<16x256xf32> -> vector<16x256xf32>
    %209 = arith.addf %197, %208 : vector<16x256xf32>
    %cst_118 = arith.constant 0.000000e+00 : f32
    %210 = vector.broadcast %cst_118 : f32 to vector<16x256xf32>
    %211 = arith.maximumf %209, %210 : vector<16x256xf32>
    %212 = tpu.concatenate %104, %211 in 0 : vector<24x256xf32>, vector<16x256xf32> -> vector<40x256xf32>
    %c0_119 = arith.constant 0 : index
    %c0_120 = arith.constant 0 : index
    %213 = vector.load %arg6[%c0_119, %c0_120] : memref<8x40xbf16, #tpu.memory_space<vmem>>, vector<8x40xbf16>
    %214 = arith.truncf %212 : vector<40x256xf32> to vector<40x256xbf16>
    %cst_121 = arith.constant dense<0.000000e+00> : vector<8x256xf32>
    %215 = tpu.matmul %213, %214, %cst_121 {dimension_numbers = #tpu.dot_dimension_numbers<[1], [0], [0], [1], [0, 0, 1, 1], [], []>} : vector<8x40xbf16>, vector<40x256xbf16>, vector<8x256xf32> -> vector<8x256xf32>
    %cst_122 = arith.constant 0.000000e+00 : f32
    %216 = vector.broadcast %cst_122 : f32 to vector<8x256xf32>
    %217 = arith.maximumf %215, %216 : vector<8x256xf32>
    %218 = vector.extract_strided_slice %217 {offsets = [0, 239], sizes = [8, 17], strides = [1, 1]} : vector<8x256xf32> to vector<8x17xf32>
    %219 = vector.extract_strided_slice %217 {offsets = [0, 0], sizes = [8, 239], strides = [1, 1]} : vector<8x256xf32> to vector<8x239xf32>
    %220 = tpu.concatenate %218, %219 in 1 : vector<8x17xf32>, vector<8x239xf32> -> vector<8x256xf32>
    %c0_123 = arith.constant 0 : index
    %c0_124 = arith.constant 0 : index
    %c0_125 = arith.constant 0 : index
    %221 = vector.load %arg1[%c0_123, %c0_124, %c0_125] : memref<9x1x256xf32, #tpu.memory_space<vmem>>, vector<1x1x256xf32>
    %222 = vector.shape_cast %221 : vector<1x1x256xf32> to vector<1x256xf32>
    %223 = vector.broadcast %222 : vector<1x256xf32> to vector<8x256xf32>
    %224 = arith.mulf %220, %223 : vector<8x256xf32>
    %c0_126 = arith.constant 0 : index
    %c0_127 = arith.constant 0 : index
    %c0_128 = arith.constant 0 : index
    %225 = vector.load %arg7[%c0_126, %c0_127, %c0_128] : memref<9x16x8xbf16, #tpu.memory_space<vmem>>, vector<1x16x8xbf16>
    %226 = vector.shape_cast %225 : vector<1x16x8xbf16> to vector<16x8xbf16>
    %227 = arith.truncf %224 : vector<8x256xf32> to vector<8x256xbf16>
    %cst_129 = arith.constant dense<0.000000e+00> : vector<16x256xf32>
    %228 = tpu.matmul %226, %227, %cst_129 {dimension_numbers = #tpu.dot_dimension_numbers<[1], [0], [0], [1], [0, 0, 1, 1], [], []>} : vector<16x8xbf16>, vector<8x256xbf16>, vector<16x256xf32> -> vector<16x256xf32>
    %229 = vector.extract_strided_slice %217 {offsets = [0, 240], sizes = [8, 16], strides = [1, 1]} : vector<8x256xf32> to vector<8x16xf32>
    %230 = vector.extract_strided_slice %217 {offsets = [0, 0], sizes = [8, 240], strides = [1, 1]} : vector<8x256xf32> to vector<8x240xf32>
    %231 = tpu.concatenate %229, %230 in 1 : vector<8x16xf32>, vector<8x240xf32> -> vector<8x256xf32>
    %c1_130 = arith.constant 1 : index
    %c0_131 = arith.constant 0 : index
    %c0_132 = arith.constant 0 : index
    %232 = vector.load %arg1[%c1_130, %c0_131, %c0_132] : memref<9x1x256xf32, #tpu.memory_space<vmem>>, vector<1x1x256xf32>
    %233 = vector.shape_cast %232 : vector<1x1x256xf32> to vector<1x256xf32>
    %234 = vector.broadcast %233 : vector<1x256xf32> to vector<8x256xf32>
    %235 = arith.mulf %231, %234 : vector<8x256xf32>
    %c1_133 = arith.constant 1 : index
    %c0_134 = arith.constant 0 : index
    %c0_135 = arith.constant 0 : index
    %236 = vector.load %arg7[%c1_133, %c0_134, %c0_135] : memref<9x16x8xbf16, #tpu.memory_space<vmem>>, vector<1x16x8xbf16>
    %237 = vector.shape_cast %236 : vector<1x16x8xbf16> to vector<16x8xbf16>
    %238 = arith.truncf %235 : vector<8x256xf32> to vector<8x256xbf16>
    %cst_136 = arith.constant dense<0.000000e+00> : vector<16x256xf32>
    %239 = tpu.matmul %237, %238, %cst_136 {dimension_numbers = #tpu.dot_dimension_numbers<[1], [0], [0], [1], [0, 0, 1, 1], [], []>} : vector<16x8xbf16>, vector<8x256xbf16>, vector<16x256xf32> -> vector<16x256xf32>
    %240 = arith.addf %228, %239 : vector<16x256xf32>
    %241 = vector.extract_strided_slice %217 {offsets = [0, 241], sizes = [8, 15], strides = [1, 1]} : vector<8x256xf32> to vector<8x15xf32>
    %242 = vector.extract_strided_slice %217 {offsets = [0, 0], sizes = [8, 241], strides = [1, 1]} : vector<8x256xf32> to vector<8x241xf32>
    %243 = tpu.concatenate %241, %242 in 1 : vector<8x15xf32>, vector<8x241xf32> -> vector<8x256xf32>
    %c2_137 = arith.constant 2 : index
    %c0_138 = arith.constant 0 : index
    %c0_139 = arith.constant 0 : index
    %244 = vector.load %arg1[%c2_137, %c0_138, %c0_139] : memref<9x1x256xf32, #tpu.memory_space<vmem>>, vector<1x1x256xf32>
    %245 = vector.shape_cast %244 : vector<1x1x256xf32> to vector<1x256xf32>
    %246 = vector.broadcast %245 : vector<1x256xf32> to vector<8x256xf32>
    %247 = arith.mulf %243, %246 : vector<8x256xf32>
    %c2_140 = arith.constant 2 : index
    %c0_141 = arith.constant 0 : index
    %c0_142 = arith.constant 0 : index
    %248 = vector.load %arg7[%c2_140, %c0_141, %c0_142] : memref<9x16x8xbf16, #tpu.memory_space<vmem>>, vector<1x16x8xbf16>
    %249 = vector.shape_cast %248 : vector<1x16x8xbf16> to vector<16x8xbf16>
    %250 = arith.truncf %247 : vector<8x256xf32> to vector<8x256xbf16>
    %cst_143 = arith.constant dense<0.000000e+00> : vector<16x256xf32>
    %251 = tpu.matmul %249, %250, %cst_143 {dimension_numbers = #tpu.dot_dimension_numbers<[1], [0], [0], [1], [0, 0, 1, 1], [], []>} : vector<16x8xbf16>, vector<8x256xbf16>, vector<16x256xf32> -> vector<16x256xf32>
    %252 = arith.addf %240, %251 : vector<16x256xf32>
    %253 = vector.extract_strided_slice %217 {offsets = [0, 255], sizes = [8, 1], strides = [1, 1]} : vector<8x256xf32> to vector<8x1xf32>
    %254 = vector.extract_strided_slice %217 {offsets = [0, 0], sizes = [8, 255], strides = [1, 1]} : vector<8x256xf32> to vector<8x255xf32>
    %255 = tpu.concatenate %253, %254 in 1 : vector<8x1xf32>, vector<8x255xf32> -> vector<8x256xf32>
    %c3_144 = arith.constant 3 : index
    %c0_145 = arith.constant 0 : index
    %c0_146 = arith.constant 0 : index
    %256 = vector.load %arg1[%c3_144, %c0_145, %c0_146] : memref<9x1x256xf32, #tpu.memory_space<vmem>>, vector<1x1x256xf32>
    %257 = vector.shape_cast %256 : vector<1x1x256xf32> to vector<1x256xf32>
    %258 = vector.broadcast %257 : vector<1x256xf32> to vector<8x256xf32>
    %259 = arith.mulf %255, %258 : vector<8x256xf32>
    %c3_147 = arith.constant 3 : index
    %c0_148 = arith.constant 0 : index
    %c0_149 = arith.constant 0 : index
    %260 = vector.load %arg7[%c3_147, %c0_148, %c0_149] : memref<9x16x8xbf16, #tpu.memory_space<vmem>>, vector<1x16x8xbf16>
    %261 = vector.shape_cast %260 : vector<1x16x8xbf16> to vector<16x8xbf16>
    %262 = arith.truncf %259 : vector<8x256xf32> to vector<8x256xbf16>
    %cst_150 = arith.constant dense<0.000000e+00> : vector<16x256xf32>
    %263 = tpu.matmul %261, %262, %cst_150 {dimension_numbers = #tpu.dot_dimension_numbers<[1], [0], [0], [1], [0, 0, 1, 1], [], []>} : vector<16x8xbf16>, vector<8x256xbf16>, vector<16x256xf32> -> vector<16x256xf32>
    %264 = arith.addf %252, %263 : vector<16x256xf32>
    %c4_151 = arith.constant 4 : index
    %c0_152 = arith.constant 0 : index
    %c0_153 = arith.constant 0 : index
    %265 = vector.load %arg7[%c4_151, %c0_152, %c0_153] : memref<9x16x8xbf16, #tpu.memory_space<vmem>>, vector<1x16x8xbf16>
    %266 = vector.shape_cast %265 : vector<1x16x8xbf16> to vector<16x8xbf16>
    %267 = arith.truncf %217 : vector<8x256xf32> to vector<8x256xbf16>
    %cst_154 = arith.constant dense<0.000000e+00> : vector<16x256xf32>
    %268 = tpu.matmul %266, %267, %cst_154 {dimension_numbers = #tpu.dot_dimension_numbers<[1], [0], [0], [1], [0, 0, 1, 1], [], []>} : vector<16x8xbf16>, vector<8x256xbf16>, vector<16x256xf32> -> vector<16x256xf32>
    %269 = arith.addf %264, %268 : vector<16x256xf32>
    %270 = vector.extract_strided_slice %217 {offsets = [0, 1], sizes = [8, 255], strides = [1, 1]} : vector<8x256xf32> to vector<8x255xf32>
    %271 = vector.extract_strided_slice %217 {offsets = [0, 0], sizes = [8, 1], strides = [1, 1]} : vector<8x256xf32> to vector<8x1xf32>
    %272 = tpu.concatenate %270, %271 in 1 : vector<8x255xf32>, vector<8x1xf32> -> vector<8x256xf32>
    %c5_155 = arith.constant 5 : index
    %c0_156 = arith.constant 0 : index
    %c0_157 = arith.constant 0 : index
    %273 = vector.load %arg1[%c5_155, %c0_156, %c0_157] : memref<9x1x256xf32, #tpu.memory_space<vmem>>, vector<1x1x256xf32>
    %274 = vector.shape_cast %273 : vector<1x1x256xf32> to vector<1x256xf32>
    %275 = vector.broadcast %274 : vector<1x256xf32> to vector<8x256xf32>
    %276 = arith.mulf %272, %275 : vector<8x256xf32>
    %c5_158 = arith.constant 5 : index
    %c0_159 = arith.constant 0 : index
    %c0_160 = arith.constant 0 : index
    %277 = vector.load %arg7[%c5_158, %c0_159, %c0_160] : memref<9x16x8xbf16, #tpu.memory_space<vmem>>, vector<1x16x8xbf16>
    %278 = vector.shape_cast %277 : vector<1x16x8xbf16> to vector<16x8xbf16>
    %279 = arith.truncf %276 : vector<8x256xf32> to vector<8x256xbf16>
    %cst_161 = arith.constant dense<0.000000e+00> : vector<16x256xf32>
    %280 = tpu.matmul %278, %279, %cst_161 {dimension_numbers = #tpu.dot_dimension_numbers<[1], [0], [0], [1], [0, 0, 1, 1], [], []>} : vector<16x8xbf16>, vector<8x256xbf16>, vector<16x256xf32> -> vector<16x256xf32>
    %281 = arith.addf %269, %280 : vector<16x256xf32>
    %282 = vector.extract_strided_slice %217 {offsets = [0, 15], sizes = [8, 241], strides = [1, 1]} : vector<8x256xf32> to vector<8x241xf32>
    %283 = vector.extract_strided_slice %217 {offsets = [0, 0], sizes = [8, 15], strides = [1, 1]} : vector<8x256xf32> to vector<8x15xf32>
    %284 = tpu.concatenate %282, %283 in 1 : vector<8x241xf32>, vector<8x15xf32> -> vector<8x256xf32>
    %c6_162 = arith.constant 6 : index
    %c0_163 = arith.constant 0 : index
    %c0_164 = arith.constant 0 : index
    %285 = vector.load %arg1[%c6_162, %c0_163, %c0_164] : memref<9x1x256xf32, #tpu.memory_space<vmem>>, vector<1x1x256xf32>
    %286 = vector.shape_cast %285 : vector<1x1x256xf32> to vector<1x256xf32>
    %287 = vector.broadcast %286 : vector<1x256xf32> to vector<8x256xf32>
    %288 = arith.mulf %284, %287 : vector<8x256xf32>
    %c6_165 = arith.constant 6 : index
    %c0_166 = arith.constant 0 : index
    %c0_167 = arith.constant 0 : index
    %289 = vector.load %arg7[%c6_165, %c0_166, %c0_167] : memref<9x16x8xbf16, #tpu.memory_space<vmem>>, vector<1x16x8xbf16>
    %290 = vector.shape_cast %289 : vector<1x16x8xbf16> to vector<16x8xbf16>
    %291 = arith.truncf %288 : vector<8x256xf32> to vector<8x256xbf16>
    %cst_168 = arith.constant dense<0.000000e+00> : vector<16x256xf32>
    %292 = tpu.matmul %290, %291, %cst_168 {dimension_numbers = #tpu.dot_dimension_numbers<[1], [0], [0], [1], [0, 0, 1, 1], [], []>} : vector<16x8xbf16>, vector<8x256xbf16>, vector<16x256xf32> -> vector<16x256xf32>
    %293 = arith.addf %281, %292 : vector<16x256xf32>
    %294 = vector.extract_strided_slice %217 {offsets = [0, 16], sizes = [8, 240], strides = [1, 1]} : vector<8x256xf32> to vector<8x240xf32>
    %295 = vector.extract_strided_slice %217 {offsets = [0, 0], sizes = [8, 16], strides = [1, 1]} : vector<8x256xf32> to vector<8x16xf32>
    %296 = tpu.concatenate %294, %295 in 1 : vector<8x240xf32>, vector<8x16xf32> -> vector<8x256xf32>
    %c7_169 = arith.constant 7 : index
    %c0_170 = arith.constant 0 : index
    %c0_171 = arith.constant 0 : index
    %297 = vector.load %arg1[%c7_169, %c0_170, %c0_171] : memref<9x1x256xf32, #tpu.memory_space<vmem>>, vector<1x1x256xf32>
    %298 = vector.shape_cast %297 : vector<1x1x256xf32> to vector<1x256xf32>
    %299 = vector.broadcast %298 : vector<1x256xf32> to vector<8x256xf32>
    %300 = arith.mulf %296, %299 : vector<8x256xf32>
    %c7_172 = arith.constant 7 : index
    %c0_173 = arith.constant 0 : index
    %c0_174 = arith.constant 0 : index
    %301 = vector.load %arg7[%c7_172, %c0_173, %c0_174] : memref<9x16x8xbf16, #tpu.memory_space<vmem>>, vector<1x16x8xbf16>
    %302 = vector.shape_cast %301 : vector<1x16x8xbf16> to vector<16x8xbf16>
    %303 = arith.truncf %300 : vector<8x256xf32> to vector<8x256xbf16>
    %cst_175 = arith.constant dense<0.000000e+00> : vector<16x256xf32>
    %304 = tpu.matmul %302, %303, %cst_175 {dimension_numbers = #tpu.dot_dimension_numbers<[1], [0], [0], [1], [0, 0, 1, 1], [], []>} : vector<16x8xbf16>, vector<8x256xbf16>, vector<16x256xf32> -> vector<16x256xf32>
    %305 = arith.addf %293, %304 : vector<16x256xf32>
    %306 = vector.extract_strided_slice %217 {offsets = [0, 17], sizes = [8, 239], strides = [1, 1]} : vector<8x256xf32> to vector<8x239xf32>
    %307 = vector.extract_strided_slice %217 {offsets = [0, 0], sizes = [8, 17], strides = [1, 1]} : vector<8x256xf32> to vector<8x17xf32>
    %308 = tpu.concatenate %306, %307 in 1 : vector<8x239xf32>, vector<8x17xf32> -> vector<8x256xf32>
    %c8_176 = arith.constant 8 : index
    %c0_177 = arith.constant 0 : index
    %c0_178 = arith.constant 0 : index
    %309 = vector.load %arg1[%c8_176, %c0_177, %c0_178] : memref<9x1x256xf32, #tpu.memory_space<vmem>>, vector<1x1x256xf32>
    %310 = vector.shape_cast %309 : vector<1x1x256xf32> to vector<1x256xf32>
    %311 = vector.broadcast %310 : vector<1x256xf32> to vector<8x256xf32>
    %312 = arith.mulf %308, %311 : vector<8x256xf32>
    %c8_179 = arith.constant 8 : index
    %c0_180 = arith.constant 0 : index
    %c0_181 = arith.constant 0 : index
    %313 = vector.load %arg7[%c8_179, %c0_180, %c0_181] : memref<9x16x8xbf16, #tpu.memory_space<vmem>>, vector<1x16x8xbf16>
    %314 = vector.shape_cast %313 : vector<1x16x8xbf16> to vector<16x8xbf16>
    %315 = arith.truncf %312 : vector<8x256xf32> to vector<8x256xbf16>
    %cst_182 = arith.constant dense<0.000000e+00> : vector<16x256xf32>
    %316 = tpu.matmul %314, %315, %cst_182 {dimension_numbers = #tpu.dot_dimension_numbers<[1], [0], [0], [1], [0, 0, 1, 1], [], []>} : vector<16x8xbf16>, vector<8x256xbf16>, vector<16x256xf32> -> vector<16x256xf32>
    %317 = arith.addf %305, %316 : vector<16x256xf32>
    %cst_183 = arith.constant 0.000000e+00 : f32
    %318 = vector.broadcast %cst_183 : f32 to vector<16x256xf32>
    %319 = arith.maximumf %317, %318 : vector<16x256xf32>
    %320 = tpu.concatenate %212, %319 in 0 : vector<40x256xf32>, vector<16x256xf32> -> vector<56x256xf32>
    %c0_184 = arith.constant 0 : index
    %c0_185 = arith.constant 0 : index
    %321 = vector.load %arg8[%c0_184, %c0_185] : memref<8x56xbf16, #tpu.memory_space<vmem>>, vector<8x56xbf16>
    %322 = arith.truncf %320 : vector<56x256xf32> to vector<56x256xbf16>
    %cst_186 = arith.constant dense<0.000000e+00> : vector<8x256xf32>
    %323 = tpu.matmul %321, %322, %cst_186 {dimension_numbers = #tpu.dot_dimension_numbers<[1], [0], [0], [1], [0, 0, 1, 1], [], []>} : vector<8x56xbf16>, vector<56x256xbf16>, vector<8x256xf32> -> vector<8x256xf32>
    %cst_187 = arith.constant 0.000000e+00 : f32
    %324 = vector.broadcast %cst_187 : f32 to vector<8x256xf32>
    %325 = arith.maximumf %323, %324 : vector<8x256xf32>
    %326 = vector.extract_strided_slice %325 {offsets = [0, 239], sizes = [8, 17], strides = [1, 1]} : vector<8x256xf32> to vector<8x17xf32>
    %327 = vector.extract_strided_slice %325 {offsets = [0, 0], sizes = [8, 239], strides = [1, 1]} : vector<8x256xf32> to vector<8x239xf32>
    %328 = tpu.concatenate %326, %327 in 1 : vector<8x17xf32>, vector<8x239xf32> -> vector<8x256xf32>
    %c0_188 = arith.constant 0 : index
    %c0_189 = arith.constant 0 : index
    %c0_190 = arith.constant 0 : index
    %329 = vector.load %arg1[%c0_188, %c0_189, %c0_190] : memref<9x1x256xf32, #tpu.memory_space<vmem>>, vector<1x1x256xf32>
    %330 = vector.shape_cast %329 : vector<1x1x256xf32> to vector<1x256xf32>
    %331 = vector.broadcast %330 : vector<1x256xf32> to vector<8x256xf32>
    %332 = arith.mulf %328, %331 : vector<8x256xf32>
    %c0_191 = arith.constant 0 : index
    %c0_192 = arith.constant 0 : index
    %c0_193 = arith.constant 0 : index
    %333 = vector.load %arg9[%c0_191, %c0_192, %c0_193] : memref<9x16x8xbf16, #tpu.memory_space<vmem>>, vector<1x16x8xbf16>
    %334 = vector.shape_cast %333 : vector<1x16x8xbf16> to vector<16x8xbf16>
    %335 = arith.truncf %332 : vector<8x256xf32> to vector<8x256xbf16>
    %cst_194 = arith.constant dense<0.000000e+00> : vector<16x256xf32>
    %336 = tpu.matmul %334, %335, %cst_194 {dimension_numbers = #tpu.dot_dimension_numbers<[1], [0], [0], [1], [0, 0, 1, 1], [], []>} : vector<16x8xbf16>, vector<8x256xbf16>, vector<16x256xf32> -> vector<16x256xf32>
    %337 = vector.extract_strided_slice %325 {offsets = [0, 240], sizes = [8, 16], strides = [1, 1]} : vector<8x256xf32> to vector<8x16xf32>
    %338 = vector.extract_strided_slice %325 {offsets = [0, 0], sizes = [8, 240], strides = [1, 1]} : vector<8x256xf32> to vector<8x240xf32>
    %339 = tpu.concatenate %337, %338 in 1 : vector<8x16xf32>, vector<8x240xf32> -> vector<8x256xf32>
    %c1_195 = arith.constant 1 : index
    %c0_196 = arith.constant 0 : index
    %c0_197 = arith.constant 0 : index
    %340 = vector.load %arg1[%c1_195, %c0_196, %c0_197] : memref<9x1x256xf32, #tpu.memory_space<vmem>>, vector<1x1x256xf32>
    %341 = vector.shape_cast %340 : vector<1x1x256xf32> to vector<1x256xf32>
    %342 = vector.broadcast %341 : vector<1x256xf32> to vector<8x256xf32>
    %343 = arith.mulf %339, %342 : vector<8x256xf32>
    %c1_198 = arith.constant 1 : index
    %c0_199 = arith.constant 0 : index
    %c0_200 = arith.constant 0 : index
    %344 = vector.load %arg9[%c1_198, %c0_199, %c0_200] : memref<9x16x8xbf16, #tpu.memory_space<vmem>>, vector<1x16x8xbf16>
    %345 = vector.shape_cast %344 : vector<1x16x8xbf16> to vector<16x8xbf16>
    %346 = arith.truncf %343 : vector<8x256xf32> to vector<8x256xbf16>
    %cst_201 = arith.constant dense<0.000000e+00> : vector<16x256xf32>
    %347 = tpu.matmul %345, %346, %cst_201 {dimension_numbers = #tpu.dot_dimension_numbers<[1], [0], [0], [1], [0, 0, 1, 1], [], []>} : vector<16x8xbf16>, vector<8x256xbf16>, vector<16x256xf32> -> vector<16x256xf32>
    %348 = arith.addf %336, %347 : vector<16x256xf32>
    %349 = vector.extract_strided_slice %325 {offsets = [0, 241], sizes = [8, 15], strides = [1, 1]} : vector<8x256xf32> to vector<8x15xf32>
    %350 = vector.extract_strided_slice %325 {offsets = [0, 0], sizes = [8, 241], strides = [1, 1]} : vector<8x256xf32> to vector<8x241xf32>
    %351 = tpu.concatenate %349, %350 in 1 : vector<8x15xf32>, vector<8x241xf32> -> vector<8x256xf32>
    %c2_202 = arith.constant 2 : index
    %c0_203 = arith.constant 0 : index
    %c0_204 = arith.constant 0 : index
    %352 = vector.load %arg1[%c2_202, %c0_203, %c0_204] : memref<9x1x256xf32, #tpu.memory_space<vmem>>, vector<1x1x256xf32>
    %353 = vector.shape_cast %352 : vector<1x1x256xf32> to vector<1x256xf32>
    %354 = vector.broadcast %353 : vector<1x256xf32> to vector<8x256xf32>
    %355 = arith.mulf %351, %354 : vector<8x256xf32>
    %c2_205 = arith.constant 2 : index
    %c0_206 = arith.constant 0 : index
    %c0_207 = arith.constant 0 : index
    %356 = vector.load %arg9[%c2_205, %c0_206, %c0_207] : memref<9x16x8xbf16, #tpu.memory_space<vmem>>, vector<1x16x8xbf16>
    %357 = vector.shape_cast %356 : vector<1x16x8xbf16> to vector<16x8xbf16>
    %358 = arith.truncf %355 : vector<8x256xf32> to vector<8x256xbf16>
    %cst_208 = arith.constant dense<0.000000e+00> : vector<16x256xf32>
    %359 = tpu.matmul %357, %358, %cst_208 {dimension_numbers = #tpu.dot_dimension_numbers<[1], [0], [0], [1], [0, 0, 1, 1], [], []>} : vector<16x8xbf16>, vector<8x256xbf16>, vector<16x256xf32> -> vector<16x256xf32>
    %360 = arith.addf %348, %359 : vector<16x256xf32>
    %361 = vector.extract_strided_slice %325 {offsets = [0, 255], sizes = [8, 1], strides = [1, 1]} : vector<8x256xf32> to vector<8x1xf32>
    %362 = vector.extract_strided_slice %325 {offsets = [0, 0], sizes = [8, 255], strides = [1, 1]} : vector<8x256xf32> to vector<8x255xf32>
    %363 = tpu.concatenate %361, %362 in 1 : vector<8x1xf32>, vector<8x255xf32> -> vector<8x256xf32>
    %c3_209 = arith.constant 3 : index
    %c0_210 = arith.constant 0 : index
    %c0_211 = arith.constant 0 : index
    %364 = vector.load %arg1[%c3_209, %c0_210, %c0_211] : memref<9x1x256xf32, #tpu.memory_space<vmem>>, vector<1x1x256xf32>
    %365 = vector.shape_cast %364 : vector<1x1x256xf32> to vector<1x256xf32>
    %366 = vector.broadcast %365 : vector<1x256xf32> to vector<8x256xf32>
    %367 = arith.mulf %363, %366 : vector<8x256xf32>
    %c3_212 = arith.constant 3 : index
    %c0_213 = arith.constant 0 : index
    %c0_214 = arith.constant 0 : index
    %368 = vector.load %arg9[%c3_212, %c0_213, %c0_214] : memref<9x16x8xbf16, #tpu.memory_space<vmem>>, vector<1x16x8xbf16>
    %369 = vector.shape_cast %368 : vector<1x16x8xbf16> to vector<16x8xbf16>
    %370 = arith.truncf %367 : vector<8x256xf32> to vector<8x256xbf16>
    %cst_215 = arith.constant dense<0.000000e+00> : vector<16x256xf32>
    %371 = tpu.matmul %369, %370, %cst_215 {dimension_numbers = #tpu.dot_dimension_numbers<[1], [0], [0], [1], [0, 0, 1, 1], [], []>} : vector<16x8xbf16>, vector<8x256xbf16>, vector<16x256xf32> -> vector<16x256xf32>
    %372 = arith.addf %360, %371 : vector<16x256xf32>
    %c4_216 = arith.constant 4 : index
    %c0_217 = arith.constant 0 : index
    %c0_218 = arith.constant 0 : index
    %373 = vector.load %arg9[%c4_216, %c0_217, %c0_218] : memref<9x16x8xbf16, #tpu.memory_space<vmem>>, vector<1x16x8xbf16>
    %374 = vector.shape_cast %373 : vector<1x16x8xbf16> to vector<16x8xbf16>
    %375 = arith.truncf %325 : vector<8x256xf32> to vector<8x256xbf16>
    %cst_219 = arith.constant dense<0.000000e+00> : vector<16x256xf32>
    %376 = tpu.matmul %374, %375, %cst_219 {dimension_numbers = #tpu.dot_dimension_numbers<[1], [0], [0], [1], [0, 0, 1, 1], [], []>} : vector<16x8xbf16>, vector<8x256xbf16>, vector<16x256xf32> -> vector<16x256xf32>
    %377 = arith.addf %372, %376 : vector<16x256xf32>
    %378 = vector.extract_strided_slice %325 {offsets = [0, 1], sizes = [8, 255], strides = [1, 1]} : vector<8x256xf32> to vector<8x255xf32>
    %379 = vector.extract_strided_slice %325 {offsets = [0, 0], sizes = [8, 1], strides = [1, 1]} : vector<8x256xf32> to vector<8x1xf32>
    %380 = tpu.concatenate %378, %379 in 1 : vector<8x255xf32>, vector<8x1xf32> -> vector<8x256xf32>
    %c5_220 = arith.constant 5 : index
    %c0_221 = arith.constant 0 : index
    %c0_222 = arith.constant 0 : index
    %381 = vector.load %arg1[%c5_220, %c0_221, %c0_222] : memref<9x1x256xf32, #tpu.memory_space<vmem>>, vector<1x1x256xf32>
    %382 = vector.shape_cast %381 : vector<1x1x256xf32> to vector<1x256xf32>
    %383 = vector.broadcast %382 : vector<1x256xf32> to vector<8x256xf32>
    %384 = arith.mulf %380, %383 : vector<8x256xf32>
    %c5_223 = arith.constant 5 : index
    %c0_224 = arith.constant 0 : index
    %c0_225 = arith.constant 0 : index
    %385 = vector.load %arg9[%c5_223, %c0_224, %c0_225] : memref<9x16x8xbf16, #tpu.memory_space<vmem>>, vector<1x16x8xbf16>
    %386 = vector.shape_cast %385 : vector<1x16x8xbf16> to vector<16x8xbf16>
    %387 = arith.truncf %384 : vector<8x256xf32> to vector<8x256xbf16>
    %cst_226 = arith.constant dense<0.000000e+00> : vector<16x256xf32>
    %388 = tpu.matmul %386, %387, %cst_226 {dimension_numbers = #tpu.dot_dimension_numbers<[1], [0], [0], [1], [0, 0, 1, 1], [], []>} : vector<16x8xbf16>, vector<8x256xbf16>, vector<16x256xf32> -> vector<16x256xf32>
    %389 = arith.addf %377, %388 : vector<16x256xf32>
    %390 = vector.extract_strided_slice %325 {offsets = [0, 15], sizes = [8, 241], strides = [1, 1]} : vector<8x256xf32> to vector<8x241xf32>
    %391 = vector.extract_strided_slice %325 {offsets = [0, 0], sizes = [8, 15], strides = [1, 1]} : vector<8x256xf32> to vector<8x15xf32>
    %392 = tpu.concatenate %390, %391 in 1 : vector<8x241xf32>, vector<8x15xf32> -> vector<8x256xf32>
    %c6_227 = arith.constant 6 : index
    %c0_228 = arith.constant 0 : index
    %c0_229 = arith.constant 0 : index
    %393 = vector.load %arg1[%c6_227, %c0_228, %c0_229] : memref<9x1x256xf32, #tpu.memory_space<vmem>>, vector<1x1x256xf32>
    %394 = vector.shape_cast %393 : vector<1x1x256xf32> to vector<1x256xf32>
    %395 = vector.broadcast %394 : vector<1x256xf32> to vector<8x256xf32>
    %396 = arith.mulf %392, %395 : vector<8x256xf32>
    %c6_230 = arith.constant 6 : index
    %c0_231 = arith.constant 0 : index
    %c0_232 = arith.constant 0 : index
    %397 = vector.load %arg9[%c6_230, %c0_231, %c0_232] : memref<9x16x8xbf16, #tpu.memory_space<vmem>>, vector<1x16x8xbf16>
    %398 = vector.shape_cast %397 : vector<1x16x8xbf16> to vector<16x8xbf16>
    %399 = arith.truncf %396 : vector<8x256xf32> to vector<8x256xbf16>
    %cst_233 = arith.constant dense<0.000000e+00> : vector<16x256xf32>
    %400 = tpu.matmul %398, %399, %cst_233 {dimension_numbers = #tpu.dot_dimension_numbers<[1], [0], [0], [1], [0, 0, 1, 1], [], []>} : vector<16x8xbf16>, vector<8x256xbf16>, vector<16x256xf32> -> vector<16x256xf32>
    %401 = arith.addf %389, %400 : vector<16x256xf32>
    %402 = vector.extract_strided_slice %325 {offsets = [0, 16], sizes = [8, 240], strides = [1, 1]} : vector<8x256xf32> to vector<8x240xf32>
    %403 = vector.extract_strided_slice %325 {offsets = [0, 0], sizes = [8, 16], strides = [1, 1]} : vector<8x256xf32> to vector<8x16xf32>
    %404 = tpu.concatenate %402, %403 in 1 : vector<8x240xf32>, vector<8x16xf32> -> vector<8x256xf32>
    %c7_234 = arith.constant 7 : index
    %c0_235 = arith.constant 0 : index
    %c0_236 = arith.constant 0 : index
    %405 = vector.load %arg1[%c7_234, %c0_235, %c0_236] : memref<9x1x256xf32, #tpu.memory_space<vmem>>, vector<1x1x256xf32>
    %406 = vector.shape_cast %405 : vector<1x1x256xf32> to vector<1x256xf32>
    %407 = vector.broadcast %406 : vector<1x256xf32> to vector<8x256xf32>
    %408 = arith.mulf %404, %407 : vector<8x256xf32>
    %c7_237 = arith.constant 7 : index
    %c0_238 = arith.constant 0 : index
    %c0_239 = arith.constant 0 : index
    %409 = vector.load %arg9[%c7_237, %c0_238, %c0_239] : memref<9x16x8xbf16, #tpu.memory_space<vmem>>, vector<1x16x8xbf16>
    %410 = vector.shape_cast %409 : vector<1x16x8xbf16> to vector<16x8xbf16>
    %411 = arith.truncf %408 : vector<8x256xf32> to vector<8x256xbf16>
    %cst_240 = arith.constant dense<0.000000e+00> : vector<16x256xf32>
    %412 = tpu.matmul %410, %411, %cst_240 {dimension_numbers = #tpu.dot_dimension_numbers<[1], [0], [0], [1], [0, 0, 1, 1], [], []>} : vector<16x8xbf16>, vector<8x256xbf16>, vector<16x256xf32> -> vector<16x256xf32>
    %413 = arith.addf %401, %412 : vector<16x256xf32>
    %414 = vector.extract_strided_slice %325 {offsets = [0, 17], sizes = [8, 239], strides = [1, 1]} : vector<8x256xf32> to vector<8x239xf32>
    %415 = vector.extract_strided_slice %325 {offsets = [0, 0], sizes = [8, 17], strides = [1, 1]} : vector<8x256xf32> to vector<8x17xf32>
    %416 = tpu.concatenate %414, %415 in 1 : vector<8x239xf32>, vector<8x17xf32> -> vector<8x256xf32>
    %c8_241 = arith.constant 8 : index
    %c0_242 = arith.constant 0 : index
    %c0_243 = arith.constant 0 : index
    %417 = vector.load %arg1[%c8_241, %c0_242, %c0_243] : memref<9x1x256xf32, #tpu.memory_space<vmem>>, vector<1x1x256xf32>
    %418 = vector.shape_cast %417 : vector<1x1x256xf32> to vector<1x256xf32>
    %419 = vector.broadcast %418 : vector<1x256xf32> to vector<8x256xf32>
    %420 = arith.mulf %416, %419 : vector<8x256xf32>
    %c8_244 = arith.constant 8 : index
    %c0_245 = arith.constant 0 : index
    %c0_246 = arith.constant 0 : index
    %421 = vector.load %arg9[%c8_244, %c0_245, %c0_246] : memref<9x16x8xbf16, #tpu.memory_space<vmem>>, vector<1x16x8xbf16>
    %422 = vector.shape_cast %421 : vector<1x16x8xbf16> to vector<16x8xbf16>
    %423 = arith.truncf %420 : vector<8x256xf32> to vector<8x256xbf16>
    %cst_247 = arith.constant dense<0.000000e+00> : vector<16x256xf32>
    %424 = tpu.matmul %422, %423, %cst_247 {dimension_numbers = #tpu.dot_dimension_numbers<[1], [0], [0], [1], [0, 0, 1, 1], [], []>} : vector<16x8xbf16>, vector<8x256xbf16>, vector<16x256xf32> -> vector<16x256xf32>
    %425 = arith.addf %413, %424 : vector<16x256xf32>
    %cst_248 = arith.constant 0.000000e+00 : f32
    %426 = vector.broadcast %cst_248 : f32 to vector<16x256xf32>
    %427 = arith.maximumf %425, %426 : vector<16x256xf32>
    %428 = tpu.concatenate %320, %427 in 0 : vector<56x256xf32>, vector<16x256xf32> -> vector<72x256xf32>
    %429 = vector.extract_strided_slice %428 {offsets = [0, 239], sizes = [72, 17], strides = [1, 1]} : vector<72x256xf32> to vector<72x17xf32>
    %430 = vector.extract_strided_slice %428 {offsets = [0, 0], sizes = [72, 239], strides = [1, 1]} : vector<72x256xf32> to vector<72x239xf32>
    %431 = tpu.concatenate %429, %430 in 1 : vector<72x17xf32>, vector<72x239xf32> -> vector<72x256xf32>
    %c0_249 = arith.constant 0 : index
    %c0_250 = arith.constant 0 : index
    %c0_251 = arith.constant 0 : index
    %432 = vector.load %arg1[%c0_249, %c0_250, %c0_251] : memref<9x1x256xf32, #tpu.memory_space<vmem>>, vector<1x1x256xf32>
    %433 = vector.shape_cast %432 : vector<1x1x256xf32> to vector<1x256xf32>
    %434 = vector.broadcast %433 : vector<1x256xf32> to vector<72x256xf32>
    %435 = arith.mulf %431, %434 : vector<72x256xf32>
    %c0_252 = arith.constant 0 : index
    %c0_253 = arith.constant 0 : index
    %c0_254 = arith.constant 0 : index
    %436 = vector.load %arg10[%c0_252, %c0_253, %c0_254] : memref<9x8x72xbf16, #tpu.memory_space<vmem>>, vector<1x8x72xbf16>
    %437 = vector.shape_cast %436 : vector<1x8x72xbf16> to vector<8x72xbf16>
    %438 = arith.truncf %435 : vector<72x256xf32> to vector<72x256xbf16>
    %cst_255 = arith.constant dense<0.000000e+00> : vector<8x256xf32>
    %439 = tpu.matmul %437, %438, %cst_255 {dimension_numbers = #tpu.dot_dimension_numbers<[1], [0], [0], [1], [0, 0, 1, 1], [], []>} : vector<8x72xbf16>, vector<72x256xbf16>, vector<8x256xf32> -> vector<8x256xf32>
    %440 = vector.extract_strided_slice %428 {offsets = [0, 240], sizes = [72, 16], strides = [1, 1]} : vector<72x256xf32> to vector<72x16xf32>
    %441 = vector.extract_strided_slice %428 {offsets = [0, 0], sizes = [72, 240], strides = [1, 1]} : vector<72x256xf32> to vector<72x240xf32>
    %442 = tpu.concatenate %440, %441 in 1 : vector<72x16xf32>, vector<72x240xf32> -> vector<72x256xf32>
    %c1_256 = arith.constant 1 : index
    %c0_257 = arith.constant 0 : index
    %c0_258 = arith.constant 0 : index
    %443 = vector.load %arg1[%c1_256, %c0_257, %c0_258] : memref<9x1x256xf32, #tpu.memory_space<vmem>>, vector<1x1x256xf32>
    %444 = vector.shape_cast %443 : vector<1x1x256xf32> to vector<1x256xf32>
    %445 = vector.broadcast %444 : vector<1x256xf32> to vector<72x256xf32>
    %446 = arith.mulf %442, %445 : vector<72x256xf32>
    %c1_259 = arith.constant 1 : index
    %c0_260 = arith.constant 0 : index
    %c0_261 = arith.constant 0 : index
    %447 = vector.load %arg10[%c1_259, %c0_260, %c0_261] : memref<9x8x72xbf16, #tpu.memory_space<vmem>>, vector<1x8x72xbf16>
    %448 = vector.shape_cast %447 : vector<1x8x72xbf16> to vector<8x72xbf16>
    %449 = arith.truncf %446 : vector<72x256xf32> to vector<72x256xbf16>
    %cst_262 = arith.constant dense<0.000000e+00> : vector<8x256xf32>
    %450 = tpu.matmul %448, %449, %cst_262 {dimension_numbers = #tpu.dot_dimension_numbers<[1], [0], [0], [1], [0, 0, 1, 1], [], []>} : vector<8x72xbf16>, vector<72x256xbf16>, vector<8x256xf32> -> vector<8x256xf32>
    %451 = arith.addf %439, %450 : vector<8x256xf32>
    %452 = vector.extract_strided_slice %428 {offsets = [0, 241], sizes = [72, 15], strides = [1, 1]} : vector<72x256xf32> to vector<72x15xf32>
    %453 = vector.extract_strided_slice %428 {offsets = [0, 0], sizes = [72, 241], strides = [1, 1]} : vector<72x256xf32> to vector<72x241xf32>
    %454 = tpu.concatenate %452, %453 in 1 : vector<72x15xf32>, vector<72x241xf32> -> vector<72x256xf32>
    %c2_263 = arith.constant 2 : index
    %c0_264 = arith.constant 0 : index
    %c0_265 = arith.constant 0 : index
    %455 = vector.load %arg1[%c2_263, %c0_264, %c0_265] : memref<9x1x256xf32, #tpu.memory_space<vmem>>, vector<1x1x256xf32>
    %456 = vector.shape_cast %455 : vector<1x1x256xf32> to vector<1x256xf32>
    %457 = vector.broadcast %456 : vector<1x256xf32> to vector<72x256xf32>
    %458 = arith.mulf %454, %457 : vector<72x256xf32>
    %c2_266 = arith.constant 2 : index
    %c0_267 = arith.constant 0 : index
    %c0_268 = arith.constant 0 : index
    %459 = vector.load %arg10[%c2_266, %c0_267, %c0_268] : memref<9x8x72xbf16, #tpu.memory_space<vmem>>, vector<1x8x72xbf16>
    %460 = vector.shape_cast %459 : vector<1x8x72xbf16> to vector<8x72xbf16>
    %461 = arith.truncf %458 : vector<72x256xf32> to vector<72x256xbf16>
    %cst_269 = arith.constant dense<0.000000e+00> : vector<8x256xf32>
    %462 = tpu.matmul %460, %461, %cst_269 {dimension_numbers = #tpu.dot_dimension_numbers<[1], [0], [0], [1], [0, 0, 1, 1], [], []>} : vector<8x72xbf16>, vector<72x256xbf16>, vector<8x256xf32> -> vector<8x256xf32>
    %463 = arith.addf %451, %462 : vector<8x256xf32>
    %464 = vector.extract_strided_slice %428 {offsets = [0, 255], sizes = [72, 1], strides = [1, 1]} : vector<72x256xf32> to vector<72x1xf32>
    %465 = vector.extract_strided_slice %428 {offsets = [0, 0], sizes = [72, 255], strides = [1, 1]} : vector<72x256xf32> to vector<72x255xf32>
    %466 = tpu.concatenate %464, %465 in 1 : vector<72x1xf32>, vector<72x255xf32> -> vector<72x256xf32>
    %c3_270 = arith.constant 3 : index
    %c0_271 = arith.constant 0 : index
    %c0_272 = arith.constant 0 : index
    %467 = vector.load %arg1[%c3_270, %c0_271, %c0_272] : memref<9x1x256xf32, #tpu.memory_space<vmem>>, vector<1x1x256xf32>
    %468 = vector.shape_cast %467 : vector<1x1x256xf32> to vector<1x256xf32>
    %469 = vector.broadcast %468 : vector<1x256xf32> to vector<72x256xf32>
    %470 = arith.mulf %466, %469 : vector<72x256xf32>
    %c3_273 = arith.constant 3 : index
    %c0_274 = arith.constant 0 : index
    %c0_275 = arith.constant 0 : index
    %471 = vector.load %arg10[%c3_273, %c0_274, %c0_275] : memref<9x8x72xbf16, #tpu.memory_space<vmem>>, vector<1x8x72xbf16>
    %472 = vector.shape_cast %471 : vector<1x8x72xbf16> to vector<8x72xbf16>
    %473 = arith.truncf %470 : vector<72x256xf32> to vector<72x256xbf16>
    %cst_276 = arith.constant dense<0.000000e+00> : vector<8x256xf32>
    %474 = tpu.matmul %472, %473, %cst_276 {dimension_numbers = #tpu.dot_dimension_numbers<[1], [0], [0], [1], [0, 0, 1, 1], [], []>} : vector<8x72xbf16>, vector<72x256xbf16>, vector<8x256xf32> -> vector<8x256xf32>
    %475 = arith.addf %463, %474 : vector<8x256xf32>
    %c4_277 = arith.constant 4 : index
    %c0_278 = arith.constant 0 : index
    %c0_279 = arith.constant 0 : index
    %476 = vector.load %arg10[%c4_277, %c0_278, %c0_279] : memref<9x8x72xbf16, #tpu.memory_space<vmem>>, vector<1x8x72xbf16>
    %477 = vector.shape_cast %476 : vector<1x8x72xbf16> to vector<8x72xbf16>
    %478 = arith.truncf %428 : vector<72x256xf32> to vector<72x256xbf16>
    %cst_280 = arith.constant dense<0.000000e+00> : vector<8x256xf32>
    %479 = tpu.matmul %477, %478, %cst_280 {dimension_numbers = #tpu.dot_dimension_numbers<[1], [0], [0], [1], [0, 0, 1, 1], [], []>} : vector<8x72xbf16>, vector<72x256xbf16>, vector<8x256xf32> -> vector<8x256xf32>
    %480 = arith.addf %475, %479 : vector<8x256xf32>
    %481 = vector.extract_strided_slice %428 {offsets = [0, 1], sizes = [72, 255], strides = [1, 1]} : vector<72x256xf32> to vector<72x255xf32>
    %482 = vector.extract_strided_slice %428 {offsets = [0, 0], sizes = [72, 1], strides = [1, 1]} : vector<72x256xf32> to vector<72x1xf32>
    %483 = tpu.concatenate %481, %482 in 1 : vector<72x255xf32>, vector<72x1xf32> -> vector<72x256xf32>
    %c5_281 = arith.constant 5 : index
    %c0_282 = arith.constant 0 : index
    %c0_283 = arith.constant 0 : index
    %484 = vector.load %arg1[%c5_281, %c0_282, %c0_283] : memref<9x1x256xf32, #tpu.memory_space<vmem>>, vector<1x1x256xf32>
    %485 = vector.shape_cast %484 : vector<1x1x256xf32> to vector<1x256xf32>
    %486 = vector.broadcast %485 : vector<1x256xf32> to vector<72x256xf32>
    %487 = arith.mulf %483, %486 : vector<72x256xf32>
    %c5_284 = arith.constant 5 : index
    %c0_285 = arith.constant 0 : index
    %c0_286 = arith.constant 0 : index
    %488 = vector.load %arg10[%c5_284, %c0_285, %c0_286] : memref<9x8x72xbf16, #tpu.memory_space<vmem>>, vector<1x8x72xbf16>
    %489 = vector.shape_cast %488 : vector<1x8x72xbf16> to vector<8x72xbf16>
    %490 = arith.truncf %487 : vector<72x256xf32> to vector<72x256xbf16>
    %cst_287 = arith.constant dense<0.000000e+00> : vector<8x256xf32>
    %491 = tpu.matmul %489, %490, %cst_287 {dimension_numbers = #tpu.dot_dimension_numbers<[1], [0], [0], [1], [0, 0, 1, 1], [], []>} : vector<8x72xbf16>, vector<72x256xbf16>, vector<8x256xf32> -> vector<8x256xf32>
    %492 = arith.addf %480, %491 : vector<8x256xf32>
    %493 = vector.extract_strided_slice %428 {offsets = [0, 15], sizes = [72, 241], strides = [1, 1]} : vector<72x256xf32> to vector<72x241xf32>
    %494 = vector.extract_strided_slice %428 {offsets = [0, 0], sizes = [72, 15], strides = [1, 1]} : vector<72x256xf32> to vector<72x15xf32>
    %495 = tpu.concatenate %493, %494 in 1 : vector<72x241xf32>, vector<72x15xf32> -> vector<72x256xf32>
    %c6_288 = arith.constant 6 : index
    %c0_289 = arith.constant 0 : index
    %c0_290 = arith.constant 0 : index
    %496 = vector.load %arg1[%c6_288, %c0_289, %c0_290] : memref<9x1x256xf32, #tpu.memory_space<vmem>>, vector<1x1x256xf32>
    %497 = vector.shape_cast %496 : vector<1x1x256xf32> to vector<1x256xf32>
    %498 = vector.broadcast %497 : vector<1x256xf32> to vector<72x256xf32>
    %499 = arith.mulf %495, %498 : vector<72x256xf32>
    %c6_291 = arith.constant 6 : index
    %c0_292 = arith.constant 0 : index
    %c0_293 = arith.constant 0 : index
    %500 = vector.load %arg10[%c6_291, %c0_292, %c0_293] : memref<9x8x72xbf16, #tpu.memory_space<vmem>>, vector<1x8x72xbf16>
    %501 = vector.shape_cast %500 : vector<1x8x72xbf16> to vector<8x72xbf16>
    %502 = arith.truncf %499 : vector<72x256xf32> to vector<72x256xbf16>
    %cst_294 = arith.constant dense<0.000000e+00> : vector<8x256xf32>
    %503 = tpu.matmul %501, %502, %cst_294 {dimension_numbers = #tpu.dot_dimension_numbers<[1], [0], [0], [1], [0, 0, 1, 1], [], []>} : vector<8x72xbf16>, vector<72x256xbf16>, vector<8x256xf32> -> vector<8x256xf32>
    %504 = arith.addf %492, %503 : vector<8x256xf32>
    %505 = vector.extract_strided_slice %428 {offsets = [0, 16], sizes = [72, 240], strides = [1, 1]} : vector<72x256xf32> to vector<72x240xf32>
    %506 = vector.extract_strided_slice %428 {offsets = [0, 0], sizes = [72, 16], strides = [1, 1]} : vector<72x256xf32> to vector<72x16xf32>
    %507 = tpu.concatenate %505, %506 in 1 : vector<72x240xf32>, vector<72x16xf32> -> vector<72x256xf32>
    %c7_295 = arith.constant 7 : index
    %c0_296 = arith.constant 0 : index
    %c0_297 = arith.constant 0 : index
    %508 = vector.load %arg1[%c7_295, %c0_296, %c0_297] : memref<9x1x256xf32, #tpu.memory_space<vmem>>, vector<1x1x256xf32>
    %509 = vector.shape_cast %508 : vector<1x1x256xf32> to vector<1x256xf32>
    %510 = vector.broadcast %509 : vector<1x256xf32> to vector<72x256xf32>
    %511 = arith.mulf %507, %510 : vector<72x256xf32>
    %c7_298 = arith.constant 7 : index
    %c0_299 = arith.constant 0 : index
    %c0_300 = arith.constant 0 : index
    %512 = vector.load %arg10[%c7_298, %c0_299, %c0_300] : memref<9x8x72xbf16, #tpu.memory_space<vmem>>, vector<1x8x72xbf16>
    %513 = vector.shape_cast %512 : vector<1x8x72xbf16> to vector<8x72xbf16>
    %514 = arith.truncf %511 : vector<72x256xf32> to vector<72x256xbf16>
    %cst_301 = arith.constant dense<0.000000e+00> : vector<8x256xf32>
    %515 = tpu.matmul %513, %514, %cst_301 {dimension_numbers = #tpu.dot_dimension_numbers<[1], [0], [0], [1], [0, 0, 1, 1], [], []>} : vector<8x72xbf16>, vector<72x256xbf16>, vector<8x256xf32> -> vector<8x256xf32>
    %516 = arith.addf %504, %515 : vector<8x256xf32>
    %517 = vector.extract_strided_slice %428 {offsets = [0, 17], sizes = [72, 239], strides = [1, 1]} : vector<72x256xf32> to vector<72x239xf32>
    %518 = vector.extract_strided_slice %428 {offsets = [0, 0], sizes = [72, 17], strides = [1, 1]} : vector<72x256xf32> to vector<72x17xf32>
    %519 = tpu.concatenate %517, %518 in 1 : vector<72x239xf32>, vector<72x17xf32> -> vector<72x256xf32>
    %c8_302 = arith.constant 8 : index
    %c0_303 = arith.constant 0 : index
    %c0_304 = arith.constant 0 : index
    %520 = vector.load %arg1[%c8_302, %c0_303, %c0_304] : memref<9x1x256xf32, #tpu.memory_space<vmem>>, vector<1x1x256xf32>
    %521 = vector.shape_cast %520 : vector<1x1x256xf32> to vector<1x256xf32>
    %522 = vector.broadcast %521 : vector<1x256xf32> to vector<72x256xf32>
    %523 = arith.mulf %519, %522 : vector<72x256xf32>
    %c8_305 = arith.constant 8 : index
    %c0_306 = arith.constant 0 : index
    %c0_307 = arith.constant 0 : index
    %524 = vector.load %arg10[%c8_305, %c0_306, %c0_307] : memref<9x8x72xbf16, #tpu.memory_space<vmem>>, vector<1x8x72xbf16>
    %525 = vector.shape_cast %524 : vector<1x8x72xbf16> to vector<8x72xbf16>
    %526 = arith.truncf %523 : vector<72x256xf32> to vector<72x256xbf16>
    %cst_308 = arith.constant dense<0.000000e+00> : vector<8x256xf32>
    %527 = tpu.matmul %525, %526, %cst_308 {dimension_numbers = #tpu.dot_dimension_numbers<[1], [0], [0], [1], [0, 0, 1, 1], [], []>} : vector<8x72xbf16>, vector<72x256xbf16>, vector<8x256xf32> -> vector<8x256xf32>
    %528 = arith.addf %516, %527 : vector<8x256xf32>
    %cst_309 = arith.constant 0.000000e+00 : f32
    %529 = vector.broadcast %cst_309 : f32 to vector<8x256xf32>
    %530 = arith.maximumf %528, %529 : vector<8x256xf32>
    %cst_310 = arith.constant 4.000000e-01 : f32
    %531 = vector.broadcast %cst_310 : f32 to vector<8x256xf32>
    %532 = arith.mulf %531, %530 : vector<8x256xf32>
    %533 = arith.addf %532, %1 : vector<8x256xf32>
    %c0_311 = arith.constant 0 : index
    %c0_312 = arith.constant 0 : index
    %c0_313 = arith.constant 0 : index
    %534 = vector.load %arg11[%c0_311, %c0_312, %c0_313] : memref<1x8x256xf32, #tpu.memory_space<vmem>>, vector<1x8x256xf32>
    %535 = vector.shape_cast %534 : vector<1x8x256xf32> to vector<8x256xf32>
    %536 = vector.shape_cast %533 : vector<8x256xf32> to vector<1x8x256xf32>
    tpu.vector_store %arg11[%c0_311, %c0_312, %c0_313], %536 {strides = array<i32>} : memref<1x8x256xf32, #tpu.memory_space<vmem>>, vector<1x8x256xf32>,
    return
  }
  func.func @transform_0(%arg0: i32) -> (i32, i32, i32) {
    %c0_i32 = arith.constant 0 : i32
    %c0_i32_0 = arith.constant 0 : i32
    %c0_i32_1 = arith.constant 0 : i32
    %c0_i32_2 = arith.constant 0 : i32
    return %c0_i32, %c0_i32_0, %c0_i32_1 : i32, i32, i32
  }
  func.func @transform_1(%arg0: i32) -> (i32, i32, i32) {
    %c0_i32 = arith.constant 0 : i32
    %c0_i32_0 = arith.constant 0 : i32
    %c0_i32_1 = arith.constant 0 : i32
    return %arg0, %c0_i32, %c0_i32_0 : i32, i32, i32
  }
  func.func @transform_2(%arg0: i32) -> (i32, i32, i32) {
    %c0_i32 = arith.constant 0 : i32
    %c0_i32_0 = arith.constant 0 : i32
    %c0_i32_1 = arith.constant 0 : i32
    %c0_i32_2 = arith.constant 0 : i32
    return %c0_i32, %c0_i32_0, %c0_i32_1 : i32, i32, i32
  }
  func.func @transform_3(%arg0: i32) -> (i32, i32) {
    %c0_i32 = arith.constant 0 : i32
    %c0_i32_0 = arith.constant 0 : i32
    %c0_i32_1 = arith.constant 0 : i32
    return %c0_i32, %c0_i32_0 : i32, i32
  }
  func.func @transform_4(%arg0: i32) -> (i32, i32, i32) {
    %c0_i32 = arith.constant 0 : i32
    %c0_i32_0 = arith.constant 0 : i32
    %c0_i32_1 = arith.constant 0 : i32
    %c0_i32_2 = arith.constant 0 : i32
    return %c0_i32, %c0_i32_0, %c0_i32_1 : i32, i32, i32
  }
  func.func @transform_5(%arg0: i32) -> (i32, i32) {
    %c0_i32 = arith.constant 0 : i32
    %c0_i32_0 = arith.constant 0 : i32
    %c0_i32_1 = arith.constant 0 : i32
    return %c0_i32, %c0_i32_0 : i32, i32
  }
  func.func @transform_6(%arg0: i32) -> (i32, i32, i32) {
    %c0_i32 = arith.constant 0 : i32
    %c0_i32_0 = arith.constant 0 : i32
    %c0_i32_1 = arith.constant 0 : i32
    %c0_i32_2 = arith.constant 0 : i32
    return %c0_i32, %c0_i32_0, %c0_i32_1 : i32, i32, i32
  }
  func.func @transform_7(%arg0: i32) -> (i32, i32) {
    %c0_i32 = arith.constant 0 : i32
    %c0_i32_0 = arith.constant 0 : i32
    %c0_i32_1 = arith.constant 0 : i32
    return %c0_i32, %c0_i32_0 : i32, i32
  }
  func.func @transform_8(%arg0: i32) -> (i32, i32, i32) {
    %c0_i32 = arith.constant 0 : i32
    %c0_i32_0 = arith.constant 0 : i32
    %c0_i32_1 = arith.constant 0 : i32
    %c0_i32_2 = arith.constant 0 : i32
    return %c0_i32, %c0_i32_0, %c0_i32_1 : i32, i32, i32
  }
  func.func @transform_9(%arg0: i32) -> (i32, i32, i32) {
    %c0_i32 = arith.constant 0 : i32
    %c0_i32_0 = arith.constant 0 : i32
    %c0_i32_1 = arith.constant 0 : i32
    %c0_i32_2 = arith.constant 0 : i32
    return %c0_i32, %c0_i32_0, %c0_i32_1 : i32, i32, i32
  }
  func.func @transform_10(%arg0: i32) -> (i32, i32, i32) {
    %c0_i32 = arith.constant 0 : i32
    %c0_i32_0 = arith.constant 0 : i32
    %c0_i32_1 = arith.constant 0 : i32
    return %arg0, %c0_i32, %c0_i32_0 : i32, i32, i32
  }
}

</mosaic_0001>

<bundles_post_ra>
// kernel: tpu_custom_call.1
= control target key start
LH: loop header
LB: loop body
LE: loop exit
PB: predicated region body
PF: predicated region fallthrough
CT: control target
= control target key end

     0   :  { %6 = vsyncpa [#allocation3], 0  ;;  %s127_s0 = inlined_call_operand.hbm [shape: f32[8,256], index: 0, kind: input, shape index: {}]   ;;  %s128_s1 = inlined_call_operand.hbm [shape: f32[8,256], index: 1, kind: output, shape index: {}]  }
   0x1   :  { %7 = vsyncpa [#allocation4], 0  ;;  %s13_s8 = sshll.u32 %s127_s0, 4  ;;  %s108_s9 = smov [#allocation2]   ;;  %s14_s8 = int_to_ptr.hbm [resolvable:$true] %s13_s8 }
   0x2   :  { %s15_s10 = sshll.u32 %s108_s9, 4  ;;  %s16_s10 = int_to_ptr.vmem [resolvable:$true] %s15_s10 }
   0x3   :  { %18 = dma.hbm_to_vmem [thread:$0]  %s14_s8, 256, %s16_s10, [#allocation3]  }
   0x4   :  { %104 = dma.done.wait [#allocation3], 256  }
   0x5   :  { %105 = vsyncadd [#allocation3], 4294967040  ;;  %v23_v0 = vld [vmem:[#allocation2] sm:$0xff]  ;;  %s109_s11 = smov 3   ;;  %v24_v1 = vld [vmem:[#allocation2 + $0x8] sm:$0xff]  ;;  %v29_v2 = vlaneseq  ;;  %s110_s12 = smov [#allocation5]  }
   0x6   :  { %25 = vrot.lane.b32.xlu0 %v23_v0, %s109_s11  ;;  %s41_s13 = sshll.u32 %s110_s12, 4  ;;  %s43_s15 = sshll.u32 %s128_s1, 4  ;;  %s42_s13 = int_to_ptr.vmem [resolvable:$true] %s41_s13  ;;  %s44_s15 = int_to_ptr.hbm [resolvable:$true] %s43_s15 }
   0x7   :  { %v30_v4 = vand.u32 127, %v29_v2 }
   0x9   :  { %vm31_vm0 = vcmp.lt.s32.totalorder %v30_v4, 3 }
   0xe   :  { %27 = vrot.lane.b32.xlu0 %v24_v1, %s109_s11 }
  0x78   :  { %v26_v3 = vpop.permute.xlu0 %25 }
  0x80   :  { %v28_v5 = vpop.permute.xlu0 %27 }
  0x81   :  { %v32_v6 = vsel %vm31_vm0, %v26_v3, %v28_v5  ;;  %v33_v7 = vsel %vm31_vm0, %v28_v5, %v26_v3 }
  0x82   :  { %34 = vst [vmem:[#allocation5] sm:$0xff] %v33_v7 }
  0x83   :  { %35 = vst [vmem:[#allocation5 + $0x8] sm:$0xff] %v32_v6 }
  0x84   :  { %46 = dma.vmem_to_hbm [thread:$0]  %s42_s13, 256, %s44_s15, [#allocation4]  }
  0x85   :  { %106 = dma.done.wait [#allocation4], 256  }
  0x86   :  { %107 = vsyncadd [#allocation4], 4294967040 }
  0x87   :  { %51 = vsyncpa [#allocation3], 1 }
  0x88   :  { %52 = vsyncpa [#allocation4], 1 }

// kernel: exchange_pallas.1
= control target key start
LH: loop header
LB: loop body
LE: loop exit
PB: predicated region body
PF: predicated region fallthrough
CT: control target
= control target key end

     0   :  { %s4404_s13 = smov 0   ;;  %s6332_s0 = inlined_call_operand.vmem [shape: f32[9,1,256], index: 0, kind: input, shape index: {}]   ;;  %s6333_s1 = inlined_call_operand.vmem [shape: f32[2,8,256], index: 1, kind: input, shape index: {}]   ;;  %s6334_s2 = inlined_call_operand.vmem [shape: bf16[9,16,8], index: 2, kind: input, shape index: {}]   ;;  %s6335_s3 = inlined_call_operand.vmem [shape: bf16[8,24], index: 3, kind: input, shape index: {}]   ;;  %s6336_s4 = inlined_call_operand.vmem [shape: bf16[9,16,8], index: 4, kind: input, shape index: {}]   ;;  %s6337_s5 = inlined_call_operand.vmem [shape: bf16[8,40], index: 5, kind: input, shape index: {}]   ;;  %s6338_s6 = inlined_call_operand.vmem [shape: bf16[9,16,8], index: 6, kind: input, shape index: {}]   ;;  %s6339_s7 = inlined_call_operand.vmem [shape: bf16[8,56], index: 7, kind: input, shape index: {}]   ;;  %s6340_s8 = inlined_call_operand.vmem [shape: bf16[9,16,8], index: 8, kind: input, shape index: {}]   ;;  %s6341_s9 = inlined_call_operand.vmem [shape: bf16[9,8,72], index: 9, kind: input, shape index: {}]   ;;  %s6342_s10 = inlined_call_operand.vmem [shape: f32[2,8,256], index: 10, kind: output, shape index: {}]  }
   0x1 LB: > { %s3947_s14 = sadd.s32 4294967295, %s4339_s13   ;;  %p3951_p0 = scmp.ge.s32.totalorder %s4339_s13, 1  ;;  %s4339_s13 = sphi %s4404_s13, %s20_s13  }
   0x2   : > { %p312_p1 = scmp.lt.s32.totalorder %s4339_s13, 3 }
   0x4   : > { %p313_p2 = pnand %p3951_p0, %p312_p1 }
   0x6   : > { %316 = sbr.rel (%p313_p2) target bundleno = 2177 (0x881), region = 60 }
   0xb   : > { %p350_p3 = scmp.lt.s32.totalorder %s3947_s14, 1  ;;  %s4341_s19 = smov 17   ;;  %v3971_v3 = vld [vmem:[%s6332_s0 + $0x4] sm:$0x3]  ;;  %vm502_vm0 = vcmask 121856   ;;  %vm370_vm1 = vcmask 138240  }
   0xc   : > { %s4342_s20 = smov 16   ;;  %s4343_s21 = smov 15   ;;  %v4463_v5 = vperm.slane %v3971_v3, 0  ;;  %v4466_v9 = vperm.slane %v3971_v3, 1  ;;  %v3956_v11 = vld [vmem:[%s6332_s0 + $0x2] sm:$0x3] }
   0xd   : > { %s6678_s14 = smov (!%p350_p3, %s3947_s14), 1  ;;  %s4344_s22 = smov 1   ;;  %v375_v12 = vld [vmem:[%s6332_s0] sm:$0x3]  ;;  %vm392_vm2 = vcmask 130048   ;;  %v4481_v15 = vperm.slane %v3956_v11, 0 }
   0xe   : > { %s4277_s15 = sshll.u32 %s6678_s14, 4  ;;  %s4345_s23 = smov 127   ;;  %6444 = vst [vmem:[#allocation2_spill] sm:$0xff] %v4463_v5  ;;  %v4483_v16 = vperm.slane %v3956_v11, 1  ;;  %v4485_v17 = vperm.slane %v375_v12, 0  ;;  %v4487_v18 = vperm.slane %v375_v12, 1 }
   0xf   : > { %s4420_s18 = scalar_lea.vmem %s6333_s1, %s4277_s15  ;;  %s4346_s24 = smov 113   ;;  %6445 = vst [vmem:[#allocation3_spill] sm:$0xff] %v4466_v9  ;;  %vm420_vm3 = vcmask 1043456   ;;  %v3980_v23 = vld [vmem:[%s6332_s0 + $0x6] sm:$0x3]  ;;  %vm572_vm4 = vcmask 7168  }
  0x10   : > { %v4423_v0 = vld [vmem:[%s4420_s18 + $0x8] sm:$0xff]  ;;  %v4432_v1 = vld [vmem:[%s4420_s18] sm:$0xff]  ;;  %s4347_s25 = smov 112   ;;  %s4348_s26 = smov 111   ;;  %v4513_v33 = vperm.slane %v3980_v23, 0  ;;  %v4524_v39 = vperm.slane %v3980_v23, 1 }
  0x11   : > { %364 = vrot.lane.b32.xlu1 %v4423_v0, %s4341_s19  ;;  %387 = vrot.lane.b32.xlu0 %v4423_v0, %s4342_s20  ;;  %v640_v40 = vpack.c.bf16 %v4432_v1, %v4432_v1  ;;  %v641_v41 = vpack.c.bf16 %v4423_v0, %v4423_v0  ;;  %v4280_v46 = vld [vmem:[%s6334_s2 + $0x8] sm:$0xff]  ;;  %vm416_vm5 = vcmask 64512   ;;  %v4279_v48 = vld [vmem:[%s6334_s2] sm:$0xff]  ;;  %vm692_vm6 = vcmask 1039360  }
  0x12   : > { %497 = vrot.lane.b32.xlu2 %v4423_v0, %s4343_s21  ;;  %6452 = vst [vmem:[#allocation10_spill] sm:$0xff] %v4513_v33  ;;  %v3997_v57 = vld [vmem:[%s6332_s0 + $0xa] sm:$0x3]  ;;  %v4006_v58 = vld [vmem:[%s6332_s0 + $0xc] sm:$0x3]  ;;  %vm762_vm7 = vcmask 924672  }
  0x13   : > { %6453 = vst [vmem:[#allocation11_spill] sm:$0xff] %v4524_v39  ;;  %v651_v53 = vsel %vm420_vm3, %v640_v40, 0  ;;  %v654_v54 = vsel %vm420_vm3, %v641_v41, 0  ;;  %v4564_v61 = vperm.slane %v3997_v57, 0  ;;  %v4566_v62 = vperm.slane %v3997_v57, 1  ;;  %v4282_v40 = vld [vmem:[%s6334_s2 + $0x18] sm:$0xff] }
  0x14   : > { %v4570_v3 = vperm.slane %v4006_v58, 0  ;;  %vm832_vm8 = vcmask 916480   ;;  %vm902_vm9 = vcmask 908288   ;;  %vm977_vm10 = vcmask 195584  }
  0x15   : > { %6456 = vst [vmem:[#allocation14_spill] sm:$0xff] %v4564_v61  ;;  %vm1564_vm11 = vcmask 326656   ;;  %vm2151_vm12 = vcmask 457728   ;;  %vm2948_vm13 = vcmask 588800  }
  0x16   : > { %6457 = vst [vmem:[#allocation15_spill] sm:$0xff] %v4566_v62 }
  0x17   : > { %6458 = vst [vmem:[#allocation16_spill] sm:$0xff] %v4570_v3 }
  0x19   : > { %368 = vrot.lane.b32.xlu1 %v4432_v1, %s4341_s19  ;;  %390 = vrot.lane.b32.xlu0 %v4432_v1, %s4342_s20 }
  0x1a   : > { %500 = vrot.lane.b32.xlu2 %v4432_v1, %s4343_s21 }
  0x21   : > { %570 = vrot.lane.b32.xlu1 %v4432_v1, %s4344_s22  ;;  %567 = vrot.lane.b32.xlu0 %v4423_v0, %s4344_s22 }
  0x22   : > { %688 = vrot.lane.b32.xlu2 %v4432_v1, %s4345_s23 }
  0x29   : > { %690 = vrot.lane.b32.xlu0 %v4423_v0, %s4345_s23  ;;  %758 = vrot.lane.b32.xlu1 %v4432_v1, %s4346_s24 }
  0x2a   : > { %760 = vrot.lane.b32.xlu2 %v4423_v0, %s4346_s24 }
  0x31   : > { %830 = vrot.lane.b32.xlu1 %v4423_v0, %s4347_s25  ;;  %828 = vrot.lane.b32.xlu0 %v4432_v1, %s4347_s25 }
  0x32   : > { %898 = vrot.lane.b32.xlu2 %v4432_v1, %s4348_s26 }
  0x39   : > { %900 = vrot.lane.b32.xlu0 %v4423_v0, %s4348_s26 }
  0x6c   : > { %v498_v2 = vpop.permute.xlu2 %497 }
  0x74   : > { %v501_v4 = vpop.permute.xlu2 %500 }
  0x75   : > { %v506_v8 = vsel %vm502_vm0, %v498_v2, %v501_v4  ;;  %v503_v10 = vsel %vm502_vm0, %v501_v4, %v498_v2  ;;  %v4572_v4 = vperm.slane %v4006_v58, 1 }
  0x76   : > { %v4476_v13 = vmul.f32 %v4463_v5, %v506_v8  ;;  %v4479_v14 = vmul.f32 %v4466_v9, %v503_v10 }
  0x77   : > { %6459 = vst [vmem:[#allocation17_spill] sm:$0xff] %v4572_v4 }
  0x78   : > { %6446 = vst [vmem:[#allocation4_spill] sm:$0xff] %v4476_v13  ;;  %v519_v19 = vpack.c.bf16 %v4476_v13, %v4476_v13  ;;  %v520_v22 = vpack.c.bf16 %v4479_v14, %v4479_v14 }
  0x79   : > { %6447 = vst [vmem:[#allocation5_spill] sm:$0xff] %v4479_v14 }
  0x7a   : > { %v530_v32 = vsel %vm420_vm3, %v519_v19, 0  ;;  %v533_v38 = vsel %vm420_vm3, %v520_v22, 0 }
  0x7c   : > { %v689_v47 = vpop.permute.xlu2 %688 }
  0x83   : > { %v365_v6 = vpop.permute.xlu1 %364  ;;  %v388_v7 = vpop.permute.xlu0 %387 }
  0x8b   : > { %v369_v20 = vpop.permute.xlu1 %368  ;;  %v391_v21 = vpop.permute.xlu0 %390 }
  0x8c   : > { %v371_v24 = vsel %vm370_vm1, %v369_v20, %v365_v6  ;;  %v374_v25 = vsel %vm370_vm1, %v365_v6, %v369_v20  ;;  %v393_v26 = vsel %vm392_vm2, %v391_v21, %v388_v7  ;;  %v396_v27 = vsel %vm392_vm2, %v388_v7, %v391_v21  ;;  %v761_v6 = vpop.permute.xlu2 %760 }
  0x8d   : > { %v4501_v28 = vmul.f32 %v4481_v15, %v396_v27  ;;  %v4504_v29 = vmul.f32 %v4483_v16, %v393_v26  ;;  %v4507_v30 = vmul.f32 %v4485_v17, %v374_v25  ;;  %v4510_v31 = vmul.f32 %v4487_v18, %v371_v24  ;;  %v4015_v24 = vld [vmem:[%s6332_s0 + $0xe] sm:$0x3] }
  0x8f   : > { %6448 = vst [vmem:[#allocation6_spill] sm:$0xff] %v4501_v28  ;;  %v409_v34 = vpack.c.bf16 %v4501_v28, %v4501_v28  ;;  %v410_v35 = vpack.c.bf16 %v4504_v29, %v4504_v29  ;;  %v385_v36 = vpack.c.bf16 %v4507_v30, %v4507_v30  ;;  %v386_v37 = vpack.c.bf16 %v4510_v31, %v4510_v31 }
  0x90   : > { %6449 = vst [vmem:[#allocation7_spill] sm:$0xff] %v4504_v29 }
  0x91   : > { %6450 = vst [vmem:[#allocation8_spill] sm:$0xff] %v4507_v30  ;;  %v422_v42 = vsel %vm420_vm3, %v409_v34, 0  ;;  %v425_v43 = vsel %vm420_vm3, %v410_v35, 0  ;;  %v464_v44 = vsel %vm420_vm3, %v385_v36, 0  ;;  %v467_v45 = vsel %vm420_vm3, %v386_v37, 0  ;;  %v4281_v34 = vld [vmem:[%s6334_s2 + $0x10] sm:$0xff] }
  0x92   : > { %6451 = vst [vmem:[#allocation9_spill] sm:$0xff] %v4510_v31  ;;  %434 = vmatpush.bf16.msra.mxu0 %v422_v42  ;;  %448 = vmatpush.bf16.msra.mxu1 %v425_v43  ;;  %v4606_v37 = vperm.slane %v4015_v24, 0 }
  0x93   : > { %476 = vmatpush.bf16.msra.mxu2 %v464_v44  ;;  %490 = vmatpush.bf16.msra.mxu3 %v467_v45  ;;  %v571_v49 = vpop.permute.xlu1 %570  ;;  %v568_v50 = vpop.permute.xlu0 %567 }
  0x94   : > { %v573_v51 = vsel %vm572_vm4, %v571_v49, %v568_v50  ;;  %v576_v52 = vsel %vm572_vm4, %v568_v50, %v571_v49  ;;  %6464 = vst [vmem:[#allocation22_spill] sm:$0xff] %v4606_v37  ;;  %v4024_v49 = vld [vmem:[%s6332_s0 + $0x10] sm:$0x3] }
  0x95   : > { %3963 = vmatmul.msk.bf16.vlgmr.msra.gmra.mxu0 %vm416_vm5, %v4280_v46  ;;  %3964 = vmatmul.msk.bf16.vlgmr.msra.gmra.mxu1 %vm416_vm5, %v4280_v46  ;;  %v4547_v55 = vmul.f32 %v4513_v33, %v576_v52  ;;  %v4550_v56 = vmul.f32 %v4524_v39, %v573_v51  ;;  %v4636_v57 = vperm.slane %v4024_v49, 0  ;;  %v4638_v58 = vperm.slane %v4024_v49, 1 }
  0x96   : > { %542 = vmatpush.bf16.msrb.mxu0 %v530_v32  ;;  %556 = vmatpush.bf16.msrb.mxu1 %v533_v38  ;;  %v4608_v38 = vperm.slane %v4015_v24, 1  ;;  %v4285_v24 = vld [vmem:[%s6334_s2 + $0x30] sm:$0xff] }
  0x97   : > { %6454 = vst [vmem:[#allocation12_spill] sm:$0xff] %v4547_v55  ;;  %3969 = vmatmul.msk.bf16.vlgmr.msra.gmra.mxu2 %vm416_vm5, %v4279_v48  ;;  %3970 = vmatmul.msk.bf16.vlgmr.msra.gmra.mxu3 %vm416_vm5, %v4279_v48  ;;  %v589_v59 = vpack.c.bf16 %v4547_v55, %v4547_v55  ;;  %v590_v60 = vpack.c.bf16 %v4550_v56, %v4550_v56 }
  0x98   : > { %6455 = vst [vmem:[#allocation13_spill] sm:$0xff] %v4550_v56 }
  0x99   : > { %v600_v63 = vsel %vm420_vm3, %v589_v59, 0  ;;  %v603_v2 = vsel %vm420_vm3, %v590_v60, 0  ;;  %6465 = vst [vmem:[#allocation23_spill] sm:$0xff] %v4608_v38 }
  0x9a   : > { %663 = vmatpush.bf16.msra.mxu0 %v651_v53  ;;  %677 = vmatpush.bf16.msra.mxu1 %v654_v54  ;;  %v899_v54 = vpop.permute.xlu2 %898  ;;  %6468 = vst [vmem:[#allocation26_spill] sm:$0xff] %v4636_v57 }
  0x9b   : > { %612 = vmatpush.bf16.msrb.mxu2 %v600_v63  ;;  %626 = vmatpush.bf16.msrb.mxu3 %v603_v2  ;;  %v691_v7 = vpop.permute.xlu0 %690  ;;  %v759_v8 = vpop.permute.xlu1 %758  ;;  %6469 = vst [vmem:[#allocation27_spill] sm:$0xff] %v4638_v58 }
  0x9c   : > { %v693_v10 = vsel %vm692_vm6, %v689_v47, %v691_v7  ;;  %v697_v11 = vsel %vm692_vm6, %v691_v7, %v689_v47  ;;  %v763_v12 = vsel %vm762_vm7, %v759_v8, %v761_v6  ;;  %v767_v19 = vsel %vm762_vm7, %v761_v6, %v759_v8 }
  0x9d   : > { %v4579_v20 = vmul.f32 %v4564_v61, %v693_v10  ;;  %v4582_v21 = vmul.f32 %v4566_v62, %v697_v11  ;;  %v4585_v22 = vmul.f32 %v4570_v3, %v763_v12  ;;  %v4588_v23 = vmul.f32 %v4572_v4, %v767_v19  ;;  %v4283_v10 = vld [vmem:[%s6334_s2 + $0x20] sm:$0xff]  ;;  %v4284_v11 = vld [vmem:[%s6334_s2 + $0x28] sm:$0xff] }
  0x9f   : > { %6460 = vst [vmem:[#allocation18_spill] sm:$0xff] %v4579_v20  ;;  %v710_v25 = vpack.c.bf16 %v4579_v20, %v4579_v20  ;;  %v711_v26 = vpack.c.bf16 %v4582_v21, %v4582_v21  ;;  %v780_v27 = vpack.c.bf16 %v4585_v22, %v4585_v22  ;;  %v781_v32 = vpack.c.bf16 %v4588_v23, %v4588_v23 }
  0xa0   : > { %6461 = vst [vmem:[#allocation19_spill] sm:$0xff] %v4582_v21 }
  0xa1   : > { %6462 = vst [vmem:[#allocation20_spill] sm:$0xff] %v4585_v22  ;;  %v721_v35 = vsel %vm420_vm3, %v710_v25, 0  ;;  %v724_v36 = vsel %vm420_vm3, %v711_v26, 0  ;;  %v791_v45 = vsel %vm420_vm3, %v780_v27, 0  ;;  %v794_v46 = vsel %vm420_vm3, %v781_v32, 0  ;;  %v4286_v25 = vld [vmem:[%s6334_s2 + $0x38] sm:$0xff] }
  0xa2   : > { %6463 = vst [vmem:[#allocation21_spill] sm:$0xff] %v4588_v23  ;;  %733 = vmatpush.bf16.msra.mxu2 %v721_v35  ;;  %747 = vmatpush.bf16.msra.mxu3 %v724_v36  ;;  %v4287_v26 = vld [vmem:[%s6334_s2 + $0x40] sm:$0xff] }
  0xa3   : > { %v831_v41 = vpop.permute.xlu1 %830  ;;  %v829_v42 = vpop.permute.xlu0 %828 }
  0xa4   : > { %v833_v43 = vsel %vm832_vm8, %v829_v42, %v831_v41  ;;  %v837_v44 = vsel %vm832_vm8, %v831_v41, %v829_v42 }
  0xa5   : > { %3978 = vmatmul.msk.bf16.vlgmr.msrb.gmra.mxu0 %vm416_vm5, %v4281_v34  ;;  %3979 = vmatmul.msk.bf16.vlgmr.msrb.gmra.mxu1 %vm416_vm5, %v4281_v34  ;;  %v4620_v47 = vmul.f32 %v4606_v37, %v833_v43  ;;  %v4623_v48 = vmul.f32 %v4608_v38, %v837_v44 }
  0xa6   : > { %803 = vmatpush.bf16.msrb.mxu0 %v791_v45  ;;  %817 = vmatpush.bf16.msrb.mxu1 %v794_v46 }
  0xa7   : > { %6466 = vst [vmem:[#allocation24_spill] sm:$0xff] %v4620_v47  ;;  %3987 = vmatmul.msk.bf16.vlgmr.msrb.gmra.mxu2 %vm416_vm5, %v4282_v40  ;;  %3988 = vmatmul.msk.bf16.vlgmr.msrb.gmra.mxu3 %vm416_vm5, %v4282_v40  ;;  %v850_v50 = vpack.c.bf16 %v4620_v47, %v4620_v47  ;;  %v851_v51 = vpack.c.bf16 %v4623_v48, %v4623_v48 }
  0xa8   : > { %6467 = vst [vmem:[#allocation25_spill] sm:$0xff] %v4623_v48 }
  0xa9   : > { %v861_v52 = vsel %vm420_vm3, %v850_v50, 0  ;;  %v864_v53 = vsel %vm420_vm3, %v851_v51, 0 }
  0xaa   : > { %873 = vmatpush.bf16.msrb.mxu2 %v861_v52  ;;  %887 = vmatpush.bf16.msrb.mxu3 %v864_v53 }
  0xab   : > { %v901_v59 = vpop.permute.xlu0 %900 }
  0xac   : > { %v903_v60 = vsel %vm902_vm9, %v899_v54, %v901_v59  ;;  %v907_v63 = vsel %vm902_vm9, %v901_v59, %v899_v54 }
  0xad   : > { %v4643_v2 = vmul.f32 %v4636_v57, %v903_v60  ;;  %v4646_v6 = vmul.f32 %v4638_v58, %v907_v63 }
  0xaf   : > { %6470 = vst [vmem:[#allocation28_spill] sm:$0xff] %v4643_v2  ;;  %v920_v7 = vpack.c.bf16 %v4643_v2, %v4643_v2  ;;  %v921_v8 = vpack.c.bf16 %v4646_v6, %v4646_v6 }
  0xb0   : > { %6471 = vst [vmem:[#allocation29_spill] sm:$0xff] %v4646_v6 }
  0xb1   : > { %v931_v12 = vsel %vm420_vm3, %v920_v7, 0  ;;  %v934_v19 = vsel %vm420_vm3, %v921_v8, 0 }
  0xb5   : > { %3995 = vmatmul.msk.bf16.vlgmr.msra.gmra.mxu0 %vm416_vm5, %v4283_v10  ;;  %3996 = vmatmul.msk.bf16.vlgmr.msra.gmra.mxu1 %vm416_vm5, %v4283_v10 }
  0xb6   : > { %943 = vmatpush.bf16.msra.mxu0 %v931_v12  ;;  %957 = vmatpush.bf16.msra.mxu1 %v934_v19 }
  0xb7   : > { %4004 = vmatmul.msk.bf16.vlgmr.msra.gmra.mxu2 %vm416_vm5, %v4284_v11  ;;  %4005 = vmatmul.msk.bf16.vlgmr.msra.gmra.mxu3 %vm416_vm5, %v4284_v11 }
  0xc5   : > { %4013 = vmatmul.msk.bf16.vlgmr.msrb.gmra.mxu0 %vm416_vm5, %v4285_v24  ;;  %4014 = vmatmul.msk.bf16.vlgmr.msrb.gmra.mxu1 %vm416_vm5, %v4285_v24 }
  0xc7   : > { %4022 = vmatmul.msk.bf16.vlgmr.msrb.gmra.mxu2 %vm416_vm5, %v4286_v25  ;;  %4023 = vmatmul.msk.bf16.vlgmr.msrb.gmra.mxu3 %vm416_vm5, %v4286_v25 }
  0xd5   : > { %4031 = vmatmul.msk.bf16.vlgmr.msra.gmra.mxu0 %vm416_vm5, %v4287_v26  ;;  %4032 = vmatmul.msk.bf16.vlgmr.msra.gmra.mxu1 %vm416_vm5, %v4287_v26 }
 0x112   : > { %v436_v27 = vpop.f32.mrf.mxu0  ;;  %v450_v32 = vpop.f32.mrf.mxu1 }
 0x11a   : > { %v478_v34 = vpop.f32.mrf.mxu2  ;;  %v492_v35 = vpop.f32.mrf.mxu3 }
 0x11b   : > { %v438_v36 = vpop.f32.mrf.mxu0  ;;  %v452_v40 = vpop.f32.mrf.mxu1  ;;  %v479_v6 = vadd.f32 %v478_v34, %v436_v27  ;;  %v493_v2 = vadd.f32 %v492_v35, %v450_v32 }
 0x122   : > { %v480_v41 = vpop.f32.mrf.mxu2  ;;  %v494_v42 = vpop.f32.mrf.mxu3 }
 0x123   : > { %v544_v43 = vpop.f32.mrf.mxu0  ;;  %v558_v44 = vpop.f32.mrf.mxu1  ;;  %v481_v48 = vadd.f32 %v480_v41, %v438_v36  ;;  %v495_v47 = vadd.f32 %v494_v42, %v452_v40 }
 0x124   : > { %v563_v23 = vadd.f32 %v544_v43, %v479_v6  ;;  %v564_v22 = vadd.f32 %v558_v44, %v493_v2  ;;  %v972_v43 = vld [vmem:[%s6335_s3] sm:$0xf] }
 0x12a   : > { %v614_v45 = vpop.f32.mrf.mxu2  ;;  %v628_v46 = vpop.f32.mrf.mxu3 }
 0x12b   : > { %v546_v49 = vpop.f32.mrf.mxu0  ;;  %v560_v50 = vpop.f32.mrf.mxu1  ;;  %v633_v14 = vadd.f32 %v614_v45, %v563_v23  ;;  %v634_v13 = vadd.f32 %v628_v46, %v564_v22 }
 0x12c   : > { %v565_v21 = vadd.f32 %v546_v49, %v481_v48  ;;  %v566_v20 = vadd.f32 %v560_v50, %v495_v47 }
 0x132   : > { %v616_v51 = vpop.f32.mrf.mxu2  ;;  %v630_v52 = vpop.f32.mrf.mxu3 }
 0x133   : > { %v665_v53 = vpop.f32.mrf.mxu0  ;;  %v679_v54 = vpop.f32.mrf.mxu1  ;;  %v635_v56 = vadd.f32 %v616_v51, %v565_v21  ;;  %v636_v55 = vadd.f32 %v630_v52, %v566_v20 }
 0x134   : > { %v684_v58 = vadd.f32 %v665_v53, %v633_v14  ;;  %v685_v57 = vadd.f32 %v679_v54, %v634_v13 }
 0x13a   : > { %v735_v59 = vpop.f32.mrf.mxu2  ;;  %v749_v60 = vpop.f32.mrf.mxu3 }
 0x13b   : > { %v667_v63 = vpop.f32.mrf.mxu0  ;;  %v681_v7 = vpop.f32.mrf.mxu1  ;;  %v754_v36 = vadd.f32 %v735_v59, %v684_v58  ;;  %v755_v40 = vadd.f32 %v749_v60, %v685_v57 }
 0x13c   : > { %v686_v31 = vadd.f32 %v667_v63, %v635_v56  ;;  %v687_v30 = vadd.f32 %v681_v7, %v636_v55 }
 0x142   : > { %v737_v8 = vpop.f32.mrf.mxu2  ;;  %v751_v10 = vpop.f32.mrf.mxu3 }
 0x143   : > { %v805_v11 = vpop.f32.mrf.mxu0  ;;  %v819_v12 = vpop.f32.mrf.mxu1  ;;  %v756_v38 = vadd.f32 %v737_v8, %v686_v31  ;;  %v757_v37 = vadd.f32 %v751_v10, %v687_v30 }
 0x144   : > { %v824_v6 = vadd.f32 %v805_v11, %v754_v36  ;;  %v825_v2 = vadd.f32 %v819_v12, %v755_v40  ;;  %v4289_v12 = vld [vmem:[%s6336_s4 + $0x8] sm:$0xff] }
 0x14a   : > { %v875_v25 = vpop.f32.mrf.mxu2  ;;  %v889_v26 = vpop.f32.mrf.mxu3 }
 0x14b   : > { %v807_v19 = vpop.f32.mrf.mxu0  ;;  %v821_v24 = vpop.f32.mrf.mxu1  ;;  %v894_v23 = vadd.f32 %v875_v25, %v824_v6  ;;  %v895_v22 = vadd.f32 %v889_v26, %v825_v2 }
 0x14c   : > { %v826_v48 = vadd.f32 %v807_v19, %v756_v38  ;;  %v827_v47 = vadd.f32 %v821_v24, %v757_v37 }
 0x152   : > { %v877_v27 = vpop.f32.mrf.mxu2  ;;  %v891_v32 = vpop.f32.mrf.mxu3 }
 0x153   : > { %v945_v29 = vpop.f32.mrf.mxu0  ;;  %v959_v28 = vpop.f32.mrf.mxu1  ;;  %v896_v21 = vadd.f32 %v877_v27, %v826_v48  ;;  %v897_v20 = vadd.f32 %v891_v32, %v827_v47 }
 0x154   : > { %v964_v14 = vadd.f32 %v945_v29, %v894_v23  ;;  %v965_v13 = vadd.f32 %v959_v28, %v895_v22 }
 0x156   : > { %v4687_v57 = vmax.f32 %v964_v14, 0.0  ;;  %v4689_v58 = vmax.f32 %v965_v13, 0.0  ;;  %v4288_v13 = vld [vmem:[%s6336_s4] sm:$0xff] }
 0x158   : > { %v4695_v28 = vpack.c.bf16 %v4687_v57, %v4432_v1  ;;  %v4699_v29 = vpack.c.bf16 %v4689_v58, %v4423_v0 }
 0x15a   : > { %6472 = vst [vmem:[#allocation30_spill] sm:$0xff] %v4695_v28 }
 0x15b   : > { %v947_v34 = vpop.f32.mrf.mxu0  ;;  %v961_v35 = vpop.f32.mrf.mxu1  ;;  %6473 = vst [vmem:[#allocation31_spill] sm:$0xff] %v4699_v29 }
 0x15c   : > { %v966_v56 = vadd.f32 %v947_v34, %v896_v21  ;;  %v967_v55 = vadd.f32 %v961_v35, %v897_v20 }
 0x15e   : > { %v4679_v31 = vmax.f32 %v966_v56, 0.0  ;;  %v4681_v30 = vmax.f32 %v967_v55, 0.0 }
 0x160   : > { %v975_v38 = vpack.c.bf16 %v4679_v31, %v4679_v31  ;;  %v976_v37 = vpack.c.bf16 %v4681_v30, %v4681_v30 }
 0x162   : > { %v982_v41 = vsel %vm420_vm3, %v975_v38, 0  ;;  %v985_v42 = vsel %vm420_vm3, %v976_v37, 0 }
 0x163   : > { %993 = vmatpush.bf16.msra.mxu2 %v982_v41  ;;  %1006 = vmatpush.bf16.msra.mxu3 %v985_v42 }
 0x167   : > { %994 = vmatpush.bf16.msra.mxu2 %v4695_v28  ;;  %1007 = vmatpush.bf16.msra.mxu3 %v4699_v29 }
 0x16a   : > { %4033 = vmatmul.msk.bf16.vlgmr.msra.gmra.mxu2 %vm977_vm10, %v972_v43  ;;  %4034 = vmatmul.msk.bf16.vlgmr.msra.gmra.mxu3 %vm977_vm10, %v972_v43 }
 0x1ed   : > { %v996_v44 = vpop.f32.mrf.mxu2  ;;  %v1009_v45 = vpop.f32.mrf.mxu3 }
 0x1ee   : > { %v4706_v46 = vmax.f32 %v996_v44, 0.0  ;;  %v4708_v1 = vmax.f32 %v1009_v45, 0.0 }
 0x1f0   : > { %1016 = vrot.lane.b32.xlu0 %v4708_v1, %s4341_s19  ;;  %1032 = vrot.lane.b32.xlu1 %v4708_v1, %s4342_s20  ;;  %v1259_v6 = vpack.c.bf16 %v4706_v46, %v4706_v46  ;;  %v1260_v2 = vpack.c.bf16 %v4708_v1, %v4708_v1 }
 0x1f1   : > { %1035 = vrot.lane.b32.xlu2 %v4706_v46, %s4342_s20 }
 0x1f2   : > { %v1270_v41 = vsel %vm420_vm3, %v1259_v6, 0  ;;  %v1273_v42 = vsel %vm420_vm3, %v1260_v2, 0 }
 0x1f5   : > { %v998_v0 = vpop.f32.mrf.mxu2  ;;  %v1011_v49 = vpop.f32.mrf.mxu3 }
 0x1f8   : > { %1135 = vrot.lane.b32.xlu0 %v4706_v46, %s4343_s21  ;;  %1020 = vrot.lane.b32.xlu1 %v4706_v46, %s4341_s19 }
 0x1f9   : > { %1132 = vrot.lane.b32.xlu2 %v4708_v1, %s4343_s21 }
 0x200   : > { %1307 = vrot.lane.b32.xlu0 %v4706_v46, %s4345_s23  ;;  %1194 = vrot.lane.b32.xlu1 %v4708_v1, %s4344_s22 }
 0x201   : > { %1197 = vrot.lane.b32.xlu2 %v4706_v46, %s4344_s22 }
 0x208   : > { %1371 = vrot.lane.b32.xlu0 %v4708_v1, %s4346_s24  ;;  %1309 = vrot.lane.b32.xlu1 %v4708_v1, %s4345_s23 }
 0x209   : > { %1369 = vrot.lane.b32.xlu2 %v4706_v46, %s4346_s24 }
 0x210   : > { %1493 = vrot.lane.b32.xlu0 %v4706_v46, %s4348_s26  ;;  %1431 = vrot.lane.b32.xlu1 %v4706_v46, %s4347_s25 }
 0x211   : > { %1433 = vrot.lane.b32.xlu2 %v4708_v1, %s4347_s25 }
 0x218   : > { %1495 = vrot.lane.b32.xlu1 %v4708_v1, %s4348_s26 }
 0x24b   : > { %v1036_v50 = vpop.permute.xlu2 %1035 }
 0x253   : > { %v1133_v59 = vpop.permute.xlu2 %1132 }
 0x25b   : > { %v1198_v21 = vpop.permute.xlu2 %1197 }
 0x262   : > { %v1017_v51 = vpop.permute.xlu0 %1016  ;;  %v1033_v52 = vpop.permute.xlu1 %1032 }
 0x263   : > { %v1037_v53 = vsel %vm392_vm2, %v1036_v50, %v1033_v52  ;;  %v1040_v54 = vsel %vm392_vm2, %v1033_v52, %v1036_v50  ;;  %v1370_v49 = vpop.permute.xlu2 %1369  ;;  %v4290_v52 = vld [vmem:[%s6336_s4 + $0x10] sm:$0xff] }
 0x264   : > { %v1041_v60 = vmul.f32 %v1040_v54, %v4481_v15  ;;  %v1042_v63 = vmul.f32 %v1037_v53, %v4483_v16 }
 0x266   : > { %v1046_v7 = vpack.c.bf16 %v1041_v60, %v1041_v60  ;;  %v1047_v8 = vpack.c.bf16 %v1042_v63, %v1042_v63 }
 0x268   : > { %v1057_v10 = vsel %vm420_vm3, %v1046_v7, 0  ;;  %v1060_v11 = vsel %vm420_vm3, %v1047_v8, 0 }
 0x269   : > { %1069 = vmatpush.bf16.msrb.mxu0 %v1057_v10  ;;  %1083 = vmatpush.bf16.msrb.mxu1 %v1060_v11 }
 0x26a   : > { %v1136_v19 = vpop.permute.xlu0 %1135  ;;  %v1021_v24 = vpop.permute.xlu1 %1020 }
 0x26b   : > { %v1137_v25 = vsel %vm502_vm0, %v1136_v19, %v1133_v59  ;;  %v1140_v26 = vsel %vm502_vm0, %v1133_v59, %v1136_v19  ;;  %v1022_v36 = vsel %vm370_vm1, %v1021_v24, %v1017_v51  ;;  %v1025_v40 = vsel %vm370_vm1, %v1017_v51, %v1021_v24 }
 0x26c   : > { %v1141_v27 = vmul.f32 %v1140_v26, %v4463_v5  ;;  %v1142_v32 = vmul.f32 %v1137_v25, %v4466_v9  ;;  %v1026_v48 = vmul.f32 %v1025_v40, %v4485_v17  ;;  %v1027_v47 = vmul.f32 %v1022_v36, %v4487_v18  ;;  %4041 = vmatmul.msk.bf16.vlgmr.msrb.gmra.mxu0 %vm416_vm5, %v4289_v12 }
 0x26d   : > { %4042 = vmatmul.msk.bf16.vlgmr.msrb.gmra.mxu1 %vm416_vm5, %v4289_v12 }
 0x26e   : > { %v1146_v20 = vpack.c.bf16 %v1141_v27, %v1141_v27  ;;  %v1147_v23 = vpack.c.bf16 %v1142_v32, %v1142_v32  ;;  %v1030_v22 = vpack.c.bf16 %v1026_v48, %v1026_v48  ;;  %v1031_v34 = vpack.c.bf16 %v1027_v47, %v1027_v47  ;;  %v4291_v48 = vld [vmem:[%s6336_s4 + $0x18] sm:$0xff]  ;;  %v1434_v47 = vpop.permute.xlu2 %1433 }
 0x270   : > { %v1099_v35 = vsel %vm420_vm3, %v1030_v22, 0  ;;  %v1102_v56 = vsel %vm420_vm3, %v1031_v34, 0  ;;  %v1157_v55 = vsel %vm420_vm3, %v1146_v20, 0  ;;  %v1160_v14 = vsel %vm420_vm3, %v1147_v23, 0  ;;  %v6474_v20 = vld [vmem:[#allocation22_spill] sm:$0xff]  ;;  %v6475_v22 = vld [vmem:[#allocation23_spill] sm:$0xff] }
 0x271   : > { %1111 = vmatpush.bf16.msrb.mxu2 %v1099_v35  ;;  %1125 = vmatpush.bf16.msrb.mxu3 %v1102_v56 }
 0x272   : > { %1169 = vmatpush.bf16.msra.mxu0 %v1157_v55  ;;  %1183 = vmatpush.bf16.msra.mxu1 %v1160_v14  ;;  %v1308_v38 = vpop.permute.xlu0 %1307  ;;  %v1195_v37 = vpop.permute.xlu1 %1194 }
 0x273   : > { %v1199_v43 = vsel %vm572_vm4, %v1198_v21, %v1195_v37  ;;  %v1202_v44 = vsel %vm572_vm4, %v1195_v37, %v1198_v21 }
 0x274   : > { %v1203_v45 = vmul.f32 %v1202_v44, %v4513_v33  ;;  %v1204_v46 = vmul.f32 %v1199_v43, %v4524_v39  ;;  %4047 = vmatmul.msk.bf16.vlgmr.msrb.gmra.mxu2 %vm416_vm5, %v4288_v13  ;;  %4048 = vmatmul.msk.bf16.vlgmr.msrb.gmra.mxu3 %vm416_vm5, %v4288_v13  ;;  %v4292_v13 = vld [vmem:[%s6336_s4 + $0x20] sm:$0xff] }
 0x275   : > { %v6476_v43 = vld [vmem:[#allocation26_spill] sm:$0xff] }
 0x276   : > { %1282 = vmatpush.bf16.msrb.mxu0 %v1270_v41  ;;  %1296 = vmatpush.bf16.msrb.mxu1 %v1273_v42  ;;  %v1208_v1 = vpack.c.bf16 %v1203_v45, %v1203_v45  ;;  %v1209_v0 = vpack.c.bf16 %v1204_v46, %v1204_v46  ;;  %v6477_v45 = vld [vmem:[#allocation27_spill] sm:$0xff] }
 0x278   : > { %v1219_v50 = vsel %vm420_vm3, %v1208_v1, 0  ;;  %v1222_v51 = vsel %vm420_vm3, %v1209_v0, 0 }
 0x279   : > { %1231 = vmatpush.bf16.msra.mxu2 %v1219_v50  ;;  %1245 = vmatpush.bf16.msra.mxu3 %v1222_v51  ;;  %v4293_v51 = vld [vmem:[%s6336_s4 + $0x28] sm:$0xff] }
 0x27a   : > { %v1372_v53 = vpop.permute.xlu0 %1371  ;;  %v1310_v54 = vpop.permute.xlu1 %1309 }
 0x27b   : > { %v1373_v59 = vsel %vm762_vm7, %v1370_v49, %v1372_v53  ;;  %v1377_v60 = vsel %vm762_vm7, %v1372_v53, %v1370_v49  ;;  %v1311_v63 = vsel %vm692_vm6, %v1308_v38, %v1310_v54  ;;  %v1315_v7 = vsel %vm692_vm6, %v1310_v54, %v1308_v38  ;;  %v4295_v53 = vld [vmem:[%s6336_s4 + $0x38] sm:$0xff]  ;;  %v4296_v54 = vld [vmem:[%s6336_s4 + $0x40] sm:$0xff] }
 0x27c   : > { %v1378_v8 = vmul.f32 %v1373_v59, %v4570_v3  ;;  %v1379_v10 = vmul.f32 %v1377_v60, %v4572_v4  ;;  %v1316_v11 = vmul.f32 %v1311_v63, %v4564_v61  ;;  %v1317_v12 = vmul.f32 %v1315_v7, %v4566_v62  ;;  %4055 = vmatmul.msk.bf16.vlgmr.msra.gmra.mxu0 %vm416_vm5, %v4290_v52 }
 0x27d   : > { %4056 = vmatmul.msk.bf16.vlgmr.msra.gmra.mxu1 %vm416_vm5, %v4290_v52  ;;  %v4294_v52 = vld [vmem:[%s6336_s4 + $0x30] sm:$0xff] }
 0x27e   : > { %v1383_v19 = vpack.c.bf16 %v1378_v8, %v1378_v8  ;;  %v1384_v24 = vpack.c.bf16 %v1379_v10, %v1379_v10  ;;  %v1321_v25 = vpack.c.bf16 %v1316_v11, %v1316_v11  ;;  %v1322_v26 = vpack.c.bf16 %v1317_v12, %v1317_v12 }
 0x280   : > { %v1332_v36 = vsel %vm420_vm3, %v1321_v25, 0  ;;  %v1335_v40 = vsel %vm420_vm3, %v1322_v26, 0  ;;  %v1394_v27 = vsel %vm420_vm3, %v1383_v19, 0  ;;  %v1397_v32 = vsel %vm420_vm3, %v1384_v24, 0 }
 0x281   : > { %1344 = vmatpush.bf16.msrb.mxu2 %v1332_v36  ;;  %1358 = vmatpush.bf16.msrb.mxu3 %v1335_v40 }
 0x282   : > { %1406 = vmatpush.bf16.msra.mxu0 %v1394_v27  ;;  %1420 = vmatpush.bf16.msra.mxu1 %v1397_v32  ;;  %v1432_v6 = vpop.permute.xlu1 %1431  ;;  %v1494_v38 = vpop.permute.xlu0 %1493 }
 0x283   : > { %v1435_v2 = vsel %vm832_vm8, %v1432_v6, %v1434_v47  ;;  %v1439_v21 = vsel %vm832_vm8, %v1434_v47, %v1432_v6 }
 0x284   : > { %v1440_v23 = vmul.f32 %v1435_v2, %v6474_v20  ;;  %v1441_v34 = vmul.f32 %v1439_v21, %v6475_v22  ;;  %4063 = vmatmul.msk.bf16.vlgmr.msra.gmra.mxu2 %vm416_vm5, %v4291_v48  ;;  %4064 = vmatmul.msk.bf16.vlgmr.msra.gmra.mxu3 %vm416_vm5, %v4291_v48 }
 0x286   : > { %v1445_v35 = vpack.c.bf16 %v1440_v23, %v1440_v23  ;;  %v1446_v56 = vpack.c.bf16 %v1441_v34, %v1441_v34 }
 0x288   : > { %v1456_v55 = vsel %vm420_vm3, %v1445_v35, 0  ;;  %v1459_v14 = vsel %vm420_vm3, %v1446_v56, 0 }
 0x289   : > { %1468 = vmatpush.bf16.msra.mxu2 %v1456_v55  ;;  %1482 = vmatpush.bf16.msra.mxu3 %v1459_v14 }
 0x28a   : > { %v1496_v37 = vpop.permute.xlu1 %1495 }
 0x28b   : > { %v1497_v41 = vsel %vm902_vm9, %v1494_v38, %v1496_v37  ;;  %v1501_v42 = vsel %vm902_vm9, %v1496_v37, %v1494_v38 }
 0x28c   : > { %v1502_v44 = vmul.f32 %v1497_v41, %v6476_v43  ;;  %v1503_v46 = vmul.f32 %v1501_v42, %v6477_v45  ;;  %4071 = vmatmul.msk.bf16.vlgmr.msrb.gmra.mxu0 %vm416_vm5, %v4292_v13 }
 0x28d   : > { %4072 = vmatmul.msk.bf16.vlgmr.msrb.gmra.mxu1 %vm416_vm5, %v4292_v13 }
 0x28e   : > { %v1507_v1 = vpack.c.bf16 %v1502_v44, %v1502_v44  ;;  %v1508_v0 = vpack.c.bf16 %v1503_v46, %v1503_v46 }
 0x290   : > { %v1518_v49 = vsel %vm420_vm3, %v1507_v1, 0  ;;  %v1521_v50 = vsel %vm420_vm3, %v1508_v0, 0 }
 0x291   : > { %1530 = vmatpush.bf16.msrb.mxu0 %v1518_v49  ;;  %1544 = vmatpush.bf16.msrb.mxu1 %v1521_v50 }
 0x294   : > { %4079 = vmatmul.msk.bf16.vlgmr.msrb.gmra.mxu2 %vm416_vm5, %v4293_v51  ;;  %4080 = vmatmul.msk.bf16.vlgmr.msrb.gmra.mxu3 %vm416_vm5, %v4293_v51 }
 0x29c   : > { %4087 = vmatmul.msk.bf16.vlgmr.msra.gmra.mxu0 %vm416_vm5, %v4294_v52 }
 0x29d   : > { %4088 = vmatmul.msk.bf16.vlgmr.msra.gmra.mxu1 %vm416_vm5, %v4294_v52 }
 0x2a4   : > { %4095 = vmatmul.msk.bf16.vlgmr.msra.gmra.mxu2 %vm416_vm5, %v4295_v53  ;;  %4096 = vmatmul.msk.bf16.vlgmr.msra.gmra.mxu3 %vm416_vm5, %v4295_v53 }
 0x2ac   : > { %4103 = vmatmul.msk.bf16.vlgmr.msrb.gmra.mxu0 %vm416_vm5, %v4296_v54 }
 0x2ad   : > { %4104 = vmatmul.msk.bf16.vlgmr.msrb.gmra.mxu1 %vm416_vm5, %v4296_v54 }
 0x2e9   : > { %v1071_v59 = vpop.f32.mrf.mxu0 }
 0x2ea   : > { %v1085_v60 = vpop.f32.mrf.mxu1 }
 0x2f1   : > { %v1073_v63 = vpop.f32.mrf.mxu0 }
 0x2f2   : > { %v1087_v7 = vpop.f32.mrf.mxu1 }
 0x2f7   : > { %v1113_v8 = vpop.f32.mrf.mxu2  ;;  %v1127_v10 = vpop.f32.mrf.mxu3 }
 0x2f8   : > { %v1114_v56 = vadd.f32 %v1113_v8, %v1071_v59  ;;  %v1128_v55 = vadd.f32 %v1127_v10, %v1085_v60 }
 0x2f9   : > { %v1171_v11 = vpop.f32.mrf.mxu0 }
 0x2fa   : > { %v1185_v12 = vpop.f32.mrf.mxu1  ;;  %v1190_v41 = vadd.f32 %v1171_v11, %v1114_v56 }
 0x2fb   : > { %v1191_v44 = vadd.f32 %v1185_v12, %v1128_v55 }
 0x2ff   : > { %v1115_v19 = vpop.f32.mrf.mxu2  ;;  %v1129_v24 = vpop.f32.mrf.mxu3 }
 0x300   : > { %v1116_v14 = vadd.f32 %v1115_v19, %v1073_v63  ;;  %v1130_v13 = vadd.f32 %v1129_v24, %v1087_v7 }
 0x301   : > { %v1173_v25 = vpop.f32.mrf.mxu0 }
 0x302   : > { %v1187_v26 = vpop.f32.mrf.mxu1  ;;  %v1192_v46 = vadd.f32 %v1173_v25, %v1116_v14 }
 0x303   : > { %v1193_v1 = vadd.f32 %v1187_v26, %v1130_v13 }
 0x307   : > { %v1233_v36 = vpop.f32.mrf.mxu2  ;;  %v1247_v40 = vpop.f32.mrf.mxu3 }
 0x308   : > { %v1252_v49 = vadd.f32 %v1233_v36, %v1190_v41  ;;  %v1253_v50 = vadd.f32 %v1247_v40, %v1191_v44  ;;  %v1559_v44 = vld [vmem:[%s6337_s5] sm:$0xf] }
 0x309   : > { %v1284_v27 = vpop.f32.mrf.mxu0 }
 0x30a   : > { %v1298_v32 = vpop.f32.mrf.mxu1  ;;  %v1303_v53 = vadd.f32 %v1284_v27, %v1252_v49 }
 0x30b   : > { %v1304_v43 = vadd.f32 %v1298_v32, %v1253_v50 }
 0x30f   : > { %v1235_v48 = vpop.f32.mrf.mxu2  ;;  %v1249_v47 = vpop.f32.mrf.mxu3 }
 0x310   : > { %v1254_v51 = vadd.f32 %v1235_v48, %v1192_v46  ;;  %v1255_v52 = vadd.f32 %v1249_v47, %v1193_v1 }
 0x311   : > { %v1286_v6 = vpop.f32.mrf.mxu0 }
 0x312   : > { %v1300_v2 = vpop.f32.mrf.mxu1  ;;  %v1305_v59 = vadd.f32 %v1286_v6, %v1254_v51 }
 0x313   : > { %v1306_v60 = vadd.f32 %v1300_v2, %v1255_v52 }
 0x317   : > { %v1346_v21 = vpop.f32.mrf.mxu2  ;;  %v1360_v23 = vpop.f32.mrf.mxu3 }
 0x318   : > { %v1365_v63 = vadd.f32 %v1346_v21, %v1303_v53  ;;  %v1366_v8 = vadd.f32 %v1360_v23, %v1304_v43 }
 0x319   : > { %v1408_v34 = vpop.f32.mrf.mxu0 }
 0x31a   : > { %v1422_v35 = vpop.f32.mrf.mxu1  ;;  %v1427_v12 = vadd.f32 %v1408_v34, %v1365_v63 }
 0x31b   : > { %v1428_v24 = vadd.f32 %v1422_v35, %v1366_v8 }
 0x31f   : > { %v1348_v38 = vpop.f32.mrf.mxu2  ;;  %v1362_v37 = vpop.f32.mrf.mxu3 }
 0x320   : > { %v1367_v10 = vadd.f32 %v1348_v38, %v1305_v59  ;;  %v1368_v11 = vadd.f32 %v1362_v37, %v1306_v60 }
 0x321   : > { %v1410_v42 = vpop.f32.mrf.mxu0 }
 0x322   : > { %v1424_v0 = vpop.f32.mrf.mxu1  ;;  %v1429_v25 = vadd.f32 %v1410_v42, %v1367_v10 }
 0x323   : > { %v1430_v26 = vadd.f32 %v1424_v0, %v1368_v11 }
 0x327   : > { %v1470_v54 = vpop.f32.mrf.mxu2  ;;  %v1484_v45 = vpop.f32.mrf.mxu3 }
 0x328   : > { %v1489_v36 = vadd.f32 %v1470_v54, %v1427_v12  ;;  %v1490_v47 = vadd.f32 %v1484_v45, %v1428_v24 }
 0x329   : > { %v1532_v7 = vpop.f32.mrf.mxu0 }
 0x32a   : > { %v1546_v19 = vpop.f32.mrf.mxu1  ;;  %v1551_v2 = vadd.f32 %v1532_v7, %v1489_v36 }
 0x32b   : > { %v1552_v14 = vadd.f32 %v1546_v19, %v1490_v47 }
 0x32c   : > { %v4847_v35 = vmax.f32 %v1551_v2, 0.0 }
 0x32d   : > { %v4851_v13 = vmax.f32 %v1552_v14, 0.0 }
 0x32e   : > { %v4857_v41 = vpack.c.bf16 %v4847_v35, %v4679_v31 }
 0x32f   : > { %v1472_v40 = vpop.f32.mrf.mxu2  ;;  %v1486_v48 = vpop.f32.mrf.mxu3  ;;  %v4861_v42 = vpack.c.bf16 %v4851_v13, %v4681_v30 }
 0x330   : > { %v1491_v27 = vadd.f32 %v1472_v40, %v1429_v25  ;;  %v1492_v56 = vadd.f32 %v1486_v48, %v1430_v26  ;;  %6478 = vst [vmem:[#allocation32_spill] sm:$0xff] %v4857_v41 }
 0x331   : > { %v1534_v55 = vpop.f32.mrf.mxu0  ;;  %6479 = vst [vmem:[#allocation33_spill] sm:$0xff] %v4861_v42 }
 0x332   : > { %v1553_v32 = vadd.f32 %v1534_v55, %v1491_v27  ;;  %v1548_v6 = vpop.f32.mrf.mxu1 }
 0x333   : > { %v1554_v21 = vadd.f32 %v1548_v6, %v1492_v56  ;;  %v4298_v56 = vld [vmem:[%s6338_s6 + $0x8] sm:$0xff]  ;;  %v4297_v6 = vld [vmem:[%s6338_s6] sm:$0xff] }
 0x334   : > { %v4841_v43 = vmax.f32 %v1553_v32, 0.0 }
 0x335   : > { %v4843_v23 = vmax.f32 %v1554_v21, 0.0 }
 0x336   : > { %v1562_v34 = vpack.c.bf16 %v4841_v43, %v4841_v43 }
 0x337   : > { %v1563_v45 = vpack.c.bf16 %v4843_v23, %v4843_v23 }
 0x338   : > { %v1569_v38 = vsel %vm420_vm3, %v1562_v34, 0 }
 0x339   : > { %1579 = vmatpush.bf16.msrb.mxu2 %v1569_v38  ;;  %v1572_v37 = vsel %vm420_vm3, %v1563_v45, 0 }
 0x33a   : > { %1592 = vmatpush.bf16.msrb.mxu3 %v1572_v37 }
 0x33d   : > { %1580 = vmatpush.bf16.msrb.mxu2 %v4857_v41 }
 0x33e   : > { %1593 = vmatpush.bf16.msrb.mxu3 %v4861_v42 }
 0x341   : > { %1581 = vmatpush.bf16.msrb.mxu2 %v4695_v28 }
 0x342   : > { %1594 = vmatpush.bf16.msrb.mxu3 %v4699_v29 }
 0x344   : > { %4105 = vmatmul.msk.bf16.vlgmr.msrb.gmra.mxu2 %vm1564_vm11, %v1559_v44 }
 0x345   : > { %4106 = vmatmul.msk.bf16.vlgmr.msrb.gmra.mxu3 %vm1564_vm11, %v1559_v44 }
 0x3c7   : > { %v1583_v46 = vpop.f32.mrf.mxu2 }
 0x3c8   : > { %v4870_v1 = vmax.f32 %v1583_v46, 0.0  ;;  %v1596_v0 = vpop.f32.mrf.mxu3 }
 0x3c9   : > { %v4872_v49 = vmax.f32 %v1596_v0, 0.0 }
 0x3ca   : > { %1622 = vrot.lane.b32.xlu0 %v4870_v1, %s4342_s20  ;;  %v1846_v46 = vpack.c.bf16 %v4870_v1, %v4870_v1 }
 0x3cb   : > { %1603 = vrot.lane.b32.xlu1 %v4872_v49, %s4341_s19  ;;  %1619 = vrot.lane.b32.xlu2 %v4872_v49, %s4342_s20  ;;  %v1847_v44 = vpack.c.bf16 %v4872_v49, %v4872_v49 }
 0x3cf   : > { %v1585_v50 = vpop.f32.mrf.mxu2 }
 0x3d0   : > { %v1598_v51 = vpop.f32.mrf.mxu3 }
 0x3d2   : > { %1719 = vrot.lane.b32.xlu0 %v4872_v49, %s4343_s21 }
 0x3d3   : > { %1722 = vrot.lane.b32.xlu1 %v4870_v1, %s4343_s21  ;;  %1607 = vrot.lane.b32.xlu2 %v4870_v1, %s4341_s19 }
 0x3da   : > { %1784 = vrot.lane.b32.xlu0 %v4870_v1, %s4344_s22 }
 0x3db   : > { %1894 = vrot.lane.b32.xlu1 %v4870_v1, %s4345_s23  ;;  %1781 = vrot.lane.b32.xlu2 %v4872_v49, %s4344_s22 }
 0x3e2   : > { %1956 = vrot.lane.b32.xlu0 %v4870_v1, %s4346_s24 }
 0x3e3   : > { %1958 = vrot.lane.b32.xlu1 %v4872_v49, %s4346_s24  ;;  %1896 = vrot.lane.b32.xlu2 %v4872_v49, %s4345_s23 }
 0x3ea   : > { %2020 = vrot.lane.b32.xlu0 %v4872_v49, %s4347_s25 }
 0x3eb   : > { %2080 = vrot.lane.b32.xlu1 %v4870_v1, %s4348_s26  ;;  %2018 = vrot.lane.b32.xlu2 %v4870_v1, %s4347_s25 }
 0x3f2   : > { %2745 = vrot.lane.b32.xlu0 %v4851_v13, %s4341_s19 }
 0x3f3   : > { %2741 = vrot.lane.b32.xlu1 %v4689_v58, %s4341_s19  ;;  %2082 = vrot.lane.b32.xlu2 %v4872_v49, %s4348_s26 }
 0x3fa   : > { %2773 = vrot.lane.b32.xlu0 %v4687_v57, %s4341_s19 }
 0x3fb   : > { %2747 = vrot.lane.b32.xlu1 %v4843_v23, %s4341_s19  ;;  %2743 = vrot.lane.b32.xlu2 %v4681_v30, %s4341_s19 }
 0x402   : > { %2779 = vrot.lane.b32.xlu0 %v4841_v43, %s4341_s19 }
 0x403   : > { %2775 = vrot.lane.b32.xlu1 %v4679_v31, %s4341_s19  ;;  %2777 = vrot.lane.b32.xlu2 %v4847_v35, %s4341_s19 }
 0x40a   : > { %2850 = vrot.lane.b32.xlu0 %v4681_v30, %s4342_s20 }
 0x40b   : > { %2852 = vrot.lane.b32.xlu1 %v4851_v13, %s4342_s20  ;;  %2848 = vrot.lane.b32.xlu2 %v4689_v58, %s4342_s20 }
 0x413   : > { %2854 = vrot.lane.b32.xlu2 %v4843_v23, %s4342_s20 }
 0x425   : > { %v1620_v52 = vpop.permute.xlu2 %1619 }
 0x42d   : > { %v1608_v53 = vpop.permute.xlu2 %1607 }
 0x435   : > { %v1782_v54 = vpop.permute.xlu2 %1781 }
 0x43c   : > { %v1623_v59 = vpop.permute.xlu0 %1622 }
 0x43d   : > { %v1604_v60 = vpop.permute.xlu1 %1603  ;;  %v1897_v63 = vpop.permute.xlu2 %1896  ;;  %v1624_v7 = vsel %vm392_vm2, %v1623_v59, %v1620_v52  ;;  %v1627_v8 = vsel %vm392_vm2, %v1620_v52, %v1623_v59 }
 0x43e   : > { %v1609_v10 = vsel %vm370_vm1, %v1608_v53, %v1604_v60  ;;  %v1612_v11 = vsel %vm370_vm1, %v1604_v60, %v1608_v53  ;;  %v1628_v19 = vmul.f32 %v1627_v8, %v4481_v15  ;;  %v1629_v12 = vmul.f32 %v1624_v7, %v4483_v16 }
 0x43f   : > { %v1613_v24 = vmul.f32 %v1612_v11, %v4485_v17  ;;  %v1614_v25 = vmul.f32 %v1609_v10, %v4487_v18  ;;  %v1860_v53 = vsel %vm420_vm3, %v1847_v44, 0  ;;  %v1857_v60 = vsel %vm420_vm3, %v1846_v46, 0 }
 0x440   : > { %v1633_v26 = vpack.c.bf16 %v1628_v19, %v1628_v19  ;;  %v1634_v36 = vpack.c.bf16 %v1629_v12, %v1629_v12 }
 0x441   : > { %v1617_v40 = vpack.c.bf16 %v1613_v24, %v1613_v24  ;;  %v1618_v48 = vpack.c.bf16 %v1614_v25, %v1614_v25 }
 0x442   : > { %v1644_v47 = vsel %vm420_vm3, %v1633_v26, 0  ;;  %v1647_v27 = vsel %vm420_vm3, %v1634_v36, 0 }
 0x443   : > { %1656 = vmatpush.bf16.msra.mxu0 %v1644_v47  ;;  %1670 = vmatpush.bf16.msra.mxu1 %v1647_v27  ;;  %v1686_v55 = vsel %vm420_vm3, %v1617_v40, 0  ;;  %v1689_v32 = vsel %vm420_vm3, %v1618_v48, 0 }
 0x444   : > { %1698 = vmatpush.bf16.msra.mxu2 %v1686_v55  ;;  %1712 = vmatpush.bf16.msra.mxu3 %v1689_v32  ;;  %v1720_v2 = vpop.permute.xlu0 %1719  ;;  %v4300_v55 = vld [vmem:[%s6338_s6 + $0x18] sm:$0xff] }
 0x445   : > { %v1723_v21 = vpop.permute.xlu1 %1722  ;;  %v4948_v14 = vpop.permute.xlu2 %2018 }
 0x446   : > { %v1724_v34 = vsel %vm502_vm0, %v1723_v21, %v1720_v2  ;;  %v1727_v45 = vsel %vm502_vm0, %v1720_v2, %v1723_v21  ;;  %4113 = vmatmul.msk.bf16.vlgmr.msra.gmra.mxu0 %vm416_vm5, %v4298_v56  ;;  %4114 = vmatmul.msk.bf16.vlgmr.msra.gmra.mxu1 %vm416_vm5, %v4298_v56 }
 0x447   : > { %v1728_v38 = vmul.f32 %v1727_v45, %v4463_v5  ;;  %v1729_v37 = vmul.f32 %v1724_v34, %v4466_v9  ;;  %4119 = vmatmul.msk.bf16.vlgmr.msra.gmra.mxu2 %vm416_vm5, %v4297_v6  ;;  %4120 = vmatmul.msk.bf16.vlgmr.msra.gmra.mxu3 %vm416_vm5, %v4297_v6 }
 0x449   : > { %v1733_v0 = vpack.c.bf16 %v1728_v38, %v1728_v38  ;;  %v1734_v50 = vpack.c.bf16 %v1729_v37, %v1729_v37 }
 0x44b   : > { %v1744_v51 = vsel %vm420_vm3, %v1733_v0, 0  ;;  %v1747_v52 = vsel %vm420_vm3, %v1734_v50, 0 }
 0x44c   : > { %1756 = vmatpush.bf16.msrb.mxu0 %v1744_v51  ;;  %1770 = vmatpush.bf16.msrb.mxu1 %v1747_v52  ;;  %v1785_v59 = vpop.permute.xlu0 %1784 }
 0x44d   : > { %v1895_v7 = vpop.permute.xlu1 %1894  ;;  %v1786_v49 = vsel %vm572_vm4, %v1785_v59, %v1782_v54  ;;  %v1789_v8 = vsel %vm572_vm4, %v1782_v54, %v1785_v59  ;;  %v2083_v25 = vpop.permute.xlu2 %2082 }
 0x44e   : > { %v1898_v1 = vsel %vm692_vm6, %v1895_v7, %v1897_v63  ;;  %v1902_v10 = vsel %vm692_vm6, %v1897_v63, %v1895_v7  ;;  %v1790_v11 = vmul.f32 %v1789_v8, %v4513_v33  ;;  %v1791_v19 = vmul.f32 %v1786_v49, %v4524_v39  ;;  %v4299_v63 = vld [vmem:[%s6338_s6 + $0x10] sm:$0xff]  ;;  %v6480_v8 = vld [vmem:[#allocation26_spill] sm:$0xff] }
 0x44f   : > { %v1903_v12 = vmul.f32 %v1898_v1, %v4564_v61  ;;  %v1904_v24 = vmul.f32 %v1902_v10, %v4566_v62  ;;  %v6481_v10 = vld [vmem:[#allocation27_spill] sm:$0xff] }
 0x450   : > { %1883 = vmatpush.bf16.msra.mxu1 %v1860_v53  ;;  %1869 = vmatpush.bf16.msra.mxu0 %v1857_v60  ;;  %v1795_v26 = vpack.c.bf16 %v1790_v11, %v1790_v11  ;;  %v1796_v36 = vpack.c.bf16 %v1791_v19, %v1791_v19 }
 0x451   : > { %v1908_v40 = vpack.c.bf16 %v1903_v12, %v1903_v12  ;;  %v1909_v48 = vpack.c.bf16 %v1904_v24, %v1904_v24 }
 0x452   : > { %v1806_v54 = vsel %vm420_vm3, %v1795_v26, 0  ;;  %v1809_v47 = vsel %vm420_vm3, %v1796_v36, 0 }
 0x453   : > { %1818 = vmatpush.bf16.msrb.mxu2 %v1806_v54  ;;  %1832 = vmatpush.bf16.msrb.mxu3 %v1809_v47  ;;  %v1919_v27 = vsel %vm420_vm3, %v1908_v40, 0  ;;  %v1922_v56 = vsel %vm420_vm3, %v1909_v48, 0  ;;  %v4302_v40 = vld [vmem:[%s6338_s6 + $0x28] sm:$0xff] }
 0x454   : > { %v1957_v32 = vpop.permute.xlu0 %1956 }
 0x455   : > { %v1959_v6 = vpop.permute.xlu1 %1958  ;;  %v2744_v44 = vpop.permute.xlu2 %2743 }
 0x456   : > { %v1960_v2 = vsel %vm762_vm7, %v1957_v32, %v1959_v6  ;;  %v1964_v21 = vsel %vm762_vm7, %v1959_v6, %v1957_v32  ;;  %4127 = vmatmul.msk.bf16.vlgmr.msrb.gmra.mxu0 %vm416_vm5, %v4299_v63  ;;  %4128 = vmatmul.msk.bf16.vlgmr.msrb.gmra.mxu1 %vm416_vm5, %v4299_v63 }
 0x457   : > { %1931 = vmatpush.bf16.msra.mxu2 %v1919_v27  ;;  %1945 = vmatpush.bf16.msra.mxu3 %v1922_v56  ;;  %v1965_v34 = vmul.f32 %v1960_v2, %v4570_v3  ;;  %v1966_v45 = vmul.f32 %v1964_v21, %v4572_v4 }
 0x458   : > { %4135 = vmatmul.msk.bf16.vlgmr.msrb.gmra.mxu2 %vm416_vm5, %v4300_v55  ;;  %4136 = vmatmul.msk.bf16.vlgmr.msrb.gmra.mxu3 %vm416_vm5, %v4300_v55 }
 0x459   : > { %v1970_v38 = vpack.c.bf16 %v1965_v34, %v1965_v34  ;;  %v1971_v37 = vpack.c.bf16 %v1966_v45, %v1966_v45  ;;  %v4303_v34 = vld [vmem:[%s6338_s6 + $0x30] sm:$0xff]  ;;  %v4304_v45 = vld [vmem:[%s6338_s6 + $0x38] sm:$0xff] }
 0x45b   : > { %v1981_v46 = vsel %vm420_vm3, %v1970_v38, 0  ;;  %v1984_v0 = vsel %vm420_vm3, %v1971_v37, 0 }
 0x45c   : > { %1993 = vmatpush.bf16.msrb.mxu0 %v1981_v46  ;;  %2007 = vmatpush.bf16.msrb.mxu1 %v1984_v0  ;;  %v2021_v50 = vpop.permute.xlu0 %2020 }
 0x45d   : > { %v2081_v51 = vpop.permute.xlu1 %2080  ;;  %v2022_v52 = vsel %vm832_vm8, %v4948_v14, %v2021_v50  ;;  %v2026_v53 = vsel %vm832_vm8, %v2021_v50, %v4948_v14  ;;  %v4301_v14 = vld [vmem:[%s6338_s6 + $0x20] sm:$0xff]  ;;  %v2778_v48 = vpop.permute.xlu2 %2777 }
 0x45e   : > { %v2084_v59 = vsel %vm902_vm9, %v2081_v51, %v2083_v25  ;;  %v2088_v60 = vsel %vm902_vm9, %v2083_v25, %v2081_v51  ;;  %v2027_v7 = vmul.f32 %v2022_v52, %v6474_v20  ;;  %v2028_v49 = vmul.f32 %v2026_v53, %v6475_v22 }
 0x45f   : > { %v2089_v1 = vmul.f32 %v2084_v59, %v6480_v8  ;;  %v2090_v11 = vmul.f32 %v2088_v60, %v6481_v10 }
 0x460   : > { %v2032_v19 = vpack.c.bf16 %v2027_v7, %v2027_v7  ;;  %v2033_v12 = vpack.c.bf16 %v2028_v49, %v2028_v49  ;;  %v4305_v49 = vld [vmem:[%s6338_s6 + $0x40] sm:$0xff] }
 0x461   : > { %v2094_v36 = vpack.c.bf16 %v2089_v1, %v2089_v1  ;;  %v2095_v25 = vpack.c.bf16 %v2090_v11, %v2090_v11 }
 0x462   : > { %v2043_v24 = vsel %vm420_vm3, %v2032_v19, 0  ;;  %v2046_v26 = vsel %vm420_vm3, %v2033_v12, 0 }
 0x463   : > { %2055 = vmatpush.bf16.msrb.mxu2 %v2043_v24  ;;  %2069 = vmatpush.bf16.msrb.mxu3 %v2046_v26  ;;  %v2105_v56 = vsel %vm420_vm3, %v2094_v36, 0  ;;  %v2108_v55 = vsel %vm420_vm3, %v2095_v25, 0 }
 0x464   : > { %v2746_v54 = vpop.permute.xlu0 %2745 }
 0x465   : > { %v2742_v47 = vpop.permute.xlu1 %2741  ;;  %v2791_v63 = vsel %vm370_vm1, %v2778_v48, %v2746_v54  ;;  %v2815_v27 = vsel %vm370_vm1, %v2746_v54, %v2778_v48 }
 0x466   : > { %4143 = vmatmul.msk.bf16.vlgmr.msra.gmra.mxu0 %vm416_vm5, %v4301_v14  ;;  %4144 = vmatmul.msk.bf16.vlgmr.msra.gmra.mxu1 %vm416_vm5, %v4301_v14  ;;  %v5039_v50 = vmul.f32 %v2815_v27, %v4485_v17  ;;  %v5045_v53 = vmul.f32 %v2791_v63, %v4487_v18 }
 0x467   : > { %2117 = vmatpush.bf16.msra.mxu0 %v2105_v56  ;;  %2131 = vmatpush.bf16.msra.mxu1 %v2108_v55 }
 0x468   : > { %4151 = vmatmul.msk.bf16.vlgmr.msra.gmra.mxu2 %vm416_vm5, %v4302_v40  ;;  %4152 = vmatmul.msk.bf16.vlgmr.msra.gmra.mxu3 %vm416_vm5, %v4302_v40  ;;  %6484 = vst [vmem:[#allocation36_spill] sm:$0xff] %v5039_v50 }
 0x469   : > { %6485 = vst [vmem:[#allocation37_spill] sm:$0xff] %v5045_v53 }
 0x46c   : > { %v2774_v32 = vpop.permute.xlu0 %2773 }
 0x46d   : > { %v2748_v6 = vpop.permute.xlu1 %2747  ;;  %v5021_v2 = vsel %vm370_vm1, %v2774_v32, %v2742_v47  ;;  %v5024_v21 = vsel %vm370_vm1, %v2742_v47, %v2774_v32 }
 0x46e   : > { %6482 = vst [vmem:[#allocation34_spill] sm:$0xff] %v5021_v2 }
 0x46f   : > { %6483 = vst [vmem:[#allocation35_spill] sm:$0xff] %v5024_v21 }
 0x474   : > { %v2780_v38 = vpop.permute.xlu0 %2779 }
 0x475   : > { %v2776_v37 = vpop.permute.xlu1 %2775  ;;  %v5033_v46 = vsel %vm370_vm1, %v2780_v38, %v2748_v6  ;;  %v5036_v0 = vsel %vm370_vm1, %v2748_v6, %v2780_v38 }
 0x476   : > { %v2790_v51 = vsel %vm370_vm1, %v2776_v37, %v2744_v44  ;;  %v2814_v52 = vsel %vm370_vm1, %v2744_v44, %v2776_v37  ;;  %4159 = vmatmul.msk.bf16.vlgmr.msrb.gmra.mxu0 %vm416_vm5, %v4303_v34  ;;  %4160 = vmatmul.msk.bf16.vlgmr.msrb.gmra.mxu1 %vm416_vm5, %v4303_v34 }
 0x477   : > { %v5048_v59 = vmul.f32 %v2814_v52, %v4485_v17  ;;  %v5051_v60 = vmul.f32 %v2790_v51, %v4487_v18 }
 0x478   : > { %4167 = vmatmul.msk.bf16.vlgmr.msrb.gmra.mxu2 %vm416_vm5, %v4304_v45  ;;  %4168 = vmatmul.msk.bf16.vlgmr.msrb.gmra.mxu3 %vm416_vm5, %v4304_v45 }
 0x479   : > { %6486 = vst [vmem:[#allocation38_spill] sm:$0xff] %v5048_v59 }
 0x47a   : > { %6487 = vst [vmem:[#allocation39_spill] sm:$0xff] %v5051_v60 }
 0x486   : > { %4175 = vmatmul.msk.bf16.vlgmr.msra.gmra.mxu0 %vm416_vm5, %v4305_v49  ;;  %4176 = vmatmul.msk.bf16.vlgmr.msra.gmra.mxu1 %vm416_vm5, %v4305_v49 }
 0x4c3   : > { %v1658_v1 = vpop.f32.mrf.mxu0  ;;  %v1672_v11 = vpop.f32.mrf.mxu1 }
 0x4ca   : > { %v1700_v19 = vpop.f32.mrf.mxu2  ;;  %v1714_v12 = vpop.f32.mrf.mxu3 }
 0x4cb   : > { %v1660_v24 = vpop.f32.mrf.mxu0  ;;  %v1674_v26 = vpop.f32.mrf.mxu1  ;;  %v1701_v7 = vadd.f32 %v1700_v19, %v1658_v1  ;;  %v1715_v44 = vadd.f32 %v1714_v12, %v1672_v11 }
 0x4d2   : > { %v1702_v14 = vpop.f32.mrf.mxu2  ;;  %v1716_v36 = vpop.f32.mrf.mxu3 }
 0x4d3   : > { %v1758_v25 = vpop.f32.mrf.mxu0  ;;  %v1772_v40 = vpop.f32.mrf.mxu1  ;;  %v1703_v20 = vadd.f32 %v1702_v14, %v1660_v24  ;;  %v1717_v62 = vadd.f32 %v1716_v36, %v1674_v26 }
 0x4d4   : > { %v1777_v60 = vadd.f32 %v1758_v25, %v1701_v7  ;;  %v1778_v53 = vadd.f32 %v1772_v40, %v1715_v44 }
 0x4db   : > { %v1820_v48 = vpop.f32.mrf.mxu2  ;;  %v1834_v54 = vpop.f32.mrf.mxu3 }
 0x4dc   : > { %v1760_v47 = vpop.f32.mrf.mxu0  ;;  %v1774_v63 = vpop.f32.mrf.mxu1  ;;  %v1839_v59 = vadd.f32 %v1820_v48, %v1777_v60  ;;  %v1840_v50 = vadd.f32 %v1834_v54, %v1778_v53 }
 0x4dd   : > { %v1779_v39 = vadd.f32 %v1760_v47, %v1703_v20  ;;  %v1780_v9 = vadd.f32 %v1774_v63, %v1717_v62  ;;  %v2146_v47 = vld [vmem:[%s6339_s7] sm:$0xf]  ;;  %v5104_v63 = vpop.permute.xlu2 %2848 }
 0x4de   : > { %6492 = vst [vmem:[#allocation44_spill] sm:$0xff] %v5104_v63 }
 0x4e3   : > { %v1822_v27 = vpop.f32.mrf.mxu2  ;;  %v1836_v56 = vpop.f32.mrf.mxu3 }
 0x4e4   : > { %v1871_v55 = vpop.f32.mrf.mxu0  ;;  %v1885_v32 = vpop.f32.mrf.mxu1  ;;  %v1841_v1 = vadd.f32 %v1822_v27, %v1779_v39  ;;  %v1842_v7 = vadd.f32 %v1836_v56, %v1780_v9 }
 0x4e5   : > { %v1890_v21 = vadd.f32 %v1871_v55, %v1839_v59  ;;  %v1891_v8 = vadd.f32 %v1885_v32, %v1840_v50  ;;  %v5106_v27 = vpop.permute.xlu2 %2854  ;;  %v5108_v56 = vpop.permute.xlu1 %2852 }
 0x4eb   : > { %v1933_v6 = vpop.f32.mrf.mxu2  ;;  %v1947_v34 = vpop.f32.mrf.mxu3 }
 0x4ec   : > { %v1873_v45 = vpop.f32.mrf.mxu0  ;;  %v1887_v38 = vpop.f32.mrf.mxu1  ;;  %v1952_v4 = vadd.f32 %v1933_v6, %v1890_v21  ;;  %v1953_v61 = vadd.f32 %v1947_v34, %v1891_v8 }
 0x4ed   : > { %v1892_v53 = vadd.f32 %v1873_v45, %v1841_v1  ;;  %v1893_v12 = vadd.f32 %v1887_v38, %v1842_v7  ;;  %v5114_v45 = vmul.f32 %v5036_v0, %v4485_v17  ;;  %v5118_v38 = vmul.f32 %v5033_v46, %v4487_v18 }
 0x4ef   : > { %6493 = vst [vmem:[#allocation45_spill] sm:$0xff] %v5114_v45 }
 0x4f0   : > { %6494 = vst [vmem:[#allocation46_spill] sm:$0xff] %v5118_v38 }
 0x4f3   : > { %v1935_v37 = vpop.f32.mrf.mxu2  ;;  %v1949_v52 = vpop.f32.mrf.mxu3 }
 0x4f4   : > { %v1995_v51 = vpop.f32.mrf.mxu0  ;;  %v2009_v49 = vpop.f32.mrf.mxu1  ;;  %v1954_v25 = vadd.f32 %v1935_v37, %v1892_v53  ;;  %v1955_v21 = vadd.f32 %v1949_v52, %v1893_v12 }
 0x4f5   : > { %v2014_v33 = vadd.f32 %v1995_v51, %v1952_v4  ;;  %v2015_v5 = vadd.f32 %v2009_v49, %v1953_v61 }
 0x4fb   : > { %v2057_v22 = vpop.f32.mrf.mxu2  ;;  %v2071_v3 = vpop.f32.mrf.mxu3 }
 0x4fc   : > { %v1997_v2 = vpop.f32.mrf.mxu0  ;;  %v2011_v10 = vpop.f32.mrf.mxu1  ;;  %v2076_v11 = vadd.f32 %v2057_v22, %v2014_v33  ;;  %v2077_v44 = vadd.f32 %v2071_v3, %v2015_v5 }
 0x4fd   : > { %v2016_v4 = vadd.f32 %v1997_v2, %v1954_v25  ;;  %v2017_v9 = vadd.f32 %v2011_v10, %v1955_v21 }
 0x503   : > { %v2059_v26 = vpop.f32.mrf.mxu2  ;;  %v2073_v62 = vpop.f32.mrf.mxu3 }
 0x504   : > { %v2119_v60 = vpop.f32.mrf.mxu0  ;;  %v2133_v59 = vpop.f32.mrf.mxu1  ;;  %v2078_v5 = vadd.f32 %v2059_v26, %v2016_v4  ;;  %v2079_v33 = vadd.f32 %v2073_v62, %v2017_v9 }
 0x505   : > { %v2138_v19 = vadd.f32 %v2119_v60, %v2076_v11  ;;  %v2139_v50 = vadd.f32 %v2133_v59, %v2077_v44 }
 0x507   : > { %v5065_v24 = vmax.f32 %v2138_v19, 0.0  ;;  %v5067_v8 = vmax.f32 %v2139_v50, 0.0  ;;  %v5214_v19 = vpop.permute.xlu0 %2850 }
 0x509   : > { %2781 = vrot.lane.b32.xlu1 %v5065_v24, %s4341_s19  ;;  %2749 = vrot.lane.b32.xlu2 %v5067_v8, %s4341_s19  ;;  %v5089_v48 = vpack.c.bf16 %v5065_v24, %v4841_v43  ;;  %v5093_v54 = vpack.c.bf16 %v5067_v8, %v4843_v23 }
 0x50b   : > { %6490 = vst [vmem:[#allocation42_spill] sm:$0xff] %v5089_v48 }
 0x50c   : > { %v2121_v39 = vpop.f32.mrf.mxu0  ;;  %v2135_v3 = vpop.f32.mrf.mxu1  ;;  %6491 = vst [vmem:[#allocation43_spill] sm:$0xff] %v5093_v54 }
 0x50d   : > { %v2140_v61 = vadd.f32 %v2121_v39, %v2078_v5  ;;  %v2141_v20 = vadd.f32 %v2135_v3, %v2079_v33 }
 0x50f   : > { %v5073_v22 = vmax.f32 %v2140_v61, 0.0  ;;  %v5075_v14 = vmax.f32 %v2141_v20, 0.0  ;;  %v4307_v20 = vld [vmem:[%s6340_s8 + $0x8] sm:$0xff] }
 0x511   : > { %6488 = vst [vmem:[#allocation40_spill] sm:$0xff] %v5073_v22  ;;  %v2149_v2 = vpack.c.bf16 %v5073_v22, %v5073_v22  ;;  %2751 = vrot.lane.b32.xlu0 %v5075_v14, %s4341_s19  ;;  %2783 = vrot.lane.b32.xlu2 %v5073_v22, %s4341_s19  ;;  %v2150_v10 = vpack.c.bf16 %v5075_v14, %v5075_v14 }
 0x512   : > { %6489 = vst [vmem:[#allocation41_spill] sm:$0xff] %v5075_v14 }
 0x513   : > { %v2156_v36 = vsel %vm420_vm3, %v2149_v2, 0  ;;  %v2159_v40 = vsel %vm420_vm3, %v2150_v10, 0 }
 0x514   : > { %2165 = vmatpush.bf16.msra.mxu2 %v2156_v36  ;;  %2178 = vmatpush.bf16.msra.mxu3 %v2159_v40 }
 0x518   : > { %2166 = vmatpush.bf16.msra.mxu2 %v5089_v48  ;;  %2179 = vmatpush.bf16.msra.mxu3 %v5093_v54 }
 0x51c   : > { %2167 = vmatpush.bf16.msra.mxu2 %v4857_v41  ;;  %2180 = vmatpush.bf16.msra.mxu3 %v4861_v42 }
 0x520   : > { %2168 = vmatpush.bf16.msra.mxu2 %v4695_v28  ;;  %2181 = vmatpush.bf16.msra.mxu3 %v4699_v29 }
 0x523   : > { %4177 = vmatmul.msk.bf16.vlgmr.msra.gmra.mxu2 %vm2151_vm12, %v2146_v47  ;;  %4178 = vmatmul.msk.bf16.vlgmr.msra.gmra.mxu3 %vm2151_vm12, %v2146_v47 }
 0x563   : > { %v2750_v55 = vpop.permute.xlu2 %2749 }
 0x56b   : > { %v5200_v60 = vpop.permute.xlu2 %2783 }
 0x57b   : > { %v2782_v32 = vpop.permute.xlu1 %2781 }
 0x57c   : > { %v2793_v6 = vsel %vm370_vm1, %v2782_v32, %v2750_v55  ;;  %v2817_v34 = vsel %vm370_vm1, %v2750_v55, %v2782_v32 }
 0x57d   : > { %v5121_v37 = vmul.f32 %v2817_v34, %v4485_v17  ;;  %v5124_v51 = vmul.f32 %v2793_v6, %v4487_v18 }
 0x57f   : > { %6495 = vst [vmem:[#allocation47_spill] sm:$0xff] %v5121_v37 }
 0x580   : > { %6496 = vst [vmem:[#allocation48_spill] sm:$0xff] %v5124_v51 }
 0x583   : > { %v5222_v12 = vpop.permute.xlu0 %2751 }
 0x5a6   : > { %v2170_v1 = vpop.f32.mrf.mxu2  ;;  %v2183_v0 = vpop.f32.mrf.mxu3 }
 0x5a7   : > { %v5130_v11 = vmax.f32 %v2170_v1, 0.0  ;;  %v5132_v7 = vmax.f32 %v2183_v0, 0.0 }
 0x5a9   : > { %2209 = vrot.lane.b32.xlu1 %v5130_v11, %s4342_s20  ;;  %2206 = vrot.lane.b32.xlu0 %v5132_v7, %s4342_s20 }
 0x5aa   : > { %2190 = vrot.lane.b32.xlu2 %v5132_v7, %s4341_s19 }
 0x5ae   : > { %v2172_v46 = vpop.f32.mrf.mxu2  ;;  %v2185_v44 = vpop.f32.mrf.mxu3 }
 0x5af   : > { %v4306_v46 = vld [vmem:[%s6340_s8] sm:$0xff] }
 0x5b1   : > { %2858 = vrot.lane.b32.xlu1 %v5075_v14, %s4342_s20  ;;  %2194 = vrot.lane.b32.xlu0 %v5130_v11, %s4341_s19 }
 0x5b2   : > { %2309 = vrot.lane.b32.xlu2 %v5130_v11, %s4343_s21 }
 0x5b9   : > { %2306 = vrot.lane.b32.xlu1 %v5132_v7, %s4343_s21  ;;  %2856 = vrot.lane.b32.xlu0 %v5067_v8, %s4342_s20 }
 0x5ba   : > { %2874 = vrot.lane.b32.xlu2 %v4679_v31, %s4342_s20 }
 0x5c1   : > { %2371 = vrot.lane.b32.xlu1 %v5130_v11, %s4344_s22  ;;  %2368 = vrot.lane.b32.xlu0 %v5132_v7, %s4344_s22 }
 0x5c2   : > { %2880 = vrot.lane.b32.xlu2 %v5065_v24, %s4342_s20 }
 0x5c9   : > { %2872 = vrot.lane.b32.xlu1 %v4687_v57, %s4342_s20  ;;  %2876 = vrot.lane.b32.xlu0 %v4847_v35, %s4342_s20 }
 0x5ca   : > { %2481 = vrot.lane.b32.xlu2 %v5130_v11, %s4345_s23 }
 0x5d1   : > { %2878 = vrot.lane.b32.xlu1 %v4841_v43, %s4342_s20  ;;  %2483 = vrot.lane.b32.xlu0 %v5132_v7, %s4345_s23 }
 0x5d2   : > { %2545 = vrot.lane.b32.xlu2 %v5132_v7, %s4346_s24 }
 0x5d9   : > { %2543 = vrot.lane.b32.xlu1 %v5130_v11, %s4346_s24  ;;  %2882 = vrot.lane.b32.xlu0 %v5073_v22, %s4342_s20 }
 0x5da   : > { %2667 = vrot.lane.b32.xlu2 %v5130_v11, %s4348_s26 }
 0x5e1   : > { %2607 = vrot.lane.b32.xlu1 %v5132_v7, %s4347_s25  ;;  %2605 = vrot.lane.b32.xlu0 %v5130_v11, %s4347_s25 }
 0x5e2   : > { %3023 = vrot.lane.b32.xlu2 %v4851_v13, %s4343_s21 }
 0x5e9   : > { %3021 = vrot.lane.b32.xlu1 %v4681_v30, %s4343_s21  ;;  %2669 = vrot.lane.b32.xlu0 %v5132_v7, %s4348_s26 }
 0x5ea   : > { %3029 = vrot.lane.b32.xlu2 %v5075_v14, %s4343_s21 }
 0x5f1   : > { %3027 = vrot.lane.b32.xlu1 %v5067_v8, %s4343_s21  ;;  %3019 = vrot.lane.b32.xlu0 %v4689_v58, %s4343_s21 }
 0x5f2   : > { %3043 = vrot.lane.b32.xlu2 %v4687_v57, %s4343_s21 }
 0x5f9   : > { %3047 = vrot.lane.b32.xlu1 %v4847_v35, %s4343_s21  ;;  %3025 = vrot.lane.b32.xlu0 %v4843_v23, %s4343_s21 }
 0x5fa   : > { %3049 = vrot.lane.b32.xlu2 %v4841_v43, %s4343_s21 }
 0x601   : > { %3051 = vrot.lane.b32.xlu1 %v5065_v24, %s4343_s21  ;;  %3045 = vrot.lane.b32.xlu0 %v4679_v31, %s4343_s21 }
 0x602   : > { %3053 = vrot.lane.b32.xlu2 %v5073_v22, %s4343_s21 }
 0x604   : > { %v2191_v53 = vpop.permute.xlu2 %2190 }
 0x609   : > { %3156 = vrot.lane.b32.xlu1 %v4689_v58, %s4344_s22  ;;  %3160 = vrot.lane.b32.xlu0 %v4851_v13, %s4344_s22 }
 0x60a   : > { %3158 = vrot.lane.b32.xlu2 %v4681_v30, %s4344_s22 }
 0x60c   : > { %v2310_v59 = vpop.permute.xlu2 %2309 }
 0x611   : > { %3162 = vrot.lane.b32.xlu1 %v4843_v23, %s4344_s22  ;;  %3166 = vrot.lane.b32.xlu0 %v5075_v14, %s4344_s22 }
 0x612   : > { %3190 = vrot.lane.b32.xlu2 %v5073_v22, %s4344_s22 }
 0x614   : > { %v5224_v50 = vpop.permute.xlu2 %2874 }
 0x619   : > { %3188 = vrot.lane.b32.xlu1 %v5065_v24, %s4344_s22  ;;  %3186 = vrot.lane.b32.xlu0 %v4841_v43, %s4344_s22 }
 0x61a   : > { %3164 = vrot.lane.b32.xlu2 %v5067_v8, %s4344_s22 }
 0x61b   : > { %v2210_v25 = vpop.permute.xlu1 %2209  ;;  %v2207_v21 = vpop.permute.xlu0 %2206 }
 0x61c   : > { %v2881_v26 = vpop.permute.xlu2 %2880  ;;  %v2211_v4 = vsel %vm392_vm2, %v2210_v25, %v2207_v21  ;;  %v2214_v62 = vsel %vm392_vm2, %v2207_v21, %v2210_v25 }
 0x61d   : > { %v2215_v9 = vmul.f32 %v2214_v62, %v4481_v15  ;;  %v2216_v5 = vmul.f32 %v2211_v4, %v4483_v16 }
 0x61f   : > { %v2220_v33 = vpack.c.bf16 %v2215_v9, %v2215_v9  ;;  %v2221_v39 = vpack.c.bf16 %v2216_v5, %v2216_v5  ;;  %v6497_v5 = vld [vmem:[#allocation2_spill] sm:$0xff] }
 0x621   : > { %3182 = vrot.lane.b32.xlu1 %v4679_v31, %s4344_s22  ;;  %3493 = vrot.lane.b32.xlu0 %v5073_v22, %s4346_s24  ;;  %v2231_v61 = vsel %vm420_vm3, %v2220_v33, 0  ;;  %v2234_v3 = vsel %vm420_vm3, %v2221_v39, 0  ;;  %v6498_v39 = vld [vmem:[#allocation3_spill] sm:$0xff] }
 0x622   : > { %3184 = vrot.lane.b32.xlu2 %v4847_v35, %s4344_s22  ;;  %2243 = vmatpush.bf16.msrb.mxu0 %v2231_v61 }
 0x623   : > { %2257 = vmatpush.bf16.msrb.mxu1 %v2234_v3  ;;  %v5247_v2 = vpop.permute.xlu1 %2858  ;;  %v2195_v36 = vpop.permute.xlu0 %2194 }
 0x624   : > { %v5249_v10 = vpop.permute.xlu2 %2481  ;;  %v2196_v40 = vsel %vm370_vm1, %v2195_v36, %v2191_v53  ;;  %v2199_v47 = vsel %vm370_vm1, %v2191_v53, %v2195_v36  ;;  %v2434_v36 = vpack.c.bf16 %v5132_v7, %v5132_v7  ;;  %v4308_v7 = vld [vmem:[%s6340_s8 + $0x10] sm:$0xff] }
 0x625   : > { %v2200_v55 = vmul.f32 %v2199_v47, %v4485_v17  ;;  %v2201_v32 = vmul.f32 %v2196_v40, %v4487_v18  ;;  %4185 = vmatmul.msk.bf16.vlgmr.msrb.gmra.mxu0 %vm416_vm5, %v4307_v20 }
 0x626   : > { %4186 = vmatmul.msk.bf16.vlgmr.msrb.gmra.mxu1 %vm416_vm5, %v4307_v20 }
 0x627   : > { %v2204_v6 = vpack.c.bf16 %v2200_v55, %v2200_v55  ;;  %v2205_v34 = vpack.c.bf16 %v2201_v32, %v2201_v32 }
 0x629   : > { %3495 = vrot.lane.b32.xlu1 %v5075_v14, %s4346_s24  ;;  %3487 = vrot.lane.b32.xlu0 %v4843_v23, %s4346_s24  ;;  %v2273_v1 = vsel %vm420_vm3, %v2204_v6, 0  ;;  %v2276_v0 = vsel %vm420_vm3, %v2205_v34, 0 }
 0x62a   : > { %3180 = vrot.lane.b32.xlu2 %v4687_v57, %s4344_s22  ;;  %2285 = vmatpush.bf16.msrb.mxu2 %v2273_v1 }
 0x62b   : > { %2299 = vmatpush.bf16.msrb.mxu3 %v2276_v0  ;;  %v2307_v44 = vpop.permute.xlu1 %2306  ;;  %v2857_v25 = vpop.permute.xlu0 %2856  ;;  %v6499_v0 = vld [vmem:[#allocation10_spill] sm:$0xff] }
 0x62c   : > { %v5268_v53 = vpop.permute.xlu2 %2545  ;;  %v2311_v21 = vsel %vm502_vm0, %v2310_v59, %v2307_v44  ;;  %v2314_v4 = vsel %vm502_vm0, %v2307_v44, %v2310_v59  ;;  %v2892_v62 = vsel %vm392_vm2, %v2881_v26, %v2857_v25  ;;  %v2916_v9 = vsel %vm392_vm2, %v2857_v25, %v2881_v26  ;;  %v6500_v44 = vld [vmem:[#allocation11_spill] sm:$0xff] }
 0x62d   : > { %v2315_v33 = vmul.f32 %v2314_v4, %v6497_v5  ;;  %v2316_v61 = vmul.f32 %v2311_v21, %v6498_v39  ;;  %4191 = vmatmul.msk.bf16.vlgmr.msrb.gmra.mxu2 %vm416_vm5, %v4306_v46  ;;  %v2433_v59 = vpack.c.bf16 %v5130_v11, %v5130_v11  ;;  %v2447_v11 = vsel %vm420_vm3, %v2434_v36, 0 }
 0x62e   : > { %4192 = vmatmul.msk.bf16.vlgmr.msrb.gmra.mxu3 %vm416_vm5, %v4306_v46  ;;  %v2889_v36 = vsel %vm392_vm2, %v5224_v50, %v5214_v19 }
 0x62f   : > { %v2320_v3 = vpack.c.bf16 %v2315_v33, %v2315_v33  ;;  %v2321_v20 = vpack.c.bf16 %v2316_v61, %v2316_v61  ;;  %v2444_v55 = vsel %vm420_vm3, %v2433_v59, 0  ;;  %v2913_v33 = vsel %vm392_vm2, %v5214_v19, %v5224_v50 }
 0x631   : > { %3356 = vrot.lane.b32.xlu1 %v5073_v22, %s4345_s23  ;;  %v2331_v26 = vsel %vm420_vm3, %v2320_v3, 0  ;;  %v2334_v40 = vsel %vm420_vm3, %v2321_v20, 0  ;;  %3348 = vrot.lane.b32.xlu0 %v4841_v43, %s4345_s23  ;;  %v4309_v20 = vld [vmem:[%s6340_s8 + $0x18] sm:$0xff] }
 0x632   : > { %3358 = vrot.lane.b32.xlu2 %v5075_v14, %s4345_s23  ;;  %2343 = vmatpush.bf16.msra.mxu0 %v2331_v26 }
 0x633   : > { %2357 = vmatpush.bf16.msra.mxu1 %v2334_v40  ;;  %v2372_v47 = vpop.permute.xlu1 %2371  ;;  %v2369_v6 = vpop.permute.xlu0 %2368 }
 0x634   : > { %v5295_v32 = vpop.permute.xlu2 %2667  ;;  %v2373_v34 = vsel %vm572_vm4, %v2372_v47, %v2369_v6  ;;  %v2376_v1 = vsel %vm572_vm4, %v2369_v6, %v2372_v47  ;;  %v6514_v6 = vld [vmem:[#allocation17_spill] sm:$0xff] }
 0x635   : > { %v2377_v46 = vmul.f32 %v2376_v1, %v6499_v0  ;;  %v2378_v25 = vmul.f32 %v2373_v34, %v6500_v44  ;;  %4199 = vmatmul.msk.bf16.vlgmr.msra.gmra.mxu0 %vm416_vm5, %v4308_v7 }
 0x636   : > { %2456 = vmatpush.bf16.msrb.mxu0 %v2444_v55  ;;  %4200 = vmatmul.msk.bf16.vlgmr.msra.gmra.mxu1 %vm416_vm5, %v4308_v7  ;;  %v5325_v7 = vmul.f32 %v2913_v33, %v4481_v15  ;;  %v5332_v55 = vmul.f32 %v2889_v36, %v4483_v16  ;;  %v6510_v36 = vld [vmem:[#allocation14_spill] sm:$0xff] }
 0x637   : > { %2470 = vmatpush.bf16.msrb.mxu1 %v2447_v11  ;;  %v2382_v21 = vpack.c.bf16 %v2377_v46, %v2377_v46  ;;  %v2383_v4 = vpack.c.bf16 %v2378_v25, %v2378_v25  ;;  %v5356_v46 = vmul.f32 %v2916_v9, %v4481_v15  ;;  %v5359_v25 = vmul.f32 %v2892_v62, %v4483_v16 }
 0x638   : > { %6502 = vst [vmem:[#allocation50_spill] sm:$0xff] %v5325_v7 }
 0x639   : > { %3489 = vrot.lane.b32.xlu1 %v5065_v24, %s4346_s24  ;;  %3354 = vrot.lane.b32.xlu0 %v5067_v8, %s4345_s23  ;;  %v2393_v61 = vsel %vm420_vm3, %v2382_v21, 0  ;;  %v2396_v3 = vsel %vm420_vm3, %v2383_v4, 0  ;;  %6503 = vst [vmem:[#allocation51_spill] sm:$0xff] %v5332_v55 }
 0x63a   : > { %3485 = vrot.lane.b32.xlu2 %v4841_v43, %s4346_s24  ;;  %2405 = vmatpush.bf16.msra.mxu2 %v2393_v61  ;;  %6506 = vst [vmem:[#allocation54_spill] sm:$0xff] %v5356_v46 }
 0x63b   : > { %2419 = vmatpush.bf16.msra.mxu3 %v2396_v3  ;;  %v5320_v59 = vpop.permute.xlu1 %2872  ;;  %v2877_v40 = vpop.permute.xlu0 %2876  ;;  %6507 = vst [vmem:[#allocation55_spill] sm:$0xff] %v5359_v25 }
 0x63c   : > { %6501 = vst [vmem:[#allocation49_spill] sm:$0xff] %v5320_v59  ;;  %v5322_v26 = vpop.permute.xlu2 %3023  ;;  %v2890_v11 = vsel %vm392_vm2, %v2877_v40, %v5108_v56  ;;  %v2914_v47 = vsel %vm392_vm2, %v5108_v56, %v2877_v40  ;;  %v4310_v56 = vld [vmem:[%s6340_s8 + $0x20] sm:$0xff] }
 0x63d   : > { %v5335_v19 = vmul.f32 %v2914_v47, %v4481_v15  ;;  %v5338_v50 = vmul.f32 %v2890_v11, %v4483_v16  ;;  %4207 = vmatmul.msk.bf16.vlgmr.msra.gmra.mxu2 %vm416_vm5, %v4309_v20  ;;  %v6511_v11 = vld [vmem:[#allocation15_spill] sm:$0xff] }
 0x63e   : > { %4208 = vmatmul.msk.bf16.vlgmr.msra.gmra.mxu3 %vm416_vm5, %v4309_v20 }
 0x63f   : > { %6504 = vst [vmem:[#allocation52_spill] sm:$0xff] %v5335_v19 }
 0x640   : > { %6505 = vst [vmem:[#allocation53_spill] sm:$0xff] %v5338_v50 }
 0x641   : > { %3350 = vrot.lane.b32.xlu1 %v4843_v23, %s4345_s23  ;;  %3481 = vrot.lane.b32.xlu0 %v4847_v35, %s4346_s24 }
 0x642   : > { %3491 = vrot.lane.b32.xlu2 %v5067_v8, %s4346_s24 }
 0x643   : > { %v2879_v1 = vpop.permute.xlu1 %2878  ;;  %v2484_v4 = vpop.permute.xlu0 %2483 }
 0x644   : > { %v5361_v21 = vpop.permute.xlu2 %3029  ;;  %v2891_v33 = vsel %vm392_vm2, %v2879_v1, %v5106_v27  ;;  %v2915_v61 = vsel %vm392_vm2, %v5106_v27, %v2879_v1  ;;  %v2485_v3 = vsel %vm692_vm6, %v5249_v10, %v2484_v4  ;;  %v2489_v20 = vsel %vm692_vm6, %v2484_v4, %v5249_v10 }
 0x645   : > { %v5372_v9 = vmul.f32 %v2915_v61, %v4481_v15  ;;  %v5375_v62 = vmul.f32 %v2891_v33, %v4483_v16  ;;  %v2490_v40 = vmul.f32 %v2485_v3, %v6510_v36  ;;  %v2491_v47 = vmul.f32 %v2489_v20, %v6511_v11  ;;  %4215 = vmatmul.msk.bf16.vlgmr.msrb.gmra.mxu0 %vm416_vm5, %v4310_v56  ;;  %v4311_v61 = vld [vmem:[%s6340_s8 + $0x28] sm:$0xff] }
 0x646   : > { %4216 = vmatmul.msk.bf16.vlgmr.msrb.gmra.mxu1 %vm416_vm5, %v4310_v56 }
 0x647   : > { %6508 = vst [vmem:[#allocation56_spill] sm:$0xff] %v5372_v9  ;;  %v2495_v1 = vpack.c.bf16 %v2490_v40, %v2490_v40  ;;  %v2496_v4 = vpack.c.bf16 %v2491_v47, %v2491_v47 }
 0x648   : > { %6509 = vst [vmem:[#allocation57_spill] sm:$0xff] %v5375_v62 }
 0x649   : > { %3477 = vrot.lane.b32.xlu1 %v4679_v31, %s4346_s24  ;;  %3344 = vrot.lane.b32.xlu0 %v4847_v35, %s4345_s23  ;;  %v2506_v33 = vsel %vm420_vm3, %v2495_v1, 0  ;;  %v2509_v56 = vsel %vm420_vm3, %v2496_v4, 0 }
 0x64a   : > { %3352 = vrot.lane.b32.xlu2 %v5065_v24, %s4345_s23  ;;  %2518 = vmatpush.bf16.msrb.mxu2 %v2506_v33  ;;  %v6513_v33 = vld [vmem:[#allocation16_spill] sm:$0xff] }
 0x64b   : > { %2532 = vmatpush.bf16.msrb.mxu3 %v2509_v56  ;;  %v2544_v3 = vpop.permute.xlu1 %2543  ;;  %v2883_v40 = vpop.permute.xlu0 %2882 }
 0x64c   : > { %v5396_v20 = vpop.permute.xlu2 %3043  ;;  %v2547_v47 = vsel %vm762_vm7, %v2544_v3, %v5268_v53  ;;  %v2551_v34 = vsel %vm762_vm7, %v5268_v53, %v2544_v3  ;;  %v5404_v1 = vsel %vm392_vm2, %v2883_v40, %v5247_v2  ;;  %v5408_v4 = vsel %vm392_vm2, %v5247_v2, %v2883_v40  ;;  %v4312_v2 = vld [vmem:[%s6340_s8 + $0x30] sm:$0xff] }
 0x64d   : > { %6512 = vst [vmem:[#allocation14_spill] sm:$0xff] %v5404_v1  ;;  %v2552_v56 = vmul.f32 %v2547_v47, %v6513_v33  ;;  %v2553_v10 = vmul.f32 %v2551_v34, %v6514_v6  ;;  %4223 = vmatmul.msk.bf16.vlgmr.msrb.gmra.mxu2 %vm416_vm5, %v4311_v61 }
 0x64e   : > { %4224 = vmatmul.msk.bf16.vlgmr.msrb.gmra.mxu3 %vm416_vm5, %v4311_v61 }
 0x64f   : > { %v2557_v27 = vpack.c.bf16 %v2552_v56, %v2552_v56  ;;  %v2558_v49 = vpack.c.bf16 %v2553_v10, %v2553_v10  ;;  %v6516_v56 = vld [vmem:[#allocation23_spill] sm:$0xff] }
 0x651   : > { %3483 = vrot.lane.b32.xlu1 %v4851_v13, %s4346_s24  ;;  %v2568_v53 = vsel %vm420_vm3, %v2557_v27, 0  ;;  %v2571_v3 = vsel %vm420_vm3, %v2558_v49, 0  ;;  %3475 = vrot.lane.b32.xlu0 %v4689_v58, %s4346_s24  ;;  %v6515_v49 = vld [vmem:[#allocation22_spill] sm:$0xff] }
 0x652   : > { %3479 = vrot.lane.b32.xlu2 %v4681_v30, %s4346_s24  ;;  %2580 = vmatpush.bf16.msra.mxu0 %v2568_v53 }
 0x653   : > { %2594 = vmatpush.bf16.msra.mxu1 %v2571_v3  ;;  %v2608_v34 = vpop.permute.xlu1 %2607  ;;  %v2606_v61 = vpop.permute.xlu0 %2605 }
 0x654   : > { %v3050_v10 = vpop.permute.xlu2 %3049  ;;  %v2609_v40 = vsel %vm832_vm8, %v2606_v61, %v2608_v34  ;;  %v2613_v27 = vsel %vm832_vm8, %v2608_v34, %v2606_v61  ;;  %v4313_v34 = vld [vmem:[%s6340_s8 + $0x38] sm:$0xff] }
 0x655   : > { %v2614_v47 = vmul.f32 %v2609_v40, %v6515_v49  ;;  %v2615_v52 = vmul.f32 %v2613_v27, %v6516_v56  ;;  %4231 = vmatmul.msk.bf16.vlgmr.msra.gmra.mxu0 %vm416_vm5, %v4312_v2 }
 0x656   : > { %4232 = vmatmul.msk.bf16.vlgmr.msra.gmra.mxu1 %vm416_vm5, %v4312_v2 }
 0x657   : > { %v2619_v29 = vpack.c.bf16 %v2614_v47, %v2614_v47  ;;  %v2620_v28 = vpack.c.bf16 %v2615_v52, %v2615_v52  ;;  %v6519_v47 = vld [vmem:[#allocation26_spill] sm:$0xff] }
 0x659   : > { %3340 = vrot.lane.b32.xlu1 %v4679_v31, %s4345_s23  ;;  %3336 = vrot.lane.b32.xlu0 %v4687_v57, %s4345_s23  ;;  %v2630_v53 = vsel %vm420_vm3, %v2619_v29, 0  ;;  %v2633_v3 = vsel %vm420_vm3, %v2620_v28, 0 }
 0x65a   : > { %3342 = vrot.lane.b32.xlu2 %v4681_v30, %s4345_s23  ;;  %2642 = vmatpush.bf16.msra.mxu2 %v2630_v53 }
 0x65b   : > { %2656 = vmatpush.bf16.msra.mxu3 %v2633_v3  ;;  %v3022_v52 = vpop.permute.xlu1 %3021  ;;  %v2670_v61 = vpop.permute.xlu0 %2669  ;;  %v6520_v3 = vld [vmem:[#allocation27_spill] sm:$0xff] }
 0x65c   : > { %v3054_v2 = vpop.permute.xlu2 %3053  ;;  %v2671_v28 = vsel %vm902_vm9, %v5295_v32, %v2670_v61  ;;  %v2675_v29 = vsel %vm902_vm9, %v2670_v61, %v5295_v32 }
 0x65d   : > { %v5444_v40 = vsel %vm502_vm0, %v3054_v2, %v5361_v21  ;;  %v5448_v27 = vsel %vm502_vm0, %v5361_v21, %v3054_v2  ;;  %v2676_v53 = vmul.f32 %v2671_v28, %v6519_v47  ;;  %v2677_v42 = vmul.f32 %v2675_v29, %v6520_v3  ;;  %4239 = vmatmul.msk.bf16.vlgmr.msra.gmra.mxu2 %vm416_vm5, %v4313_v34  ;;  %v4314_v2 = vld [vmem:[%s6340_s8 + $0x40] sm:$0xff] }
 0x65e   : > { %6517 = vst [vmem:[#allocation15_spill] sm:$0xff] %v5444_v40  ;;  %4240 = vmatmul.msk.bf16.vlgmr.msra.gmra.mxu3 %vm416_vm5, %v4313_v34 }
 0x65f   : > { %6518 = vst [vmem:[#allocation16_spill] sm:$0xff] %v5448_v27  ;;  %v2681_v41 = vpack.c.bf16 %v2676_v53, %v2676_v53  ;;  %v2682_v54 = vpack.c.bf16 %v2677_v42, %v2677_v42 }
 0x661   : > { %3346 = vrot.lane.b32.xlu1 %v4851_v13, %s4345_s23  ;;  %3769 = vrot.lane.b32.xlu0 %v5075_v14, %s4348_s26  ;;  %v2692_v32 = vsel %vm420_vm3, %v2681_v41, 0  ;;  %v2695_v21 = vsel %vm420_vm3, %v2682_v54, 0 }
 0x662   : > { %3473 = vrot.lane.b32.xlu2 %v4687_v57, %s4346_s24  ;;  %2704 = vmatpush.bf16.msrb.mxu0 %v2692_v32 }
 0x663   : > { %2718 = vmatpush.bf16.msrb.mxu1 %v2695_v21  ;;  %v3028_v42 = vpop.permute.xlu1 %3027  ;;  %v3020_v61 = vpop.permute.xlu0 %3019 }
 0x664   : > { %v5469_v34 = vpop.permute.xlu2 %3158  ;;  %v5473_v28 = vsel %vm502_vm0, %v5396_v20, %v3020_v61  ;;  %v5477_v29 = vsel %vm502_vm0, %v3020_v61, %v5396_v20 }
 0x665   : > { %6521 = vst [vmem:[#allocation17_spill] sm:$0xff] %v5473_v28  ;;  %4247 = vmatmul.msk.bf16.vlgmr.msrb.gmra.mxu0 %vm416_vm5, %v4314_v2 }
 0x666   : > { %6522 = vst [vmem:[#allocation26_spill] sm:$0xff] %v5477_v29  ;;  %4248 = vmatmul.msk.bf16.vlgmr.msrb.gmra.mxu1 %vm416_vm5, %v4314_v2 }
 0x669   : > { %3338 = vrot.lane.b32.xlu1 %v4689_v58, %s4345_s23  ;;  %3630 = vrot.lane.b32.xlu0 %v5073_v22, %s4347_s25 }
 0x66a   : > { %3767 = vrot.lane.b32.xlu2 %v5073_v22, %s4348_s26 }
 0x66b   : > { %v3048_v41 = vpop.permute.xlu1 %3047  ;;  %v3026_v53 = vpop.permute.xlu0 %3025 }
 0x66c   : > { %v3191_v54 = vpop.permute.xlu2 %3190  ;;  %v3061_v20 = vsel %vm502_vm0, %v3048_v41, %v5322_v26  ;;  %v3085_v32 = vsel %vm502_vm0, %v5322_v26, %v3048_v41  ;;  %v3062_v21 = vsel %vm502_vm0, %v3050_v10, %v3026_v53  ;;  %v3086_v2 = vsel %vm502_vm0, %v3026_v53, %v3050_v10 }
 0x66d   : > { %v5496_v48 = vmul.f32 %v3086_v2, %v6497_v5  ;;  %v5499_v22 = vmul.f32 %v3062_v21, %v6498_v39  ;;  %v5512_v2 = vmul.f32 %v3085_v32, %v6497_v5  ;;  %v5515_v21 = vmul.f32 %v3061_v20, %v6498_v39 }
 0x66f   : > { %6523 = vst [vmem:[#allocation27_spill] sm:$0xff] %v5496_v48 }
 0x670   : > { %6524 = vst [vmem:[#allocation58_spill] sm:$0xff] %v5499_v22 }
 0x671   : > { %3632 = vrot.lane.b32.xlu1 %v5075_v14, %s4347_s25  ;;  %6527 = vst [vmem:[#allocation61_spill] sm:$0xff] %v5512_v2 }
 0x672   : > { %6528 = vst [vmem:[#allocation62_spill] sm:$0xff] %v5515_v21 }
 0x673   : > { %v3052_v61 = vpop.permute.xlu1 %3051  ;;  %v3046_v29 = vpop.permute.xlu0 %3045 }
 0x674   : > { %v3165_v28 = vpop.permute.xlu2 %3164  ;;  %v3063_v56 = vsel %vm502_vm0, %v3052_v61, %v3028_v42  ;;  %v3087_v26 = vsel %vm502_vm0, %v3028_v42, %v3052_v61  ;;  %v3060_v41 = vsel %vm502_vm0, %v3046_v29, %v3022_v52  ;;  %v3084_v10 = vsel %vm502_vm0, %v3022_v52, %v3046_v29 }
 0x675   : > { %v5506_v53 = vmul.f32 %v3087_v26, %v6497_v5  ;;  %v5509_v14 = vmul.f32 %v3063_v56, %v6498_v39  ;;  %v5518_v49 = vmul.f32 %v3084_v10, %v6497_v5  ;;  %v5521_v42 = vmul.f32 %v3060_v41, %v6498_v39 }
 0x677   : > { %6525 = vst [vmem:[#allocation59_spill] sm:$0xff] %v5506_v53 }
 0x678   : > { %6526 = vst [vmem:[#allocation60_spill] sm:$0xff] %v5509_v14 }
 0x679   : > { %6529 = vst [vmem:[#allocation63_spill] sm:$0xff] %v5518_v49 }
 0x67a   : > { %6530 = vst [vmem:[#allocation64_spill] sm:$0xff] %v5521_v42 }
 0x67b   : > { %v3157_v20 = vpop.permute.xlu1 %3156  ;;  %v3161_v26 = vpop.permute.xlu0 %3160 }
 0x67c   : > { %v3185_v61 = vpop.permute.xlu2 %3184 }
 0x67d   : > { %v3198_v10 = vsel %vm572_vm4, %v3185_v61, %v3161_v26  ;;  %v3222_v41 = vsel %vm572_vm4, %v3161_v26, %v3185_v61 }
 0x683   : > { %v3163_v40 = vpop.permute.xlu1 %3162  ;;  %v3167_v55 = vpop.permute.xlu0 %3166 }
 0x684   : > { %v3181_v27 = vpop.permute.xlu2 %3180  ;;  %v5540_v56 = vsel %vm572_vm4, %v3191_v54, %v3167_v55  ;;  %v5543_v32 = vsel %vm572_vm4, %v3167_v55, %v3191_v54 }
 0x685   : > { %v5534_v52 = vsel %vm572_vm4, %v3181_v27, %v3157_v20  ;;  %v5537_v29 = vsel %vm572_vm4, %v3157_v20, %v3181_v27  ;;  %6533 = vst [vmem:[#allocation67_spill] sm:$0xff] %v5540_v56 }
 0x686   : > { %6531 = vst [vmem:[#allocation65_spill] sm:$0xff] %v5534_v52 }
 0x687   : > { %6532 = vst [vmem:[#allocation66_spill] sm:$0xff] %v5537_v29 }
 0x688   : > { %6534 = vst [vmem:[#allocation68_spill] sm:$0xff] %v5543_v32 }
 0x68b   : > { %v3189_v42 = vpop.permute.xlu1 %3188  ;;  %v3187_v49 = vpop.permute.xlu0 %3186 }
 0x68c   : > { %v3359_v21 = vpop.permute.xlu2 %3358  ;;  %v3200_v61 = vsel %vm572_vm4, %v3189_v42, %v3165_v28  ;;  %v3224_v26 = vsel %vm572_vm4, %v3165_v28, %v3189_v42  ;;  %v3199_v2 = vsel %vm572_vm4, %v3187_v49, %v3163_v40  ;;  %v3223_v52 = vsel %vm572_vm4, %v3163_v40, %v3187_v49 }
 0x68d   : > { %v5550_v27 = vmul.f32 %v3224_v26, %v6499_v0  ;;  %v5553_v20 = vmul.f32 %v3200_v61, %v6500_v44  ;;  %v5556_v55 = vmul.f32 %v3223_v52, %v6499_v0  ;;  %v5559_v54 = vmul.f32 %v3199_v2, %v6500_v44 }
 0x68e   : > { %v5570_v52 = vmul.f32 %v3222_v41, %v6499_v0  ;;  %v5573_v2 = vmul.f32 %v3198_v10, %v6500_v44 }
 0x68f   : > { %6535 = vst [vmem:[#allocation69_spill] sm:$0xff] %v5550_v27 }
 0x690   : > { %6536 = vst [vmem:[#allocation70_spill] sm:$0xff] %v5553_v20 }
 0x691   : > { %6537 = vst [vmem:[#allocation71_spill] sm:$0xff] %v5556_v55 }
 0x692   : > { %6538 = vst [vmem:[#allocation72_spill] sm:$0xff] %v5559_v54 }
 0x693   : > { %v3183_v42 = vpop.permute.xlu1 %3182  ;;  %v3494_v40 = vpop.permute.xlu0 %3493  ;;  %6539 = vst [vmem:[#allocation73_spill] sm:$0xff] %v5570_v52 }
 0x694   : > { %v3486_v49 = vpop.permute.xlu2 %3485  ;;  %v3197_v26 = vsel %vm572_vm4, %v3183_v42, %v5469_v34  ;;  %v3221_v61 = vsel %vm572_vm4, %v5469_v34, %v3183_v42  ;;  %6540 = vst [vmem:[#allocation74_spill] sm:$0xff] %v5573_v2 }
 0x695   : > { %v5576_v29 = vmul.f32 %v3221_v61, %v6499_v0  ;;  %v5579_v28 = vmul.f32 %v3197_v26, %v6500_v44 }
 0x697   : > { %6541 = vst [vmem:[#allocation75_spill] sm:$0xff] %v5576_v29 }
 0x698   : > { %6542 = vst [vmem:[#allocation76_spill] sm:$0xff] %v5579_v28 }
 0x69b   : > { %v3496_v55 = vpop.permute.xlu1 %3495  ;;  %v3488_v42 = vpop.permute.xlu0 %3487 }
 0x69c   : > { %v3492_v34 = vpop.permute.xlu2 %3491  ;;  %v5586_v41 = vsel %vm762_vm7, %v3494_v40, %v3496_v55  ;;  %v5589_v10 = vsel %vm762_vm7, %v3496_v55, %v3494_v40  ;;  %v3508_v61 = vsel %vm762_vm7, %v3486_v49, %v3488_v42  ;;  %v3540_v26 = vsel %vm762_vm7, %v3488_v42, %v3486_v49 }
 0x69d   : > { %v5610_v56 = vmul.f32 %v3508_v61, %v6513_v33  ;;  %v5613_v32 = vmul.f32 %v3540_v26, %v6514_v6 }
 0x69f   : > { %6543 = vst [vmem:[#allocation77_spill] sm:$0xff] %v5610_v56 }
 0x6a0   : > { %6544 = vst [vmem:[#allocation78_spill] sm:$0xff] %v5613_v32 }
 0x6a2   : > { %v5593_v27 = vpop.f32.mrf.mxu0 }
 0x6a3   : > { %v5595_v22 = vpop.f32.mrf.mxu1  ;;  %v3349_v54 = vpop.permute.xlu0 %3348 }
 0x6a4   : > { %v3357_v29 = vpop.permute.xlu1 %3356  ;;  %v3353_v20 = vpop.permute.xlu2 %3352 }
 0x6a5   : > { %v5598_v28 = vsel %vm692_vm6, %v3357_v29, %v3359_v21  ;;  %v5601_v2 = vsel %vm692_vm6, %v3359_v21, %v3357_v29 }
 0x6aa   : > { %v2247_v52 = vpop.f32.mrf.mxu0 }
 0x6ab   : > { %v5603_v55 = vpop.f32.mrf.mxu1  ;;  %v3355_v40 = vpop.permute.xlu0 %3354 }
 0x6ac   : > { %v3372_v14 = vsel %vm692_vm6, %v3353_v20, %v3355_v40  ;;  %v3404_v49 = vsel %vm692_vm6, %v3355_v40, %v3353_v20  ;;  %v3490_v42 = vpop.permute.xlu1 %3489  ;;  %v3480_v44 = vpop.permute.xlu2 %3479 }
 0x6ad   : > { %v3509_v48 = vsel %vm762_vm7, %v3490_v42, %v3492_v34  ;;  %v3541_v53 = vsel %vm762_vm7, %v3492_v34, %v3490_v42  ;;  %v5631_v19 = vmul.f32 %v3404_v49, %v6511_v11 }
 0x6ae   : > { %v5616_v21 = vmul.f32 %v3509_v48, %v6513_v33  ;;  %v5619_v29 = vmul.f32 %v3541_v53, %v6514_v6  ;;  %v5628_v53 = vmul.f32 %v3372_v14, %v6510_v36 }
 0x6af   : > { %6548 = vst [vmem:[#allocation82_spill] sm:$0xff] %v5631_v19 }
 0x6b0   : > { %6545 = vst [vmem:[#allocation79_spill] sm:$0xff] %v5616_v21  ;;  %v2287_v0 = vpop.f32.mrf.mxu2 }
 0x6b1   : > { %6546 = vst [vmem:[#allocation80_spill] sm:$0xff] %v5619_v29  ;;  %v2301_v20 = vpop.f32.mrf.mxu3 }
 0x6b2   : > { %v2345_v61 = vpop.f32.mrf.mxu0  ;;  %6547 = vst [vmem:[#allocation81_spill] sm:$0xff] %v5628_v53  ;;  %v2302_v59 = vadd.f32 %v2301_v20, %v5595_v22 }
 0x6b3   : > { %v2359_v42 = vpop.f32.mrf.mxu1  ;;  %v3482_v50 = vpop.permute.xlu0 %3481 }
 0x6b4   : > { %v3351_v26 = vpop.permute.xlu1 %3350  ;;  %v3343_v14 = vpop.permute.xlu2 %3342 }
 0x6b5   : > { %v3371_v7 = vsel %vm692_vm6, %v3349_v54, %v3351_v26  ;;  %v3403_v48 = vsel %vm692_vm6, %v3351_v26, %v3349_v54 }
 0x6b6   : > { %v5634_v39 = vmul.f32 %v3371_v7, %v6510_v36  ;;  %v5637_v40 = vmul.f32 %v3403_v48, %v6511_v11 }
 0x6b8   : > { %6549 = vst [vmem:[#allocation83_spill] sm:$0xff] %v5634_v39  ;;  %v2289_v34 = vpop.f32.mrf.mxu2 }
 0x6b9   : > { %6550 = vst [vmem:[#allocation84_spill] sm:$0xff] %v5637_v40  ;;  %v5639_v32 = vpop.f32.mrf.mxu3  ;;  %v2290_v26 = vadd.f32 %v2289_v34, %v2247_v52 }
 0x6ba   : > { %v2347_v56 = vpop.f32.mrf.mxu0 }
 0x6bb   : > { %v5645_v49 = vpop.f32.mrf.mxu1  ;;  %v5647_v21 = vadd.f32 %v2347_v56, %v2290_v26  ;;  %v3345_v7 = vpop.permute.xlu0 %3344 }
 0x6bc   : > { %v3478_v5 = vpop.permute.xlu1 %3477  ;;  %v3474_v39 = vpop.permute.xlu2 %3473 }
 0x6bd   : > { %v3506_v48 = vsel %vm762_vm7, %v3478_v5, %v3480_v44  ;;  %v3538_v62 = vsel %vm762_vm7, %v3480_v44, %v3478_v5 }
 0x6be   : > { %v5660_v40 = vmul.f32 %v3506_v48, %v6513_v33  ;;  %v5663_v5 = vmul.f32 %v3538_v62, %v6514_v6 }
 0x6c0   : > { %v2407_v25 = vpop.f32.mrf.mxu2  ;;  %6553 = vst [vmem:[#allocation87_spill] sm:$0xff] %v5660_v40  ;;  %v2365_v40 = vadd.f32 %v2359_v42, %v2302_v59 }
 0x6c1   : > { %v2421_v9 = vpop.f32.mrf.mxu3  ;;  %6554 = vst [vmem:[#allocation88_spill] sm:$0xff] %v5663_v5 }
 0x6c2   : > { %v2458_v46 = vpop.f32.mrf.mxu0  ;;  %v2427_v5 = vadd.f32 %v2421_v9, %v2365_v40 }
 0x6c3   : > { %v2472_v29 = vpop.f32.mrf.mxu1  ;;  %v3476_v53 = vpop.permute.xlu0 %3475 }
 0x6c4   : > { %v5652_v54 = vsel %vm762_vm7, %v3474_v39, %v3476_v53  ;;  %v5655_v52 = vsel %vm762_vm7, %v3476_v53, %v3474_v39  ;;  %v3484_v56 = vpop.permute.xlu1 %3483 }
 0x6c5   : > { %6551 = vst [vmem:[#allocation85_spill] sm:$0xff] %v5652_v54  ;;  %v3507_v34 = vsel %vm762_vm7, %v3482_v50, %v3484_v56  ;;  %v3539_v26 = vsel %vm762_vm7, %v3484_v56, %v3482_v50 }
 0x6c6   : > { %6552 = vst [vmem:[#allocation86_spill] sm:$0xff] %v5655_v52  ;;  %v5666_v44 = vmul.f32 %v3507_v34, %v6513_v33  ;;  %v5669_v19 = vmul.f32 %v3539_v26, %v6514_v6  ;;  %v2288_v26 = vadd.f32 %v2287_v0, %v5593_v27 }
 0x6c8   : > { %6555 = vst [vmem:[#allocation89_spill] sm:$0xff] %v5666_v44  ;;  %v5671_v54 = vpop.f32.mrf.mxu2  ;;  %v2364_v53 = vadd.f32 %v2345_v61, %v2288_v26  ;;  %v2478_v61 = vadd.f32 %v2472_v29, %v2427_v5 }
 0x6c9   : > { %6556 = vst [vmem:[#allocation90_spill] sm:$0xff] %v5669_v19  ;;  %v2423_v39 = vpop.f32.mrf.mxu3 }
 0x6ca   : > { %v5677_v48 = vpop.f32.mrf.mxu0  ;;  %v2426_v50 = vadd.f32 %v2407_v25, %v2364_v53 }
 0x6cb   : > { %v2474_v56 = vpop.f32.mrf.mxu1 }
 0x6cc   : > { %v3341_v62 = vpop.permute.xlu1 %3340  ;;  %v2477_v40 = vadd.f32 %v2458_v46, %v2426_v50 }
 0x6cd   : > { %v3369_v52 = vsel %vm692_vm6, %v3341_v62, %v3343_v14  ;;  %v3401_v34 = vsel %vm692_vm6, %v3343_v14, %v3341_v62 }
 0x6ce   : > { %v5686_v1 = vmul.f32 %v3369_v52, %v6510_v36  ;;  %v5689_v0 = vmul.f32 %v3401_v34, %v6511_v11  ;;  %v3337_v52 = vpop.permute.xlu0 %3336 }
 0x6d0   : > { %v2520_v63 = vpop.f32.mrf.mxu2  ;;  %6557 = vst [vmem:[#allocation91_spill] sm:$0xff] %v5686_v1 }
 0x6d1   : > { %v2534_v38 = vpop.f32.mrf.mxu3 }
 0x6d2   : > { %v2582_v51 = vpop.f32.mrf.mxu0 }
 0x6d3   : > { %v2596_v45 = vpop.f32.mrf.mxu1 }
 0x6d4   : > { %v3347_v44 = vpop.permute.xlu1 %3346 }
 0x6d5   : > { %v3370_v19 = vsel %vm692_vm6, %v3345_v7, %v3347_v44  ;;  %v3402_v37 = vsel %vm692_vm6, %v3347_v44, %v3345_v7  ;;  %v2539_v7 = vadd.f32 %v2520_v63, %v2477_v40  ;;  %v2540_v44 = vadd.f32 %v2534_v38, %v2478_v61 }
 0x6d6   : > { %v5692_v22 = vmul.f32 %v3370_v19, %v6510_v36  ;;  %v5695_v27 = vmul.f32 %v3402_v37, %v6511_v11 }
 0x6d7   : > { %v2601_v62 = vadd.f32 %v2582_v51, %v2539_v7  ;;  %v2602_v34 = vadd.f32 %v2596_v45, %v2540_v44  ;;  %v2304_v45 = vadd.f32 %v5639_v32, %v5603_v55  ;;  %v2428_v32 = vadd.f32 %v5671_v54, %v5647_v21 }
 0x6d8   : > { %v2522_v59 = vpop.f32.mrf.mxu2 }
 0x6d9   : > { %v2536_v20 = vpop.f32.mrf.mxu3  ;;  %v2367_v51 = vadd.f32 %v5645_v49, %v2304_v45  ;;  %v2479_v40 = vadd.f32 %v5677_v48, %v2428_v32 }
 0x6da   : > { %v2584_v42 = vpop.f32.mrf.mxu0 }
 0x6db   : > { %v2598_v14 = vpop.f32.mrf.mxu1 }
 0x6dc   : > { %v3339_v19 = vpop.permute.xlu1 %3338 }
 0x6dd   : > { %v5702_v53 = vsel %vm692_vm6, %v3337_v52, %v3339_v19  ;;  %v5705_v37 = vsel %vm692_vm6, %v3339_v19, %v3337_v52 }
 0x6e0   : > { %v2644_v26 = vpop.f32.mrf.mxu2 }
 0x6e1   : > { %v2663_v25 = vadd.f32 %v2644_v26, %v2601_v62  ;;  %v2658_v1 = vpop.f32.mrf.mxu3 }
 0x6e2   : > { %v2664_v9 = vadd.f32 %v2658_v1, %v2602_v34  ;;  %v2706_v46 = vpop.f32.mrf.mxu0  ;;  %v2429_v1 = vadd.f32 %v2423_v39, %v2367_v51 }
 0x6e3   : > { %v2720_v29 = vpop.f32.mrf.mxu1  ;;  %v2725_v5 = vadd.f32 %v2706_v46, %v2663_v25 }
 0x6e4   : > { %v2726_v50 = vadd.f32 %v2720_v29, %v2664_v9  ;;  %v2480_v25 = vadd.f32 %v2474_v56, %v2429_v1  ;;  %v2541_v56 = vadd.f32 %v2522_v59, %v2479_v40  ;;  %v5809_v44 = vpop.permute.xlu1 %3632 }
 0x6e5   : > { %v5707_v63 = vmax.f32 %v2725_v5, 0.0 }
 0x6e6   : > { %v5709_v38 = vmax.f32 %v2726_v50, 0.0  ;;  %v2542_v9 = vadd.f32 %v2536_v20, %v2480_v25  ;;  %v2603_v52 = vadd.f32 %v2584_v42, %v2541_v56  ;;  %v3770_v42 = vpop.permute.xlu0 %3769  ;;  %v5847_v25 = vmul.f32 %v5586_v41, %v6513_v33 }
 0x6e7   : > { %2785 = vrot.lane.b32.xlu0 %v5707_v63, %s4341_s19 }
 0x6e8   : > { %2860 = vrot.lane.b32.xlu2 %v5709_v38, %s4342_s20  ;;  %2753 = vrot.lane.b32.xlu1 %v5709_v38, %s4341_s19  ;;  %v2604_v49 = vadd.f32 %v2598_v14, %v2542_v9  ;;  %v2646_v7 = vpop.f32.mrf.mxu2 }
 0x6e9   : > { %v2660_v55 = vpop.f32.mrf.mxu3  ;;  %v2665_v21 = vadd.f32 %v2646_v7, %v2603_v52 }
 0x6ea   : > { %v2666_v61 = vadd.f32 %v2660_v55, %v2604_v49  ;;  %v2708_v14 = vpop.f32.mrf.mxu0 }
 0x6eb   : > { %v2722_v39 = vpop.f32.mrf.mxu1  ;;  %v2727_v48 = vadd.f32 %v2708_v14, %v2665_v21 }
 0x6ec   : > { %v2728_v20 = vadd.f32 %v2722_v39, %v2666_v61 }
 0x6ed   : > { %v5749_v59 = vmax.f32 %v2727_v48, 0.0  ;;  %v5885_v48 = vmul.f32 %v5598_v28, %v6510_v36 }
 0x6ee   : > { %v5741_v54 = vmax.f32 %v2728_v20, 0.0 }
 0x6ef   : > { %3031 = vrot.lane.b32.xlu0 %v5709_v38, %s4343_s21 }
 0x6f0   : > { %3497 = vrot.lane.b32.xlu2 %v5707_v63, %s4346_s24  ;;  %2884 = vrot.lane.b32.xlu1 %v5707_v63, %s4342_s20 }
 0x6f7   : > { %3055 = vrot.lane.b32.xlu0 %v5707_v63, %s4343_s21 }
 0x6f8   : > { %3773 = vrot.lane.b32.xlu2 %v5709_v38, %s4348_s26  ;;  %3168 = vrot.lane.b32.xlu1 %v5709_v38, %s4344_s22 }
 0x6ff   : > { %3192 = vrot.lane.b32.xlu0 %v5707_v63, %s4344_s22 }
 0x700   : > { %3634 = vrot.lane.b32.xlu2 %v5707_v63, %s4347_s25  ;;  %3362 = vrot.lane.b32.xlu1 %v5709_v38, %s4345_s23 }
 0x707   : > { %3499 = vrot.lane.b32.xlu0 %v5709_v38, %s4346_s24 }
 0x708   : > { %2755 = vrot.lane.b32.xlu2 %v5741_v54, %s4341_s19  ;;  %3771 = vrot.lane.b32.xlu1 %v5707_v63, %s4348_s26 }
 0x70f   : > { %3360 = vrot.lane.b32.xlu0 %v5707_v63, %s4345_s23 }
 0x710   : > { %2886 = vrot.lane.b32.xlu2 %v5749_v59, %s4342_s20  ;;  %2787 = vrot.lane.b32.xlu1 %v5749_v59, %s4341_s19 }
 0x717   : > { %2862 = vrot.lane.b32.xlu0 %v5741_v54, %s4342_s20 }
 0x718   : > { %3761 = vrot.lane.b32.xlu2 %v4843_v23, %s4348_s26  ;;  %3759 = vrot.lane.b32.xlu1 %v4841_v43, %s4348_s26 }
 0x71f   : > { %3636 = vrot.lane.b32.xlu0 %v5709_v38, %s4347_s25 }
 0x720   : > { %3622 = vrot.lane.b32.xlu2 %v4841_v43, %s4347_s25  ;;  %3033 = vrot.lane.b32.xlu1 %v5741_v54, %s4343_s21  ;;  %v3768_v43 = vpop.permute.xlu2 %3767 }
 0x721   : > { %v3784_v51 = vsel %vm902_vm9, %v3768_v43, %v3770_v42 }
 0x722   : > { %v5864_v39 = vmul.f32 %v3784_v51, %v6519_v47 }
 0x727   : > { %3057 = vrot.lane.b32.xlu0 %v5749_v59, %s4343_s21 }
 0x728   : > { %3628 = vrot.lane.b32.xlu2 %v5067_v8, %s4347_s25  ;;  %3765 = vrot.lane.b32.xlu1 %v5067_v8, %s4348_s26 }
 0x72f   : > { %3763 = vrot.lane.b32.xlu0 %v5065_v24, %s4348_s26 }
 0x730   : > { %3194 = vrot.lane.b32.xlu2 %v5749_v59, %s4344_s22  ;;  %3170 = vrot.lane.b32.xlu1 %v5741_v54, %s4344_s22 }
 0x737   : > { %3624 = vrot.lane.b32.xlu0 %v4843_v23, %s4347_s25 }
 0x738   : > { %3501 = vrot.lane.b32.xlu2 %v5749_v59, %s4346_s24  ;;  %3626 = vrot.lane.b32.xlu1 %v5065_v24, %s4347_s25  ;;  %v5807_v24 = vpop.permute.xlu0 %3630 }
 0x73f   : > { %3751 = vrot.lane.b32.xlu0 %v4679_v31, %s4348_s26 }
 0x740   : > { %3755 = vrot.lane.b32.xlu2 %v4847_v35, %s4348_s26  ;;  %3366 = vrot.lane.b32.xlu1 %v5741_v54, %s4345_s23 }
 0x742   : > { %v5793_v8 = vpop.permute.xlu2 %2860 }
 0x747   : > { %3503 = vrot.lane.b32.xlu0 %v5741_v54, %s4346_s24 }
 0x748   : > { %3775 = vrot.lane.b32.xlu2 %v5749_v59, %s4348_s26  ;;  %3753 = vrot.lane.b32.xlu1 %v4681_v30, %s4348_s26 }
 0x74a   : > { %v3498_v23 = vpop.permute.xlu2 %3497 }
 0x74f   : > { %3364 = vrot.lane.b32.xlu0 %v5749_v59, %s4345_s23  ;;  %s359_s23 = scalar_lea.vmem %s6342_s10, %s4277_s15 }
 0x750   : > { %3640 = vrot.lane.b32.xlu2 %v5741_v54, %s4347_s25  ;;  %3638 = vrot.lane.b32.xlu1 %v5749_v59, %s4347_s25 }
 0x752   : > { %v3774_v19 = vpop.permute.xlu2 %3773 }
 0x757   : > { %3777 = vrot.lane.b32.xlu0 %v5741_v54, %s4348_s26 }
 0x758   : > { %3616 = vrot.lane.b32.xlu2 %v4681_v30, %s4347_s25  ;;  %3614 = vrot.lane.b32.xlu1 %v4679_v31, %s4347_s25 }
 0x759   : > { %v2786_v62 = vpop.permute.xlu0 %2785 }
 0x75a   : > { %v2754_v34 = vpop.permute.xlu1 %2753  ;;  %v5817_v26 = vpop.permute.xlu2 %3634 }
 0x75f   : > { %3757 = vrot.lane.b32.xlu0 %v4851_v13, %s4348_s26 }
 0x760   : > { %3747 = vrot.lane.b32.xlu2 %v4687_v57, %s4348_s26  ;;  %3620 = vrot.lane.b32.xlu1 %v4851_v13, %s4347_s25 }
 0x761   : > { %v5825_v46 = vpop.permute.xlu0 %3031 }
 0x762   : > { %v5827_v29 = vpop.permute.xlu1 %2884  ;;  %v2756_v30 = vpop.permute.xlu2 %2755 }
 0x763   : > { %v2894_v21 = vsel %vm392_vm2, %v5827_v29, %v5793_v8 }
 0x767   : > { %3618 = vrot.lane.b32.xlu0 %v4847_v35, %s4347_s25  ;;  %v3816_v35 = vsel %vm902_vm9, %v3770_v42, %v3768_v43  ;;  %v5889_v43 = vmul.f32 %v5601_v2, %v6511_v11 }
 0x768   : > { %3612 = vrot.lane.b32.xlu2 %v4689_v58, %s4347_s25  ;;  %3610 = vrot.lane.b32.xlu1 %v4687_v57, %s4347_s25  ;;  %v5851_v57 = vmul.f32 %v5589_v10, %v6514_v6  ;;  %v5867_v10 = vmul.f32 %v3816_v35, %v6520_v3 }
 0x769   : > { %v5835_v31 = vpop.permute.xlu0 %3055 }
 0x76a   : > { %v5837_v5 = vpop.permute.xlu1 %3168  ;;  %v2887_v13 = vpop.permute.xlu2 %2886 }
 0x76f   : > { %3749 = vrot.lane.b32.xlu0 %v4689_v58, %s4348_s26 }
 0x771   : > { %v5841_v50 = vpop.permute.xlu0 %3192 }
 0x772   : > { %v3363_v45 = vpop.permute.xlu1 %3362  ;;  %v3762_v55 = vpop.permute.xlu2 %3761 }
 0x779   : > { %v3500_v1 = vpop.permute.xlu0 %3499 }
 0x77a   : > { %v3772_v9 = vpop.permute.xlu1 %3771  ;;  %v3511_v58 = vsel %vm762_vm7, %v3498_v23, %v3500_v1  ;;  %v3543_v32 = vsel %vm762_vm7, %v3500_v1, %v3498_v23  ;;  %v2795_v23 = vsel %vm370_vm1, %v2786_v62, %v2754_v34 }
 0x77b   : > { %v3785_v49 = vsel %vm902_vm9, %v3772_v9, %v3774_v19  ;;  %v3817_v40 = vsel %vm902_vm9, %v3774_v19, %v3772_v9  ;;  %v5858_v61 = vmul.f32 %v3511_v58, %v6513_v33  ;;  %v5861_v41 = vmul.f32 %v3543_v32, %v6514_v6 }
 0x77c   : > { %v5870_v56 = vmul.f32 %v3785_v49, %v6519_v47  ;;  %v5873_v20 = vmul.f32 %v3817_v40, %v6520_v3  ;;  %v2819_v19 = vsel %vm370_vm1, %v2754_v34, %v2786_v62  ;;  %v2794_v32 = vsel %vm370_vm1, %v5200_v60, %v5222_v12  ;;  %v5913_v40 = vpop.permute.xlu2 %3622 }
 0x77d   : > { %v3569_v7 = vpack.c.bf16 %v5858_v61, %v5847_v25  ;;  %v3570_v52 = vpack.c.bf16 %v5861_v41, %v5851_v57  ;;  %v2818_v62 = vsel %vm370_vm1, %v5222_v12, %v5200_v60  ;;  %v2834_v49 = vmul.f32 %v2795_v23, %v4487_v18 }
 0x77e   : > { %v2831_v60 = vmul.f32 %v2818_v62, %v4485_v17  ;;  %v2832_v12 = vmul.f32 %v2794_v32, %v4487_v18 }
 0x780   : > { %v2845_v14 = vpack.c.bf16 %v2834_v49, %v2832_v12 }
 0x781   : > { %v3361_v42 = vpop.permute.xlu0 %3360 }
 0x782   : > { %v2788_v51 = vpop.permute.xlu1 %2787  ;;  %v3374_v35 = vsel %vm692_vm6, %v3361_v42, %v3363_v45  ;;  %v3406_v1 = vsel %vm692_vm6, %v3363_v45, %v3361_v42 }
 0x783   : > { %v2796_v9 = vsel %vm370_vm1, %v2788_v51, %v2756_v30  ;;  %v2820_v58 = vsel %vm370_vm1, %v2756_v30, %v2788_v51  ;;  %v5898_v28 = vmul.f32 %v3374_v35, %v6510_v36  ;;  %v5901_v2 = vmul.f32 %v3406_v1, %v6511_v11  ;;  %v6571_v51 = vld [vmem:[#allocation39_spill] sm:$0xff] }
 0x784   : > { %v2835_v34 = vmul.f32 %v2820_v58, %v4485_v17  ;;  %v2836_v45 = vmul.f32 %v2796_v9, %v4487_v18  ;;  %v2833_v30 = vmul.f32 %v2819_v19, %v4485_v17 }
 0x785   : > { %v6644_v25 = vpack.c.bf16 %v5898_v28, %v5885_v48  ;;  %v6650_v48 = vld [vmem:[#allocation86_spill] sm:$0xff] }
 0x786   : > { %v2846_v35 = vpack.c.bf16 %v2835_v34, %v2835_v34  ;;  %v2847_v1 = vpack.c.bf16 %v2836_v45, %v2836_v45  ;;  %v2844_v58 = vpack.c.bf16 %v2833_v30, %v2831_v60  ;;  %v2918_v34 = vsel %vm392_vm2, %v5793_v8, %v5827_v29 }
 0x787   : > { %v2932_v8 = vmul.f32 %v2918_v34, %v4481_v15  ;;  %v2933_v29 = vmul.f32 %v2894_v21, %v4483_v16  ;;  %v6562_v34 = vld [vmem:[#allocation48_spill] sm:$0xff]  ;;  %v6563_v21 = vld [vmem:[#allocation46_spill] sm:$0xff]  ;;  %v3546_v28 = vmul.f32 %v6650_v48, %v6514_v6 }
 0x788   : > { %v2988_v9 = vsel %vm420_vm3, %v2846_v35, 0  ;;  %v2991_v19 = vsel %vm420_vm3, %v2847_v1, 0 }
 0x789   : > { %2996 = vmatpush.bf16.msra.mxu0 %v2988_v9  ;;  %3009 = vmatpush.bf16.msra.mxu1 %v2991_v19  ;;  %v2863_v23 = vpop.permute.xlu0 %2862  ;;  %v5941_v9 = vpop.permute.xlu2 %3628 }
 0x78a   : > { %v3760_v62 = vpop.permute.xlu1 %3759  ;;  %v2895_v32 = vsel %vm392_vm2, %v2887_v13, %v2863_v23  ;;  %v2919_v45 = vsel %vm392_vm2, %v2863_v23, %v2887_v13  ;;  %v6558_v23 = vld [vmem:[#allocation14_spill] sm:$0xff] }
 0x78b   : > { %v5932_v35 = vsel %vm902_vm9, %v3760_v62, %v3762_v55  ;;  %v5935_v1 = vsel %vm902_vm9, %v3762_v55, %v3760_v62  ;;  %v2934_v30 = vmul.f32 %v2919_v45, %v4481_v15  ;;  %v2935_v49 = vmul.f32 %v2895_v32, %v4483_v16 }
 0x78c   : > { %v2930_v55 = vmul.f32 %v5408_v4, %v4481_v15  ;;  %v2931_v62 = vmul.f32 %v6558_v23, %v4483_v16  ;;  %v6564_v45 = vpack.c.bf16 %v6562_v34, %v6563_v21  ;;  %v6568_v34 = vld [vmem:[#allocation38_spill] sm:$0xff] }
 0x78d   : > { %v2946_v60 = vpack.c.bf16 %v2934_v30, %v2934_v30  ;;  %v2947_v12 = vpack.c.bf16 %v2935_v49, %v2935_v49  ;;  %2997 = vmatpush.bf16.msra.mxu0 %v2844_v58  ;;  %3010 = vmatpush.bf16.msra.mxu1 %v2845_v14  ;;  %v6559_v58 = vld [vmem:[#allocation47_spill] sm:$0xff]  ;;  %v6560_v14 = vld [vmem:[#allocation45_spill] sm:$0xff] }
 0x78e   : > { %v6561_v32 = vpack.c.bf16 %v6559_v58, %v6560_v14  ;;  %v6566_v58 = vld [vmem:[#allocation34_spill] sm:$0xff] }
 0x78f   : > { %v2953_v13 = vsel %vm420_vm3, %v2946_v60, 0  ;;  %v2956_v19 = vsel %vm420_vm3, %v2947_v12, 0  ;;  %v2944_v12 = vpack.c.bf16 %v2932_v8, %v2930_v55  ;;  %v2822_v14 = vmul.f32 %v6566_v58, %v4487_v18  ;;  %v6576_v55 = vld [vmem:[#allocation9_spill] sm:$0xff]  ;;  %v6580_v58 = vld [vmem:[#allocation55_spill] sm:$0xff] }
 0x790   : > { %2961 = vmatpush.bf16.msrb.mxu2 %v2953_v13  ;;  %2974 = vmatpush.bf16.msrb.mxu3 %v2956_v19  ;;  %v2945_v13 = vpack.c.bf16 %v2933_v29, %v2931_v62  ;;  %v6565_v19 = vld [vmem:[#allocation35_spill] sm:$0xff]  ;;  %v6575_v29 = vld [vmem:[#allocation8_spill] sm:$0xff] }
 0x791   : > { %2998 = vmatpush.bf16.msra.mxu0 %v6561_v32  ;;  %3011 = vmatpush.bf16.msra.mxu1 %v6564_v45  ;;  %v3637_v30 = vpop.permute.xlu0 %3636  ;;  %v2821_v23 = vmul.f32 %v6565_v19, %v4485_v17  ;;  %v6567_v32 = vld [vmem:[#allocation36_spill] sm:$0xff]  ;;  %v6570_v45 = vld [vmem:[#allocation37_spill] sm:$0xff]  ;;  %v2839_v62 = vpack.c.bf16 %v2822_v14, %v6576_v55 }
 0x792   : > { %v3034_v49 = vpop.permute.xlu1 %3033  ;;  %v5957_v60 = vsel %vm832_vm8, %v5817_v26, %v3637_v30  ;;  %v5961_v4 = vsel %vm832_vm8, %v3637_v30, %v5817_v26  ;;  %v6569_v21 = vpack.c.bf16 %v6567_v32, %v6568_v34  ;;  %v6572_v42 = vpack.c.bf16 %v6570_v45, %v6571_v51  ;;  %v6573_v26 = vld [vmem:[#allocation44_spill] sm:$0xff]  ;;  %v6574_v30 = vld [vmem:[#allocation49_spill] sm:$0xff] }
 0x793   : > { %v2888_v8 = vsel %vm392_vm2, %v6574_v30, %v6573_v26  ;;  %v2912_v17 = vsel %vm392_vm2, %v6573_v26, %v6574_v30  ;;  %v2838_v18 = vpack.c.bf16 %v2821_v23, %v6575_v29  ;;  %v6581_v32 = vld [vmem:[#allocation57_spill] sm:$0xff]  ;;  %v2837_v30 = vld [vmem:[%s6341_s9] sm:$0xf]  ;;  %v3089_v29 = vsel %vm502_vm0, %v5825_v46, %v5835_v31 }
 0x794   : > { %2962 = vmatpush.bf16.msrb.mxu2 %v2944_v12  ;;  %2975 = vmatpush.bf16.msrb.mxu3 %v2945_v13  ;;  %v6577_v12 = vld [vmem:[#allocation54_spill] sm:$0xff]  ;;  %v6578_v13 = vld [vmem:[#allocation56_spill] sm:$0xff]  ;;  %v6582_v51 = vpack.c.bf16 %v6580_v58, %v6581_v32  ;;  %v2921_v45 = vmul.f32 %v2888_v8, %v4483_v16  ;;  %v3065_v16 = vsel %vm502_vm0, %v5835_v31, %v5825_v46  ;;  %v6592_v46 = vld [vmem:[#allocation7_spill] sm:$0xff] }
 0x795   : > { %2999 = vmatpush.bf16.msra.mxu0 %v6569_v21  ;;  %3012 = vmatpush.bf16.msra.mxu1 %v6572_v42  ;;  %v6579_v19 = vpack.c.bf16 %v6577_v12, %v6578_v13  ;;  %v3195_v42 = vpop.permute.xlu2 %3194  ;;  %v2920_v21 = vmul.f32 %v2912_v17, %v4481_v15  ;;  %v6585_v8 = vld [vmem:[#allocation52_spill] sm:$0xff]  ;;  %v6586_v17 = vld [vmem:[#allocation50_spill] sm:$0xff]  ;;  %v6589_v13 = vld [vmem:[#allocation51_spill] sm:$0xff] }
 0x796   : > { %v6587_v12 = vpack.c.bf16 %v6585_v8, %v6586_v17  ;;  %v2939_v31 = vpack.c.bf16 %v2921_v45, %v6592_v46 }
 0x798   : > { %2963 = vmatpush.bf16.msrb.mxu2 %v6579_v19  ;;  %2976 = vmatpush.bf16.msrb.mxu3 %v6582_v51 }
 0x799   : > { %3000 = vmatpush.bf16.msra.mxu0 %v2838_v18  ;;  %3013 = vmatpush.bf16.msra.mxu1 %v2839_v62  ;;  %v3058_v34 = vpop.permute.xlu0 %3057  ;;  %v6583_v18 = vld [vmem:[#allocation2_spill] sm:$0xff]  ;;  %v6584_v62 = vld [vmem:[#allocation3_spill] sm:$0xff] }
 0x79a   : > { %v5989_v26 = vpop.permute.xlu1 %3765  ;;  %v3066_v23 = vsel %vm502_vm0, %v3058_v34, %v3034_v49  ;;  %v3090_v14 = vsel %vm502_vm0, %v3034_v49, %v3058_v34  ;;  %v6588_v49 = vld [vmem:[#allocation53_spill] sm:$0xff]  ;;  %v3103_v51 = vmul.f32 %v3089_v29, %v6583_v18  ;;  %v6591_v34 = vld [vmem:[#allocation6_spill] sm:$0xff]  ;;  %v6594_v29 = vld [vmem:[#allocation15_spill] sm:$0xff] }
 0x79b   : > { %v3105_v55 = vmul.f32 %v3090_v14, %v6583_v18  ;;  %v3106_v15 = vmul.f32 %v3066_v23, %v6584_v62  ;;  %v6590_v19 = vpack.c.bf16 %v6588_v49, %v6589_v13  ;;  %v2938_v23 = vpack.c.bf16 %v2920_v21, %v6591_v34 }
 0x79c   : > { %2964 = vmatpush.bf16.msrb.mxu2 %v6587_v12  ;;  %4252 = vmatmul.msk.bf16.vlgmr.msra.gmra.mxu0 %vm2948_vm13, %v2837_v30  ;;  %v3104_v14 = vmul.f32 %v3065_v16, %v6584_v62  ;;  %v6593_v12 = vld [vmem:[#allocation16_spill] sm:$0xff]  ;;  %v3102_v21 = vmul.f32 %v6594_v29, %v6584_v62  ;;  %v3202_v13 = vsel %vm572_vm4, %v5841_v50, %v5837_v5 }
 0x79d   : > { %2977 = vmatpush.bf16.msrb.mxu3 %v6590_v19  ;;  %v3117_v58 = vpack.c.bf16 %v3105_v55, %v3105_v55  ;;  %v3118_v32 = vpack.c.bf16 %v3106_v15, %v3106_v15  ;;  %4253 = vmatmul.msk.bf16.vlgmr.msra.gmra.mxu1 %vm2948_vm13, %v2837_v30  ;;  %v3101_v55 = vmul.f32 %v6593_v12, %v6583_v18  ;;  %v4249_v30 = vld [vmem:[%s6341_s9 + $0x4] sm:$0xf]  ;;  %v6033_v19 = vpop.permute.xlu2 %3501  ;;  %v6597_v12 = vld [vmem:[#allocation68_spill] sm:$0xff] }
 0x79e   : > { %v3226_v15 = vsel %vm572_vm4, %v5837_v5, %v5841_v50  ;;  %v3116_v34 = vpack.c.bf16 %v3104_v14, %v3102_v21 }
 0x79f   : > { %v3123_v8 = vsel %vm420_vm3, %v3117_v58, 0  ;;  %v3126_v17 = vsel %vm420_vm3, %v3118_v32, 0  ;;  %v3115_v49 = vpack.c.bf16 %v3103_v51, %v3101_v55  ;;  %v6598_v55 = vld [vmem:[#allocation67_spill] sm:$0xff] }
 0x7a0   : > { %2965 = vmatpush.bf16.msrb.mxu2 %v2938_v23  ;;  %v6595_v23 = vld [vmem:[#allocation10_spill] sm:$0xff] }
 0x7a1   : > { %2978 = vmatpush.bf16.msrb.mxu3 %v2939_v31  ;;  %v6025_v45 = vpop.permute.xlu0 %3763  ;;  %v6596_v31 = vld [vmem:[#allocation11_spill] sm:$0xff]  ;;  %v3240_v51 = vmul.f32 %v3226_v15, %v6595_v23 }
 0x7a2   : > { %v3171_v16 = vpop.permute.xlu1 %3170  ;;  %v3241_v5 = vmul.f32 %v3202_v13, %v6596_v31  ;;  %v3239_v14 = vmul.f32 %v6598_v55, %v6596_v31 }
 0x7a3   : > { %v3203_v58 = vsel %vm572_vm4, %v3195_v42, %v3171_v16  ;;  %v3227_v32 = vsel %vm572_vm4, %v3171_v16, %v3195_v42  ;;  %4250 = vmatmul.msk.bf16.vlgmr.msrb.gmra.mxu2 %vm2948_vm13, %v4249_v30  ;;  %v3238_v42 = vmul.f32 %v6597_v12, %v6595_v23 }
 0x7a4   : > { %3131 = vmatpush.bf16.msra.mxu2 %v3123_v8  ;;  %v3242_v46 = vmul.f32 %v3227_v32, %v6595_v23  ;;  %v3243_v8 = vmul.f32 %v3203_v58, %v6596_v31  ;;  %4251 = vmatmul.msk.bf16.vlgmr.msrb.gmra.mxu3 %vm2948_vm13, %v4249_v30  ;;  %v6600_v58 = vld [vmem:[#allocation27_spill] sm:$0xff]  ;;  %v6602_v32 = vld [vmem:[#allocation60_spill] sm:$0xff] }
 0x7a5   : > { %3144 = vmatpush.bf16.msra.mxu3 %v3126_v17  ;;  %v3252_v15 = vpack.c.bf16 %v3240_v51, %v3238_v42  ;;  %v6605_v42 = vld [vmem:[#allocation22_spill] sm:$0xff] }
 0x7a6   : > { %v3254_v50 = vpack.c.bf16 %v3242_v46, %v3242_v46  ;;  %v3255_v17 = vpack.c.bf16 %v3243_v8, %v3243_v8 }
 0x7a8   : > { %3132 = vmatpush.bf16.msra.mxu2 %v3115_v49  ;;  %v3260_v29 = vsel %vm420_vm3, %v3254_v50, 0  ;;  %v3263_v21 = vsel %vm420_vm3, %v3255_v17, 0  ;;  %v6599_v49 = vld [vmem:[#allocation59_spill] sm:$0xff]  ;;  %v3253_v17 = vpack.c.bf16 %v3241_v5, %v3239_v14  ;;  %v6079_v14 = vpop.permute.xlu2 %3755 }
 0x7a9   : > { %3145 = vmatpush.bf16.msra.mxu3 %v3116_v34  ;;  %3268 = vmatpush.bf16.msrb.mxu0 %v3260_v29  ;;  %v3625_v30 = vpop.permute.xlu0 %3624  ;;  %v6601_v13 = vpack.c.bf16 %v6599_v49, %v6600_v58  ;;  %v6603_v34 = vld [vmem:[#allocation58_spill] sm:$0xff]  ;;  %v6606_v29 = vld [vmem:[#allocation23_spill] sm:$0xff] }
 0x7aa   : > { %3281 = vmatpush.bf16.msrb.mxu1 %v3263_v21  ;;  %v3627_v16 = vpop.permute.xlu1 %3626  ;;  %v6604_v46 = vpack.c.bf16 %v6602_v32, %v6603_v34  ;;  %v3645_v8 = vsel %vm832_vm8, %v5913_v40, %v3625_v30  ;;  %v3677_v50 = vsel %vm832_vm8, %v3625_v30, %v5913_v40  ;;  %v6607_v49 = vld [vmem:[#allocation26_spill] sm:$0xff]  ;;  %v6609_v30 = vld [vmem:[#allocation61_spill] sm:$0xff] }
 0x7ab   : > { %v3646_v12 = vsel %vm832_vm8, %v3627_v16, %v5941_v9  ;;  %v3678_v51 = vsel %vm832_vm8, %v5941_v9, %v3627_v16  ;;  %v6064_v55 = vmul.f32 %v3645_v8, %v6605_v42  ;;  %v6067_v21 = vmul.f32 %v3677_v50, %v6606_v29  ;;  %v6610_v16 = vld [vmem:[#allocation63_spill] sm:$0xff] }
 0x7ac   : > { %3133 = vmatpush.bf16.msra.mxu2 %v6601_v13  ;;  %v3091_v58 = vmul.f32 %v6607_v49, %v6583_v18  ;;  %v6608_v13 = vld [vmem:[#allocation17_spill] sm:$0xff]  ;;  %v6074_v40 = vmul.f32 %v3646_v12, %v6605_v42  ;;  %v6077_v5 = vmul.f32 %v3678_v51, %v6606_v29  ;;  %v3297_v9 = vpack.c.bf16 %v5749_v59, %v5749_v59  ;;  %v6612_v18 = vld [vmem:[#allocation62_spill] sm:$0xff] }
 0x7ad   : > { %3146 = vmatpush.bf16.msra.mxu3 %v6604_v46  ;;  %v3092_v32 = vmul.f32 %v6608_v13, %v6584_v62  ;;  %3269 = vmatpush.bf16.msrb.mxu0 %v3252_v15  ;;  %v6611_v34 = vpack.c.bf16 %v6609_v30, %v6610_v16  ;;  %v6613_v46 = vld [vmem:[#allocation64_spill] sm:$0xff]  ;;  %v3298_v8 = vpack.c.bf16 %v5741_v54, %v5741_v54  ;;  %v6616_v59 = vld [vmem:[#allocation5_spill] sm:$0xff]  ;;  %v6618_v13 = vld [vmem:[#allocation71_spill] sm:$0xff] }
 0x7ae   : > { %3282 = vmatpush.bf16.msrb.mxu1 %v3253_v17  ;;  %v6614_v62 = vpack.c.bf16 %v6612_v18, %v6613_v46  ;;  %v3704_v50 = vpack.c.bf16 %v6074_v40, %v6064_v55  ;;  %v6615_v17 = vld [vmem:[#allocation4_spill] sm:$0xff]  ;;  %v6617_v49 = vld [vmem:[#allocation69_spill] sm:$0xff]  ;;  %v6620_v16 = vld [vmem:[#allocation70_spill] sm:$0xff] }
 0x7af   : > { %v3109_v12 = vpack.c.bf16 %v3091_v58, %v6615_v17  ;;  %v3110_v51 = vpack.c.bf16 %v3092_v32, %v6616_v59  ;;  %v6619_v30 = vpack.c.bf16 %v6617_v49, %v6618_v13  ;;  %v3306_v15 = vsel %vm420_vm3, %v3298_v8, 0  ;;  %v6623_v58 = vld [vmem:[#allocation66_spill] sm:$0xff]  ;;  %v6624_v17 = vld [vmem:[#allocation65_spill] sm:$0xff]  ;;  %v4254_v49 = vld [vmem:[%s6341_s9 + $0x8] sm:$0xf] }
 0x7b0   : > { %3134 = vmatpush.bf16.msra.mxu2 %v6611_v34  ;;  %v6621_v34 = vld [vmem:[#allocation72_spill] sm:$0xff]  ;;  %v3228_v32 = vmul.f32 %v6623_v58, %v6595_v23  ;;  %v3229_v59 = vmul.f32 %v6624_v17, %v6596_v31  ;;  %v6625_v13 = vld [vmem:[#allocation73_spill] sm:$0xff] }
 0x7b1   : > { %3147 = vmatpush.bf16.msra.mxu3 %v6614_v62  ;;  %3270 = vmatpush.bf16.msrb.mxu0 %v6619_v30  ;;  %v6622_v18 = vpack.c.bf16 %v6620_v16, %v6621_v34  ;;  %v6103_v46 = vpop.permute.xlu0 %3751  ;;  %v3303_v62 = vsel %vm420_vm3, %v3297_v9, 0  ;;  %v6626_v30 = vld [vmem:[#allocation75_spill] sm:$0xff]  ;;  %v6629_v9 = vld [vmem:[#allocation76_spill] sm:$0xff]  ;;  %v6632_v34 = vld [vmem:[#allocation41_spill] sm:$0xff] }
 0x7b2   : > { %v3367_v54 = vpop.permute.xlu1 %3366  ;;  %v6631_v8 = vld [vmem:[#allocation40_spill] sm:$0xff]  ;;  %v3296_v31 = vpack.c.bf16 %v5709_v38, %v6632_v34  ;;  %v6634_v58 = vld [vmem:[#allocation13_spill] sm:$0xff] }
 0x7b3   : > { %3283 = vmatpush.bf16.msrb.mxu1 %v6622_v18  ;;  %v3295_v23 = vpack.c.bf16 %v5707_v63, %v6631_v8  ;;  %v6633_v18 = vld [vmem:[#allocation12_spill] sm:$0xff]  ;;  %v3247_v17 = vpack.c.bf16 %v3229_v59, %v6634_v58  ;;  %v4257_v63 = vld [vmem:[%s6341_s9 + $0xc] sm:$0xf] }
 0x7b4   : > { %3135 = vmatpush.bf16.msra.mxu2 %v3109_v12  ;;  %v6627_v12 = vpack.c.bf16 %v6625_v13, %v6626_v30 }
 0x7b5   : > { %3148 = vmatpush.bf16.msra.mxu3 %v3110_v51  ;;  %v6628_v51 = vld [vmem:[#allocation74_spill] sm:$0xff] }
 0x7b6   : > { %3271 = vmatpush.bf16.msrb.mxu0 %v6627_v12  ;;  %v6630_v16 = vpack.c.bf16 %v6628_v51, %v6629_v9  ;;  %v6636_v51 = vld [vmem:[#allocation43_spill] sm:$0xff] }
 0x7b7   : > { %4255 = vmatmul.msk.bf16.vlgmr.msra.gmra.mxu2 %vm2948_vm13, %v4254_v49 }
 0x7b8   : > { %3311 = vmatpush.bf16.msrb.mxu2 %v3303_v62  ;;  %3284 = vmatpush.bf16.msrb.mxu1 %v6630_v16  ;;  %v3246_v62 = vpack.c.bf16 %v3228_v32, %v6633_v18  ;;  %v6635_v32 = vld [vmem:[#allocation42_spill] sm:$0xff]  ;;  %v6637_v16 = vld [vmem:[#allocation32_spill] sm:$0xff] }
 0x7b9   : > { %3324 = vmatpush.bf16.msrb.mxu3 %v3306_v15  ;;  %v3776_v15 = vpop.permute.xlu2 %3775  ;;  %v3504_v13 = vpop.permute.xlu0 %3503 }
 0x7ba   : > { %4256 = vmatmul.msk.bf16.vlgmr.msra.gmra.mxu3 %vm2948_vm13, %v4254_v49  ;;  %3272 = vmatpush.bf16.msrb.mxu0 %v3246_v62  ;;  %v6131_v30 = vpop.permute.xlu1 %3753  ;;  %v3512_v38 = vsel %vm762_vm7, %v6033_v19, %v3504_v13  ;;  %v3544_v49 = vsel %vm762_vm7, %v3504_v13, %v6033_v19  ;;  %v6639_v13 = vld [vmem:[#allocation30_spill] sm:$0xff] }
 0x7bb   : > { %v3559_v12 = vmul.f32 %v3512_v38, %v6513_v33  ;;  %v3560_v59 = vmul.f32 %v3544_v49, %v6514_v6  ;;  %v4260_v38 = vld [vmem:[%s6341_s9 + $0x10] sm:$0xf]  ;;  %v6640_v49 = vld [vmem:[#allocation31_spill] sm:$0xff] }
 0x7bc   : > { %3312 = vmatpush.bf16.msrb.mxu2 %v3295_v23  ;;  %3285 = vmatpush.bf16.msrb.mxu1 %v3247_v17  ;;  %v6638_v23 = vld [vmem:[#allocation33_spill] sm:$0xff]  ;;  %v6661_v6 = vld [vmem:[#allocation84_spill] sm:$0xff] }
 0x7bd   : > { %3325 = vmatpush.bf16.msrb.mxu3 %v3296_v31  ;;  %4258 = vmatmul.msk.bf16.vlgmr.msrb.gmra.mxu0 %vm2948_vm13, %v4257_v63  ;;  %v3571_v9 = vpack.c.bf16 %v3559_v12, %v3559_v12  ;;  %v3572_v8 = vpack.c.bf16 %v3560_v59, %v3560_v59 }
 0x7bf   : > { %4259 = vmatmul.msk.bf16.vlgmr.msrb.gmra.mxu1 %vm2948_vm13, %v4257_v63  ;;  %v3577_v63 = vsel %vm420_vm3, %v3571_v9, 0  ;;  %v3580_v12 = vsel %vm420_vm3, %v3572_v8, 0 }
 0x7c0   : > { %3313 = vmatpush.bf16.msrb.mxu2 %v6635_v32 }
 0x7c1   : > { %3326 = vmatpush.bf16.msrb.mxu3 %v6636_v51  ;;  %v3641_v34 = vpop.permute.xlu2 %3640  ;;  %v3365_v19 = vpop.permute.xlu0 %3364 }
 0x7c2   : > { %v3639_v31 = vpop.permute.xlu1 %3638  ;;  %v3375_v18 = vsel %vm692_vm6, %v3365_v19, %v3367_v54  ;;  %v3407_v62 = vsel %vm692_vm6, %v3367_v54, %v3365_v19 }
 0x7c3   : > { %v3422_v58 = vmul.f32 %v3375_v18, %v6510_v36  ;;  %v3423_v17 = vmul.f32 %v3407_v62, %v6511_v11  ;;  %v6641_v18 = vld [vmem:[#allocation79_spill] sm:$0xff]  ;;  %v6642_v62 = vld [vmem:[#allocation77_spill] sm:$0xff]  ;;  %v3649_v57 = vsel %vm832_vm8, %v3639_v31, %v3641_v34 }
 0x7c4   : > { %3314 = vmatpush.bf16.msrb.mxu2 %v6637_v16 }
 0x7c5   : > { %3327 = vmatpush.bf16.msrb.mxu3 %v6638_v23  ;;  %v3434_v32 = vpack.c.bf16 %v3422_v58, %v3422_v58  ;;  %v3435_v59 = vpack.c.bf16 %v3423_v17, %v3423_v17  ;;  %v6643_v58 = vpack.c.bf16 %v6641_v18, %v6642_v62  ;;  %v6660_v18 = vld [vmem:[#allocation82_spill] sm:$0xff] }
 0x7c6   : > { %v6662_v62 = vpack.c.bf16 %v6660_v18, %v6661_v6 }
 0x7c7   : > { %v3440_v54 = vsel %vm420_vm3, %v3434_v32, 0  ;;  %v3443_v51 = vsel %vm420_vm3, %v3435_v59, 0  ;;  %v6652_v32 = vld [vmem:[#allocation87_spill] sm:$0xff] }
 0x7c8   : > { %3315 = vmatpush.bf16.msrb.mxu2 %v6639_v13  ;;  %3448 = vmatpush.bf16.msra.mxu0 %v3440_v54  ;;  %v6649_v13 = vld [vmem:[#allocation85_spill] sm:$0xff] }
 0x7c9   : > { %3328 = vmatpush.bf16.msrb.mxu3 %v6640_v49  ;;  %3461 = vmatpush.bf16.msra.mxu1 %v3443_v51  ;;  %v3778_v9 = vpop.permute.xlu0 %3777  ;;  %v6170_v19 = vpop.permute.xlu2 %3616  ;;  %v3696_v49 = vmul.f32 %v3649_v57, %v6605_v42  ;;  %v6654_v54 = vld [vmem:[#allocation81_spill] sm:$0xff]  ;;  %v6655_v51 = vld [vmem:[#allocation83_spill] sm:$0xff]  ;;  %v6663_v57 = vld [vmem:[#allocation20_spill] sm:$0xff] }
 0x7ca   : > { %v6166_v16 = vpop.permute.xlu1 %3614  ;;  %v3786_v8 = vsel %vm902_vm9, %v3776_v15, %v3778_v9  ;;  %v3818_v23 = vsel %vm902_vm9, %v3778_v9, %v3776_v15  ;;  %v6648_v15 = vpack.c.bf16 %v5901_v2, %v5889_v43  ;;  %v6656_v9 = vpack.c.bf16 %v6654_v54, %v6655_v51 }
 0x7cb   : > { %4261 = vmatmul.msk.bf16.vlgmr.msrb.gmra.mxu2 %vm2948_vm13, %v4260_v38  ;;  %v3833_v61 = vmul.f32 %v3786_v8, %v6519_v47  ;;  %v3834_v41 = vmul.f32 %v3818_v23, %v6520_v3  ;;  %v6657_v8 = vld [vmem:[#allocation90_spill] sm:$0xff]  ;;  %v6658_v23 = vld [vmem:[#allocation88_spill] sm:$0xff]  ;;  %v3825_v51 = vmul.f32 %v5932_v35, %v6519_v47 }
 0x7cc   : > { %3585 = vmatpush.bf16.msra.mxu2 %v3577_v63  ;;  %4262 = vmatmul.msk.bf16.vlgmr.msrb.gmra.mxu3 %vm2948_vm13, %v4260_v38  ;;  %v3545_v63 = vmul.f32 %v6649_v13, %v6513_v33  ;;  %v3681_v38 = vsel %vm832_vm8, %v3641_v34, %v3639_v31  ;;  %v6659_v33 = vpack.c.bf16 %v6657_v8, %v6658_v23 }
 0x7cd   : > { %3598 = vmatpush.bf16.msra.mxu3 %v3580_v12  ;;  %3449 = vmatpush.bf16.msra.mxu0 %v6644_v25  ;;  %v6651_v12 = vld [vmem:[#allocation89_spill] sm:$0xff]  ;;  %v3845_v43 = vpack.c.bf16 %v3833_v61, %v3833_v61  ;;  %v3846_v2 = vpack.c.bf16 %v3834_v41, %v3834_v41  ;;  %v3408_v31 = vmul.f32 %v5702_v53, %v6510_v36  ;;  %v6665_v36 = vld [vmem:[#allocation91_spill] sm:$0xff] }
 0x7ce   : > { %3462 = vmatpush.bf16.msra.mxu1 %v6648_v15  ;;  %v6653_v59 = vpack.c.bf16 %v6651_v12, %v6652_v32  ;;  %v3697_v25 = vmul.f32 %v3681_v38, %v6606_v29  ;;  %v3563_v61 = vpack.c.bf16 %v3545_v63, %v6663_v57  ;;  %v3815_v15 = vsel %vm902_vm9, %v5989_v26, %v6025_v45  ;;  %v4266_v53 = vld [vmem:[%s6341_s9 + $0x18] sm:$0xf] }
 0x7cf   : > { %v3708_v13 = vpack.c.bf16 %v3696_v49, %v3696_v49  ;;  %v6669_v49 = vld [vmem:[#allocation19_spill] sm:$0xff]  ;;  %v3679_v32 = vsel %vm832_vm8, %v5809_v44, %v5807_v24  ;;  %v6670_v8 = vpack.c.bf16 %v5870_v56, %v5864_v39 }
 0x7d0   : > { %3586 = vmatpush.bf16.msra.mxu2 %v3569_v7  ;;  %v6645_v7 = vld [vmem:[#allocation80_spill] sm:$0xff]  ;;  %v3709_v48 = vpack.c.bf16 %v3697_v25, %v3697_v25 }
 0x7d1   : > { %3599 = vmatpush.bf16.msra.mxu3 %v3570_v52  ;;  %v6646_v52 = vld [vmem:[#allocation78_spill] sm:$0xff]  ;;  %3450 = vmatpush.bf16.msra.mxu0 %v6656_v9  ;;  %v3758_v34 = vpop.permute.xlu0 %3757  ;;  %v6227_v63 = vpop.permute.xlu2 %3747  ;;  %v3826_v9 = vmul.f32 %v5935_v1, %v6520_v3  ;;  %v4263_v1 = vld [vmem:[%s6341_s9 + $0x14] sm:$0xf] }
 0x7d2   : > { %v6647_v17 = vpack.c.bf16 %v6645_v7, %v6646_v52  ;;  %3463 = vmatpush.bf16.msra.mxu1 %v6662_v62  ;;  %v3621_v41 = vpop.permute.xlu1 %3620  ;;  %v6664_v7 = vld [vmem:[#allocation21_spill] sm:$0xff]  ;;  %v3717_v23 = vsel %vm420_vm3, %v3709_v48, 0 }
 0x7d3   : > { %v3564_v52 = vpack.c.bf16 %v3546_v28, %v6664_v7  ;;  %v6668_v28 = vld [vmem:[#allocation18_spill] sm:$0xff] }
 0x7d4   : > { %3587 = vmatpush.bf16.msra.mxu2 %v6643_v58  ;;  %v3409_v58 = vmul.f32 %v5705_v37, %v6511_v11  ;;  %v6666_v11 = vpack.c.bf16 %v5692_v22, %v6665_v36  ;;  %v3647_v37 = vsel %vm832_vm8, %v5807_v24, %v5809_v44  ;;  %v3854_v22 = vsel %vm420_vm3, %v3846_v2, 0 }
 0x7d5   : > { %3600 = vmatpush.bf16.msra.mxu3 %v6647_v17  ;;  %v3783_v17 = vsel %vm902_vm9, %v6025_v45, %v5989_v26  ;;  %v6667_v26 = vpack.c.bf16 %v5695_v27, %v5689_v0  ;;  %v3851_v45 = vsel %vm420_vm3, %v3845_v43, 0  ;;  %v3426_v38 = vpack.c.bf16 %v3408_v31, %v6668_v28  ;;  %v6674_v28 = vld [vmem:[#allocation29_spill] sm:$0xff] }
 0x7d6   : > { %3451 = vmatpush.bf16.msra.mxu0 %v6666_v11  ;;  %v3427_v12 = vpack.c.bf16 %v3409_v58, %v6669_v49  ;;  %v3827_v0 = vmul.f32 %v3783_v17, %v6519_v47  ;;  %v3828_v27 = vmul.f32 %v3815_v15, %v6520_v3  ;;  %v3692_v54 = vmul.f32 %v3647_v37, %v6605_v42 }
 0x7d7   : > { %3464 = vmatpush.bf16.msra.mxu1 %v6667_v26  ;;  %v3714_v24 = vsel %vm420_vm3, %v3708_v13, 0  ;;  %v3695_v44 = vmul.f32 %v5961_v4, %v6606_v29  ;;  %v3813_v43 = vsel %vm902_vm9, %v3758_v34, %v6079_v14  ;;  %v3780_v2 = vsel %vm902_vm9, %v6103_v46, %v6131_v30 }
 0x7d8   : > { %3588 = vmatpush.bf16.msra.mxu2 %v6653_v59  ;;  %v3694_v59 = vmul.f32 %v5957_v60, %v6605_v42  ;;  %v3781_v60 = vsel %vm902_vm9, %v6079_v14, %v3758_v34  ;;  %v3812_v4 = vsel %vm902_vm9, %v6131_v30, %v6103_v46  ;;  %v6671_v14 = vpack.c.bf16 %v5873_v20, %v5867_v10 }
 0x7d9   : > { %3601 = vmatpush.bf16.msra.mxu3 %v6659_v33  ;;  %v3619_v35 = vpop.permute.xlu0 %3618  ;;  %v3693_v33 = vmul.f32 %v3679_v32, %v6606_v29  ;;  %v3841_v18 = vpack.c.bf16 %v3827_v0, %v3825_v51  ;;  %v3842_v6 = vpack.c.bf16 %v3828_v27, %v3826_v9  ;;  %v3823_v34 = vmul.f32 %v3781_v60, %v6519_v47  ;;  %v3613_v57 = vpop.permute.xlu2 %3612 }
 0x7da   : > { %3452 = vmatpush.bf16.msra.mxu0 %v3426_v38  ;;  %v3706_v62 = vpack.c.bf16 %v3694_v59, %v3692_v54  ;;  %v3824_v46 = vmul.f32 %v3813_v43, %v6520_v3  ;;  %v3644_v30 = vsel %vm832_vm8, %v3619_v35, %v3621_v41  ;;  %v3821_v39 = vmul.f32 %v3780_v2, %v6519_v47  ;;  %v3611_v56 = vpop.permute.xlu1 %3610 }
 0x7db   : > { %3465 = vmatpush.bf16.msra.mxu1 %v3427_v12  ;;  %v3822_v10 = vmul.f32 %v3812_v4, %v6520_v3  ;;  %v3707_v20 = vpack.c.bf16 %v3695_v44, %v3693_v33  ;;  %v3643_v31 = vsel %vm832_vm8, %v6166_v16, %v6170_v19  ;;  %v3675_v58 = vsel %vm832_vm8, %v6170_v19, %v6166_v16 }
 0x7dc   : > { %3589 = vmatpush.bf16.msra.mxu2 %v3563_v61  ;;  %v3676_v25 = vsel %vm832_vm8, %v3621_v41, %v3619_v35  ;;  %v3686_v61 = vmul.f32 %v3644_v30, %v6605_v42  ;;  %v3642_v7 = vsel %vm832_vm8, %v3611_v56, %v3613_v57  ;;  %v3684_v15 = vmul.f32 %v3643_v31, %v6605_v42 }
 0x7dd   : > { %3602 = vmatpush.bf16.msra.mxu3 %v3564_v52  ;;  %4264 = vmatmul.msk.bf16.vlgmr.msra.gmra.mxu0 %vm2948_vm13, %v4263_v1  ;;  %v3839_v52 = vpack.c.bf16 %v3823_v34, %v3821_v39  ;;  %v3840_v17 = vpack.c.bf16 %v3824_v46, %v3822_v10  ;;  %v3685_v13 = vmul.f32 %v3675_v58, %v6606_v29 }
 0x7de   : > { %3722 = vmatpush.bf16.msrb.mxu0 %v3714_v24  ;;  %4265 = vmatmul.msk.bf16.vlgmr.msra.gmra.mxu1 %vm2948_vm13, %v4263_v1  ;;  %v3687_v36 = vmul.f32 %v3676_v25, %v6606_v29  ;;  %v3674_v19 = vsel %vm832_vm8, %v3613_v57, %v3611_v56  ;;  %v6672_v37 = vpack.c.bf16 %v6077_v5, %v6067_v21  ;;  %v4272_v21 = vld [vmem:[%s6341_s9 + $0x20] sm:$0xf] }
 0x7df   : > { %4267 = vmatmul.msk.bf16.vlgmr.msra.gmra.mxu2 %vm2948_vm13, %v4266_v53  ;;  %3735 = vmatpush.bf16.msrb.mxu1 %v3717_v23  ;;  %v3683_v26 = vmul.f32 %v3674_v19, %v6606_v29  ;;  %v4269_v29 = vld [vmem:[%s6341_s9 + $0x1c] sm:$0xf] }
 0x7e0   : > { %3859 = vmatpush.bf16.msrb.mxu2 %v3851_v45  ;;  %4268 = vmatmul.msk.bf16.vlgmr.msra.gmra.mxu3 %vm2948_vm13, %v4266_v53  ;;  %v3682_v53 = vmul.f32 %v3642_v7, %v6605_v42  ;;  %v3703_v45 = vpack.c.bf16 %v3687_v36, %v3685_v13  ;;  %v6675_v42 = vld [vmem:[#allocation24_spill] sm:$0xff] }
 0x7e1   : > { %3872 = vmatpush.bf16.msrb.mxu3 %v3854_v22  ;;  %v3750_v16 = vpop.permute.xlu0 %3749  ;;  %v6673_v22 = vld [vmem:[#allocation28_spill] sm:$0xff] }
 0x7e2   : > { %3723 = vmatpush.bf16.msrb.mxu0 %v3706_v62  ;;  %v3779_v41 = vsel %vm902_vm9, %v6227_v63, %v3750_v16  ;;  %v3811_v11 = vsel %vm902_vm9, %v3750_v16, %v6227_v63  ;;  %v3700_v63 = vpack.c.bf16 %v3682_v53, %v6675_v42 }
 0x7e3   : > { %3736 = vmatpush.bf16.msrb.mxu1 %v3707_v20  ;;  %v3819_v55 = vmul.f32 %v3779_v41, %v6519_v47  ;;  %v3820_v40 = vmul.f32 %v3811_v11, %v6520_v3  ;;  %v6676_v47 = vld [vmem:[#allocation25_spill] sm:$0xff] }
 0x7e4   : > { %3860 = vmatpush.bf16.msrb.mxu2 %v6670_v8  ;;  %v3701_v3 = vpack.c.bf16 %v3683_v26, %v6676_v47 }
 0x7e5   : > { %3873 = vmatpush.bf16.msrb.mxu3 %v6671_v14  ;;  %v3837_v48 = vpack.c.bf16 %v3819_v55, %v6673_v22  ;;  %v3838_v38 = vpack.c.bf16 %v3820_v40, %v6674_v28  ;;  %v4331_v22 = vld [vmem:[%s4420_s18] sm:$0xff]  ;;  %v4332_v28 = vld [vmem:[%s4420_s18 + $0x8] sm:$0xff] }
 0x7e6   : > { %3724 = vmatpush.bf16.msrb.mxu0 %v3704_v50  ;;  %v3702_v50 = vpack.c.bf16 %v3686_v61, %v3684_v15 }
 0x7e7   : > { %3737 = vmatpush.bf16.msrb.mxu1 %v6672_v37 }
 0x7e8   : > { %3861 = vmatpush.bf16.msrb.mxu2 %v3841_v18 }
 0x7e9   : > { %3874 = vmatpush.bf16.msrb.mxu3 %v3842_v6 }
 0x7ea   : > { %3725 = vmatpush.bf16.msrb.mxu0 %v3702_v50 }
 0x7eb   : > { %3738 = vmatpush.bf16.msrb.mxu1 %v3703_v45 }
 0x7ec   : > { %3862 = vmatpush.bf16.msrb.mxu2 %v3839_v52 }
 0x7ed   : > { %3875 = vmatpush.bf16.msrb.mxu3 %v3840_v17 }
 0x7ee   : > { %3726 = vmatpush.bf16.msrb.mxu0 %v3700_v63 }
 0x7ef   : > { %3739 = vmatpush.bf16.msrb.mxu1 %v3701_v3 }
 0x7f0   : > { %3863 = vmatpush.bf16.msrb.mxu2 %v3837_v48 }
 0x7f1   : > { %3876 = vmatpush.bf16.msrb.mxu3 %v3838_v38  ;;  %4270 = vmatmul.msk.bf16.vlgmr.msrb.gmra.mxu0 %vm2948_vm13, %v4269_v29 }
 0x7f2   : > { %4271 = vmatmul.msk.bf16.vlgmr.msrb.gmra.mxu1 %vm2948_vm13, %v4269_v29 }
 0x7f3   : > { %4273 = vmatmul.msk.bf16.vlgmr.msrb.gmra.mxu2 %vm2948_vm13, %v4272_v21 }
 0x7f4   : > { %4274 = vmatmul.msk.bf16.vlgmr.msrb.gmra.mxu3 %vm2948_vm13, %v4272_v21 }
 0x819   : > { %v3002_v5 = vpop.f32.mrf.mxu0 }
 0x81a   : > { %v3015_v49 = vpop.f32.mrf.mxu1 }
 0x821   : > { %v3004_v12 = vpop.f32.mrf.mxu0 }
 0x822   : > { %v3017_v32 = vpop.f32.mrf.mxu1 }
 0x826   : > { %v2967_v59 = vpop.f32.mrf.mxu2 }
 0x827   : > { %v2980_v0 = vpop.f32.mrf.mxu3  ;;  %v3003_v62 = vadd.f32 %v3002_v5, %v2967_v59 }
 0x828   : > { %v3016_v34 = vadd.f32 %v3015_v49, %v2980_v0 }
 0x82e   : > { %v2969_v27 = vpop.f32.mrf.mxu2 }
 0x82f   : > { %v2982_v54 = vpop.f32.mrf.mxu3 }
 0x83a   : > { %v3137_v51 = vpop.f32.mrf.mxu2  ;;  %v3274_v24 = vpop.f32.mrf.mxu0 }
 0x83b   : > { %v3154_v46 = vadd.f32 %v3137_v51, %v3003_v62 }
 0x83c   : > { %v3287_v44 = vpop.f32.mrf.mxu1 }
 0x83d   : > { %v3150_v9 = vpop.f32.mrf.mxu3  ;;  %v3291_v56 = vadd.f32 %v3274_v24, %v3154_v46 }
 0x83e   : > { %v3155_v30 = vadd.f32 %v3150_v9, %v3016_v34 }
 0x840   : > { %v3292_v31 = vadd.f32 %v3287_v44, %v3155_v30 }
 0x842   : > { %v3139_v60 = vpop.f32.mrf.mxu2  ;;  %v3276_v35 = vpop.f32.mrf.mxu0 }
 0x844   : > { %v3289_v1 = vpop.f32.mrf.mxu1 }
 0x845   : > { %v3152_v43 = vpop.f32.mrf.mxu3 }
 0x84e   : > { %v3317_v2 = vpop.f32.mrf.mxu2 }
 0x84f   : > { %v3330_v4 = vpop.f32.mrf.mxu3  ;;  %v3334_v25 = vadd.f32 %v3317_v2, %v3291_v56 }
 0x850   : > { %v3335_v57 = vadd.f32 %v3330_v4, %v3292_v31 }
 0x856   : > { %v3319_v8 = vpop.f32.mrf.mxu2 }
 0x857   : > { %v3332_v14 = vpop.f32.mrf.mxu3 }
 0x85a   : > { %v3454_v23 = vpop.f32.mrf.mxu0 }
 0x85b   : > { %v3467_v33 = vpop.f32.mrf.mxu1  ;;  %v3471_v61 = vadd.f32 %v3454_v23, %v3334_v25 }
 0x85c   : > { %v3472_v7 = vadd.f32 %v3467_v33, %v3335_v57 }
 0x862   : > { %v3591_v18 = vpop.f32.mrf.mxu2  ;;  %v3456_v39 = vpop.f32.mrf.mxu0 }
 0x863   : > { %v3604_v6 = vpop.f32.mrf.mxu3  ;;  %v3469_v10 = vpop.f32.mrf.mxu1  ;;  %v3608_v17 = vadd.f32 %v3591_v18, %v3471_v61 }
 0x864   : > { %v3609_v15 = vadd.f32 %v3604_v6, %v3472_v7 }
 0x86a   : > { %v3593_v20 = vpop.f32.mrf.mxu2 }
 0x86b   : > { %v3606_v58 = vpop.f32.mrf.mxu3 }
 0x86e   : > { %v3728_v52 = vpop.f32.mrf.mxu0 }
 0x86f   : > { %v3741_v13 = vpop.f32.mrf.mxu1  ;;  %v3745_v36 = vadd.f32 %v3728_v52, %v3608_v17 }
 0x870   : > { %v3746_v16 = vadd.f32 %v3741_v13, %v3609_v15 }
 0x876   : > { %v3865_v19 = vpop.f32.mrf.mxu2  ;;  %v3730_v40 = vpop.f32.mrf.mxu0 }
 0x877   : > { %v3882_v41 = vadd.f32 %v3865_v19, %v3745_v36  ;;  %v3878_v11 = vpop.f32.mrf.mxu3  ;;  %v3743_v45 = vpop.f32.mrf.mxu1 }
 0x878   : > { %v3883_v53 = vadd.f32 %v3878_v11, %v3746_v16 }
 0x879   : > { %v3884_v37 = vmax.f32 %v3882_v41, 0.0 }
 0x87a   : > { %v3885_v55 = vmax.f32 %v3883_v53, 0.0 }
 0x87b   : > { %v3886_v50 = vmul.f32 0.4, %v3884_v37 }
 0x87c   : > { %v3887_v26 = vmul.f32 0.4, %v3885_v55 }
 0x87d   : > { %v3888_v48 = vadd.f32 %v4331_v22, %v3886_v50 }
 0x87e   : > { %v3889_v38 = vadd.f32 %v4332_v28, %v3887_v26  ;;  %v3867_v42 = vpop.f32.mrf.mxu2 }
 0x87f   : > { %3890 = vst [vmem:[%s359_s23] sm:$0xff] %v3888_v48  ;;  %v3880_v63 = vpop.f32.mrf.mxu3 }
 0x880   : > { %3891 = vst [vmem:[%s359_s23 + $0x8] sm:$0xff] %v3889_v38 }
 0x881 PF: > { %s20_s13 = sadd.s32 1, %s4339_s13  }
 0x882   : > { %p17_p4 = scmp.ge.s32.totalorder %s20_s13, 4  }
 0x884   :  { %19 = sbr.rel (!%p17_p4) target bundleno = 1 (0x1), region = 137 }

</bundles_post_ra>
